<compile_context>
chip_gen: v6e
topology: v6e:2x2x1
jax: 0.10.0
libtpu: 0.0.40
codegen_flags: <defaults>
</compile_context>

<pallas_src>
import functools

import jax
import jax.numpy as jnp
from jax.experimental import pallas as pl
from jax.experimental.pallas import tpu as pltpu

C_IN, C_MID, C_OUT = 3, 16, 20       # Conv2d(3,16,1x1) -> Conv2d(16,20,1x1)
HW = 49                              # 7x7 obs; Linear(980,124) => 20*49 = 980
P_PAD = 64                           # spatial positions padded 49 -> 64 lanes
K_FC = C_OUT * P_PAD                 # 1280: K of the single fused fc matmul
N_FEATURES = 124                     # Linear(980, 124)
N_PAD = 128                          # lane-dense fc width inside the kernel
BLOCK_B_CAP = 256                    # max batch rows per grid step


def _fused_kernel(x_ref, w1_ref, b1_ref, w2_ref, b2_ref, w3_ref, b3_ref,
                  out_ref, h2_scr, *, sub):
    """conv1x1(3->16)+ReLU -> conv1x1(16->20)+ReLU -> flatten -> fc(1280->128)+ReLU.

    Per grid step over the batch:
      x_ref  : (3, bt, 64)  VMEM  channel-major, P padded 49->64 with zeros
      w1_ref : (3, 16)  SMEM      b1_ref : (16,)  SMEM
      w2_ref : (16, 20) SMEM      b2_ref : (20,)  SMEM
      w3_ref : (1280, 128) VMEM (f32 or bf16, resident)   b3_ref : (1, 128) VMEM f32
      out_ref: (bt, 124) VMEM f32
      h2_scr : (bt, 1280) VMEM f32 scratch -- lane-dense fc LHS (NCHW flatten order)
    """
    bt = out_ref.shape[0]
    n_sub = bt // sub

    # Row sub-tiles keep only `16 * ceil(sub/8)` h1 vregs live at once, so the
    # 64-entry register file never spills even at 256-row batch tiles.
    @pl.loop(0, n_sub)
    def _(s):
        r0 = pl.multiple_of(s * sub, sub)
        xs = [x_ref[c, pl.ds(r0, sub), :] for c in range(C_IN)]   # (sub, 64) each

        # conv1 (1x1, 3->16) + ReLU on the VPU: K=3 would leave the MXU idle,
        # and the VPU slots are free while the fc matmul runs on the MXU.
        h1 = []
        for j in range(C_MID):
            v = xs[0] * w1_ref[0, j]
            for c in range(1, C_IN):
                v = v + xs[c] * w1_ref[c, j]
            h1.append(jnp.maximum(v + b1_ref[j], 0.0))

        # conv2 (1x1, 16->20) + ReLU, staged lane-dense into the fc LHS scratch.
        # Channel j occupies lanes [j*64, (j+1)*64)  == NCHW flatten order, so
        # no activation transpose anywhere.  Lanes 49..63 of each channel hold
        # finite padding values that hit zero rows of w3 (zero contribution).
        for j in range(C_OUT):
            v = h1[0] * w2_ref[0, j]
            for c in range(1, C_MID):
                v = v + h1[c] * w2_ref[c, j]
            h2_scr[pl.ds(r0, sub), pl.ds(j * P_PAD, P_PAD)] = \
                jnp.maximum(v + b2_ref[j], 0.0)

    # Single K-dense fc contraction on the MXU (MRB accumulation on v7x);
    # f32 bias + ReLU epilogue regardless of weight dtype (v5e has no bf16 VPU).
    lhs = h2_scr[...].astype(w3_ref.dtype)
    y = jnp.dot(lhs, w3_ref[...], preferred_element_type=jnp.float32)
    out_ref[...] = jnp.maximum(y + b3_ref[...], 0.0)[:, :out_ref.shape[1]]


def _choose_block_b(B):
    """Batch rows per grid step: multiple of 8, <= 256, and >= 2 grid steps for
    B >= 16 so ("parallel",) shards across v7x's two TensorCores."""
    if B < 16:
        return 8
    return min(BLOCK_B_CAP, max(8, 8 * ((B // 2) // 8)))


def agent2_forward(x_nchw, params, *, block_b=None):
    """Pallas implementation of Agent2.forward.

    x_nchw: (B, 3, 7, 7) float32 NCHW (same as the PyTorch module).
    params: output of prepare_params().
    returns: (B, 124) float32 features.
    """
    w1, b1, w2, b2, w3p, b3p = params
    B, C, H, W = x_nchw.shape
    P = H * W
    assert C == C_IN and P == HW, "unexpected input shape"

    # (B,3,7,7) -> (3,B,49) -> pad P to 64: each channel becomes a contiguous,
    # tile-aligned (block_b, 64) slab inside the kernel (no sublane gather).
    x = jnp.transpose(x_nchw.reshape(B, C, P), (1, 0, 2)).astype(jnp.float32)
    x = jnp.pad(x, ((0, 0), (0, 0), (0, P_PAD - P)))

    if block_b is None:
        block_b = _choose_block_b(B)
    assert block_b % 8 == 0
    sub = 16 if block_b % 16 == 0 else 8
    grid = (pl.cdiv(B, block_b),)

    return pl.pallas_call(
        functools.partial(_fused_kernel, sub=sub),
        out_shape=jax.ShapeDtypeStruct((B, N_FEATURES), jnp.float32),
        grid=grid,
        in_specs=[
            pl.BlockSpec((C_IN, block_b, P_PAD), lambda i: (0, i, 0)),  # x tile
            pl.BlockSpec(memory_space=pltpu.MemorySpace.SMEM),          # w1 (3,16)
            pl.BlockSpec(memory_space=pltpu.MemorySpace.SMEM),          # b1 (16,)
            pl.BlockSpec(memory_space=pltpu.MemorySpace.SMEM),          # w2 (16,20)
            pl.BlockSpec(memory_space=pltpu.MemorySpace.SMEM),          # b2 (20,)
            pl.BlockSpec((K_FC, N_PAD), lambda i: (0, 0)),              # w3 resident
            pl.BlockSpec((1, N_PAD), lambda i: (0, 0)),                 # b3 resident
        ],
        out_specs=pl.BlockSpec((block_b, N_FEATURES), lambda i: (i, 0)),
        scratch_shapes=[pltpu.VMEM((block_b, K_FC), jnp.float32)],      # fc LHS
        compiler_params=pltpu.CompilerParams(
            dimension_semantics=("parallel",)),   # v7x: shard batch over 2 TCs
    )(x, w1, b1, w2, b2, w3p, b3p)


def init_raw_params(key, frames=C_IN, hw=HW):
    """Synthetic parameters with Agent2's shapes (PyTorch layout -> matmul form).

    Biases are small nonzero values purely to exercise the bias path
    (PyTorch's layer_init uses zeros; shapes/dtypes are identical).
    """
    k1, k2, k3, k4, k5, k6 = jax.random.split(key, 6)
    # Conv2d(3,16,1x1): torch weight (16,3,1,1) -> (3,16)
    w1 = jax.random.normal(k1, (frames, C_MID), jnp.float32) * (2.0 / frames) ** 0.5
    b1 = 0.1 * jax.random.normal(k4, (C_MID,), jnp.float32)
    # Conv2d(16,20,1x1): torch weight (20,16,1,1) -> (16,20)
    w2 = jax.random.normal(k2, (C_MID, C_OUT), jnp.float32) * (2.0 / C_MID) ** 0.5
    b2 = 0.1 * jax.random.normal(k5, (C_OUT,), jnp.float32)
    # Linear(980,124): torch weight (124,980) -> (980,124), rows in NCHW order
    w3 = jax.random.normal(k3, (C_OUT * hw, N_FEATURES), jnp.float32) \
        * (2.0 / (C_OUT * hw)) ** 0.5
    b3 = 0.1 * jax.random.normal(k6, (N_FEATURES,), jnp.float32)
    return (w1, b1, w2, b2, w3, b3)


def prepare_params(raw_params, w3_dtype=jnp.bfloat16):
    """One-time parameter prep (NOT in the hot path).

    * w3 rows are already in NCHW-flatten order (c*49 + p); reshape to
      (20, 49, 124), zero-pad to (20, 64, 128) and flatten to (1280, 128) so the
      kernel consumes the lane-dense scratch with ONE matmul.
    * w3 defaults to bf16 on all generations (f32 accumulation / epilogue).
    """
    w1, b1, w2, b2, w3, b3 = raw_params
    w3r = w3.reshape(C_OUT, HW, N_FEATURES)
    w3r = jnp.pad(w3r, ((0, 0), (0, P_PAD - HW), (0, N_PAD - N_FEATURES)))
    w3r = w3r.reshape(K_FC, N_PAD).astype(w3_dtype)
    b3r = jnp.pad(b3, (0, N_PAD - N_FEATURES)).reshape(1, N_PAD).astype(jnp.float32)
    return (w1.astype(jnp.float32), b1.astype(jnp.float32),
            w2.astype(jnp.float32), b2.astype(jnp.float32), w3r, b3r)


def reference_forward(x_nchw, raw_params, w3_dtype=jnp.float32):
    """Pure-JAX replica of the PyTorch module (NCHW flatten order)."""
    w1, b1, w2, b2, w3, b3 = raw_params
    B, C, H, W = x_nchw.shape
    P = H * W
    x2d = jnp.transpose(x_nchw, (0, 2, 3, 1)).reshape(B * P, C)
    r1 = jnp.maximum(x2d @ w1 + b1, 0.0)
    r2 = jnp.maximum(r1 @ w2 + b2, 0.0)
    rflat = jnp.transpose(r2.reshape(B, P, C_OUT), (0, 2, 1)).reshape(B, -1)
    y = jnp.dot(rflat.astype(w3_dtype), w3.astype(w3_dtype),
                preferred_element_type=jnp.float32) + b3
    return jnp.maximum(y, 0.0)


if __name__ == "__main__":
    key = jax.random.PRNGKey(0)
    kx, kx2, kp = jax.random.split(key, 3)

    B, C, H, W = 16, 3, 7, 7          # minigrid doorkey obs: 3 channels, 7x7 grid
    x = jax.random.uniform(kx, (B, C, H, W), jnp.float32, 0.0, 10.0)
    raw = init_raw_params(kp)

    fwd = jax.jit(agent2_forward)

    # f32 weights.  B=16 -> block_b=8, grid=2 (>=2 steps: both v7x TCs active).
    feat = jax.block_until_ready(fwd(x, prepare_params(raw, jnp.float32)))
    assert feat.shape == (B, N_FEATURES), feat.shape
    assert feat.dtype == jnp.float32
    ref = reference_forward(x, raw)
    assert jnp.allclose(feat, ref, atol=5e-4, rtol=5e-4), \
        float(jnp.max(jnp.abs(feat - ref)))

    # Default bf16 w3 (all generations): f32 convs, bf16 MXU, f32 epilogue.
    feat_bf = jax.block_until_ready(fwd(x, prepare_params(raw)))
    ref_bf = reference_forward(x, raw, w3_dtype=jnp.bfloat16)
    assert jnp.allclose(feat_bf, ref_bf, atol=2e-2, rtol=2e-2), \
        float(jnp.max(jnp.abs(feat_bf - ref_bf)))

    # Larger batch: block_b=16 (sub=16), grid=3 with a ragged (masked) last tile.
    B2 = 40
    x2 = jax.random.uniform(kx2, (B2, C, H, W), jnp.float32, 0.0, 10.0)
    feat2 = jax.block_until_ready(fwd(x2, prepare_params(raw, jnp.float32)))
    ref2 = reference_forward(x2, raw)
    assert feat2.shape == (B2, N_FEATURES)
    assert jnp.allclose(feat2, ref2, atol=5e-4, rtol=5e-4), \
        float(jnp.max(jnp.abs(feat2 - ref2)))

    print("KERNEL_OK")
</pallas_src>

<mosaic_0001>
module attributes {stable_mosaic.version = 11 : i64} {
  func.func @_fused_kernel(%arg0: i32, %arg1: memref<3x8x64xf32, #tpu.memory_space<vmem>>, %arg2: memref<3x16xf32, #tpu.memory_space<smem>>, %arg3: memref<16xf32, #tpu.memory_space<smem>>, %arg4: memref<16x20xf32, #tpu.memory_space<smem>>, %arg5: memref<20xf32, #tpu.memory_space<smem>>, %arg6: memref<1280x128xf32, #tpu.memory_space<vmem>>, %arg7: memref<1x128xf32, #tpu.memory_space<vmem>>, %arg8: memref<8x124xf32, #tpu.memory_space<vmem>>, %arg9: memref<8x1280xf32, #tpu.memory_space<vmem>>) attributes {dimension_semantics = [#tpu.dimension_semantics<parallel>], iteration_bounds = array<i64: 2>, scalar_prefetch = 0 : i64, scratch_operands = 1 : i64, tpu.core_type = #tpu.core_type<tc>, window_params = [{transform_indices = @transform_0, window_bounds = array<i64: 3, 8, 64>}, {transform_indices = @transform_1, window_bounds = array<i64: 3, 16>}, {transform_indices = @transform_2, window_bounds = array<i64: 16>}, {transform_indices = @transform_3, window_bounds = array<i64: 16, 20>}, {transform_indices = @transform_4, window_bounds = array<i64: 20>}, {pipeline_mode = #tpu.pipeline_mode<synchronous>, transform_indices = @transform_5, window_bounds = array<i64: 1280, 128>}, {pipeline_mode = #tpu.pipeline_mode<synchronous>, transform_indices = @transform_6, window_bounds = array<i64: 1, 128>}, {transform_indices = @transform_7, window_bounds = array<i64: 8, 124>}]} {
    %c0_i32 = arith.constant 0 : i32
    %c1_i32 = arith.constant 1 : i32
    %0 = arith.muli %c0_i32, %c1_i32 : i32
    %c0_i32_0 = arith.constant 0 : i32
    %1 = arith.addi %c0_i32_0, %0 : i32
    %c8_i32 = arith.constant 8 : i32
    %2 = arith.muli %1, %c8_i32 : i32
    %3 = tpu.assume_multiple %2, 8 : i32
    %c0 = arith.constant 0 : index
    %4 = arith.index_cast %3 : i32 to index
    %c0_1 = arith.constant 0 : index
    %5 = vector.load %arg1[%c0, %4, %c0_1] : memref<3x8x64xf32, #tpu.memory_space<vmem>>, vector<1x8x64xf32>
    %6 = vector.shape_cast %5 : vector<1x8x64xf32> to vector<8x64xf32>
    %c1 = arith.constant 1 : index
    %7 = arith.index_cast %3 : i32 to index
    %c0_2 = arith.constant 0 : index
    %8 = vector.load %arg1[%c1, %7, %c0_2] : memref<3x8x64xf32, #tpu.memory_space<vmem>>, vector<1x8x64xf32>
    %9 = vector.shape_cast %8 : vector<1x8x64xf32> to vector<8x64xf32>
    %c2 = arith.constant 2 : index
    %10 = arith.index_cast %3 : i32 to index
    %c0_3 = arith.constant 0 : index
    %11 = vector.load %arg1[%c2, %10, %c0_3] : memref<3x8x64xf32, #tpu.memory_space<vmem>>, vector<1x8x64xf32>
    %12 = vector.shape_cast %11 : vector<1x8x64xf32> to vector<8x64xf32>
    %c0_4 = arith.constant 0 : index
    %c0_5 = arith.constant 0 : index
    %13 = memref.load %arg2[%c0_4, %c0_5] : memref<3x16xf32, #tpu.memory_space<smem>>
    %14 = vector.broadcast %13 : f32 to vector<8x64xf32>
    %15 = arith.mulf %6, %14 : vector<8x64xf32>
    %c1_6 = arith.constant 1 : index
    %c0_7 = arith.constant 0 : index
    %16 = memref.load %arg2[%c1_6, %c0_7] : memref<3x16xf32, #tpu.memory_space<smem>>
    %17 = vector.broadcast %16 : f32 to vector<8x64xf32>
    %18 = arith.mulf %9, %17 : vector<8x64xf32>
    %19 = arith.addf %15, %18 : vector<8x64xf32>
    %c2_8 = arith.constant 2 : index
    %c0_9 = arith.constant 0 : index
    %20 = memref.load %arg2[%c2_8, %c0_9] : memref<3x16xf32, #tpu.memory_space<smem>>
    %21 = vector.broadcast %20 : f32 to vector<8x64xf32>
    %22 = arith.mulf %12, %21 : vector<8x64xf32>
    %23 = arith.addf %19, %22 : vector<8x64xf32>
    %c0_10 = arith.constant 0 : index
    %24 = memref.load %arg3[%c0_10] : memref<16xf32, #tpu.memory_space<smem>>
    %25 = vector.broadcast %24 : f32 to vector<8x64xf32>
    %26 = arith.addf %23, %25 : vector<8x64xf32>
    %cst = arith.constant 0.000000e+00 : f32
    %27 = vector.broadcast %cst : f32 to vector<8x64xf32>
    %28 = arith.maximumf %26, %27 : vector<8x64xf32>
    %c0_11 = arith.constant 0 : index
    %c1_12 = arith.constant 1 : index
    %29 = memref.load %arg2[%c0_11, %c1_12] : memref<3x16xf32, #tpu.memory_space<smem>>
    %30 = vector.broadcast %29 : f32 to vector<8x64xf32>
    %31 = arith.mulf %6, %30 : vector<8x64xf32>
    %c1_13 = arith.constant 1 : index
    %c1_14 = arith.constant 1 : index
    %32 = memref.load %arg2[%c1_13, %c1_14] : memref<3x16xf32, #tpu.memory_space<smem>>
    %33 = vector.broadcast %32 : f32 to vector<8x64xf32>
    %34 = arith.mulf %9, %33 : vector<8x64xf32>
    %35 = arith.addf %31, %34 : vector<8x64xf32>
    %c2_15 = arith.constant 2 : index
    %c1_16 = arith.constant 1 : index
    %36 = memref.load %arg2[%c2_15, %c1_16] : memref<3x16xf32, #tpu.memory_space<smem>>
    %37 = vector.broadcast %36 : f32 to vector<8x64xf32>
    %38 = arith.mulf %12, %37 : vector<8x64xf32>
    %39 = arith.addf %35, %38 : vector<8x64xf32>
    %c1_17 = arith.constant 1 : index
    %40 = memref.load %arg3[%c1_17] : memref<16xf32, #tpu.memory_space<smem>>
    %41 = vector.broadcast %40 : f32 to vector<8x64xf32>
    %42 = arith.addf %39, %41 : vector<8x64xf32>
    %cst_18 = arith.constant 0.000000e+00 : f32
    %43 = vector.broadcast %cst_18 : f32 to vector<8x64xf32>
    %44 = arith.maximumf %42, %43 : vector<8x64xf32>
    %c0_19 = arith.constant 0 : index
    %c2_20 = arith.constant 2 : index
    %45 = memref.load %arg2[%c0_19, %c2_20] : memref<3x16xf32, #tpu.memory_space<smem>>
    %46 = vector.broadcast %45 : f32 to vector<8x64xf32>
    %47 = arith.mulf %6, %46 : vector<8x64xf32>
    %c1_21 = arith.constant 1 : index
    %c2_22 = arith.constant 2 : index
    %48 = memref.load %arg2[%c1_21, %c2_22] : memref<3x16xf32, #tpu.memory_space<smem>>
    %49 = vector.broadcast %48 : f32 to vector<8x64xf32>
    %50 = arith.mulf %9, %49 : vector<8x64xf32>
    %51 = arith.addf %47, %50 : vector<8x64xf32>
    %c2_23 = arith.constant 2 : index
    %c2_24 = arith.constant 2 : index
    %52 = memref.load %arg2[%c2_23, %c2_24] : memref<3x16xf32, #tpu.memory_space<smem>>
    %53 = vector.broadcast %52 : f32 to vector<8x64xf32>
    %54 = arith.mulf %12, %53 : vector<8x64xf32>
    %55 = arith.addf %51, %54 : vector<8x64xf32>
    %c2_25 = arith.constant 2 : index
    %56 = memref.load %arg3[%c2_25] : memref<16xf32, #tpu.memory_space<smem>>
    %57 = vector.broadcast %56 : f32 to vector<8x64xf32>
    %58 = arith.addf %55, %57 : vector<8x64xf32>
    %cst_26 = arith.constant 0.000000e+00 : f32
    %59 = vector.broadcast %cst_26 : f32 to vector<8x64xf32>
    %60 = arith.maximumf %58, %59 : vector<8x64xf32>
    %c0_27 = arith.constant 0 : index
    %c3 = arith.constant 3 : index
    %61 = memref.load %arg2[%c0_27, %c3] : memref<3x16xf32, #tpu.memory_space<smem>>
    %62 = vector.broadcast %61 : f32 to vector<8x64xf32>
    %63 = arith.mulf %6, %62 : vector<8x64xf32>
    %c1_28 = arith.constant 1 : index
    %c3_29 = arith.constant 3 : index
    %64 = memref.load %arg2[%c1_28, %c3_29] : memref<3x16xf32, #tpu.memory_space<smem>>
    %65 = vector.broadcast %64 : f32 to vector<8x64xf32>
    %66 = arith.mulf %9, %65 : vector<8x64xf32>
    %67 = arith.addf %63, %66 : vector<8x64xf32>
    %c2_30 = arith.constant 2 : index
    %c3_31 = arith.constant 3 : index
    %68 = memref.load %arg2[%c2_30, %c3_31] : memref<3x16xf32, #tpu.memory_space<smem>>
    %69 = vector.broadcast %68 : f32 to vector<8x64xf32>
    %70 = arith.mulf %12, %69 : vector<8x64xf32>
    %71 = arith.addf %67, %70 : vector<8x64xf32>
    %c3_32 = arith.constant 3 : index
    %72 = memref.load %arg3[%c3_32] : memref<16xf32, #tpu.memory_space<smem>>
    %73 = vector.broadcast %72 : f32 to vector<8x64xf32>
    %74 = arith.addf %71, %73 : vector<8x64xf32>
    %cst_33 = arith.constant 0.000000e+00 : f32
    %75 = vector.broadcast %cst_33 : f32 to vector<8x64xf32>
    %76 = arith.maximumf %74, %75 : vector<8x64xf32>
    %c0_34 = arith.constant 0 : index
    %c4 = arith.constant 4 : index
    %77 = memref.load %arg2[%c0_34, %c4] : memref<3x16xf32, #tpu.memory_space<smem>>
    %78 = vector.broadcast %77 : f32 to vector<8x64xf32>
    %79 = arith.mulf %6, %78 : vector<8x64xf32>
    %c1_35 = arith.constant 1 : index
    %c4_36 = arith.constant 4 : index
    %80 = memref.load %arg2[%c1_35, %c4_36] : memref<3x16xf32, #tpu.memory_space<smem>>
    %81 = vector.broadcast %80 : f32 to vector<8x64xf32>
    %82 = arith.mulf %9, %81 : vector<8x64xf32>
    %83 = arith.addf %79, %82 : vector<8x64xf32>
    %c2_37 = arith.constant 2 : index
    %c4_38 = arith.constant 4 : index
    %84 = memref.load %arg2[%c2_37, %c4_38] : memref<3x16xf32, #tpu.memory_space<smem>>
    %85 = vector.broadcast %84 : f32 to vector<8x64xf32>
    %86 = arith.mulf %12, %85 : vector<8x64xf32>
    %87 = arith.addf %83, %86 : vector<8x64xf32>
    %c4_39 = arith.constant 4 : index
    %88 = memref.load %arg3[%c4_39] : memref<16xf32, #tpu.memory_space<smem>>
    %89 = vector.broadcast %88 : f32 to vector<8x64xf32>
    %90 = arith.addf %87, %89 : vector<8x64xf32>
    %cst_40 = arith.constant 0.000000e+00 : f32
    %91 = vector.broadcast %cst_40 : f32 to vector<8x64xf32>
    %92 = arith.maximumf %90, %91 : vector<8x64xf32>
    %c0_41 = arith.constant 0 : index
    %c5 = arith.constant 5 : index
    %93 = memref.load %arg2[%c0_41, %c5] : memref<3x16xf32, #tpu.memory_space<smem>>
    %94 = vector.broadcast %93 : f32 to vector<8x64xf32>
    %95 = arith.mulf %6, %94 : vector<8x64xf32>
    %c1_42 = arith.constant 1 : index
    %c5_43 = arith.constant 5 : index
    %96 = memref.load %arg2[%c1_42, %c5_43] : memref<3x16xf32, #tpu.memory_space<smem>>
    %97 = vector.broadcast %96 : f32 to vector<8x64xf32>
    %98 = arith.mulf %9, %97 : vector<8x64xf32>
    %99 = arith.addf %95, %98 : vector<8x64xf32>
    %c2_44 = arith.constant 2 : index
    %c5_45 = arith.constant 5 : index
    %100 = memref.load %arg2[%c2_44, %c5_45] : memref<3x16xf32, #tpu.memory_space<smem>>
    %101 = vector.broadcast %100 : f32 to vector<8x64xf32>
    %102 = arith.mulf %12, %101 : vector<8x64xf32>
    %103 = arith.addf %99, %102 : vector<8x64xf32>
    %c5_46 = arith.constant 5 : index
    %104 = memref.load %arg3[%c5_46] : memref<16xf32, #tpu.memory_space<smem>>
    %105 = vector.broadcast %104 : f32 to vector<8x64xf32>
    %106 = arith.addf %103, %105 : vector<8x64xf32>
    %cst_47 = arith.constant 0.000000e+00 : f32
    %107 = vector.broadcast %cst_47 : f32 to vector<8x64xf32>
    %108 = arith.maximumf %106, %107 : vector<8x64xf32>
    %c0_48 = arith.constant 0 : index
    %c6 = arith.constant 6 : index
    %109 = memref.load %arg2[%c0_48, %c6] : memref<3x16xf32, #tpu.memory_space<smem>>
    %110 = vector.broadcast %109 : f32 to vector<8x64xf32>
    %111 = arith.mulf %6, %110 : vector<8x64xf32>
    %c1_49 = arith.constant 1 : index
    %c6_50 = arith.constant 6 : index
    %112 = memref.load %arg2[%c1_49, %c6_50] : memref<3x16xf32, #tpu.memory_space<smem>>
    %113 = vector.broadcast %112 : f32 to vector<8x64xf32>
    %114 = arith.mulf %9, %113 : vector<8x64xf32>
    %115 = arith.addf %111, %114 : vector<8x64xf32>
    %c2_51 = arith.constant 2 : index
    %c6_52 = arith.constant 6 : index
    %116 = memref.load %arg2[%c2_51, %c6_52] : memref<3x16xf32, #tpu.memory_space<smem>>
    %117 = vector.broadcast %116 : f32 to vector<8x64xf32>
    %118 = arith.mulf %12, %117 : vector<8x64xf32>
    %119 = arith.addf %115, %118 : vector<8x64xf32>
    %c6_53 = arith.constant 6 : index
    %120 = memref.load %arg3[%c6_53] : memref<16xf32, #tpu.memory_space<smem>>
    %121 = vector.broadcast %120 : f32 to vector<8x64xf32>
    %122 = arith.addf %119, %121 : vector<8x64xf32>
    %cst_54 = arith.constant 0.000000e+00 : f32
    %123 = vector.broadcast %cst_54 : f32 to vector<8x64xf32>
    %124 = arith.maximumf %122, %123 : vector<8x64xf32>
    %c0_55 = arith.constant 0 : index
    %c7 = arith.constant 7 : index
    %125 = memref.load %arg2[%c0_55, %c7] : memref<3x16xf32, #tpu.memory_space<smem>>
    %126 = vector.broadcast %125 : f32 to vector<8x64xf32>
    %127 = arith.mulf %6, %126 : vector<8x64xf32>
    %c1_56 = arith.constant 1 : index
    %c7_57 = arith.constant 7 : index
    %128 = memref.load %arg2[%c1_56, %c7_57] : memref<3x16xf32, #tpu.memory_space<smem>>
    %129 = vector.broadcast %128 : f32 to vector<8x64xf32>
    %130 = arith.mulf %9, %129 : vector<8x64xf32>
    %131 = arith.addf %127, %130 : vector<8x64xf32>
    %c2_58 = arith.constant 2 : index
    %c7_59 = arith.constant 7 : index
    %132 = memref.load %arg2[%c2_58, %c7_59] : memref<3x16xf32, #tpu.memory_space<smem>>
    %133 = vector.broadcast %132 : f32 to vector<8x64xf32>
    %134 = arith.mulf %12, %133 : vector<8x64xf32>
    %135 = arith.addf %131, %134 : vector<8x64xf32>
    %c7_60 = arith.constant 7 : index
    %136 = memref.load %arg3[%c7_60] : memref<16xf32, #tpu.memory_space<smem>>
    %137 = vector.broadcast %136 : f32 to vector<8x64xf32>
    %138 = arith.addf %135, %137 : vector<8x64xf32>
    %cst_61 = arith.constant 0.000000e+00 : f32
    %139 = vector.broadcast %cst_61 : f32 to vector<8x64xf32>
    %140 = arith.maximumf %138, %139 : vector<8x64xf32>
    %c0_62 = arith.constant 0 : index
    %c8 = arith.constant 8 : index
    %141 = memref.load %arg2[%c0_62, %c8] : memref<3x16xf32, #tpu.memory_space<smem>>
    %142 = vector.broadcast %141 : f32 to vector<8x64xf32>
    %143 = arith.mulf %6, %142 : vector<8x64xf32>
    %c1_63 = arith.constant 1 : index
    %c8_64 = arith.constant 8 : index
    %144 = memref.load %arg2[%c1_63, %c8_64] : memref<3x16xf32, #tpu.memory_space<smem>>
    %145 = vector.broadcast %144 : f32 to vector<8x64xf32>
    %146 = arith.mulf %9, %145 : vector<8x64xf32>
    %147 = arith.addf %143, %146 : vector<8x64xf32>
    %c2_65 = arith.constant 2 : index
    %c8_66 = arith.constant 8 : index
    %148 = memref.load %arg2[%c2_65, %c8_66] : memref<3x16xf32, #tpu.memory_space<smem>>
    %149 = vector.broadcast %148 : f32 to vector<8x64xf32>
    %150 = arith.mulf %12, %149 : vector<8x64xf32>
    %151 = arith.addf %147, %150 : vector<8x64xf32>
    %c8_67 = arith.constant 8 : index
    %152 = memref.load %arg3[%c8_67] : memref<16xf32, #tpu.memory_space<smem>>
    %153 = vector.broadcast %152 : f32 to vector<8x64xf32>
    %154 = arith.addf %151, %153 : vector<8x64xf32>
    %cst_68 = arith.constant 0.000000e+00 : f32
    %155 = vector.broadcast %cst_68 : f32 to vector<8x64xf32>
    %156 = arith.maximumf %154, %155 : vector<8x64xf32>
    %c0_69 = arith.constant 0 : index
    %c9 = arith.constant 9 : index
    %157 = memref.load %arg2[%c0_69, %c9] : memref<3x16xf32, #tpu.memory_space<smem>>
    %158 = vector.broadcast %157 : f32 to vector<8x64xf32>
    %159 = arith.mulf %6, %158 : vector<8x64xf32>
    %c1_70 = arith.constant 1 : index
    %c9_71 = arith.constant 9 : index
    %160 = memref.load %arg2[%c1_70, %c9_71] : memref<3x16xf32, #tpu.memory_space<smem>>
    %161 = vector.broadcast %160 : f32 to vector<8x64xf32>
    %162 = arith.mulf %9, %161 : vector<8x64xf32>
    %163 = arith.addf %159, %162 : vector<8x64xf32>
    %c2_72 = arith.constant 2 : index
    %c9_73 = arith.constant 9 : index
    %164 = memref.load %arg2[%c2_72, %c9_73] : memref<3x16xf32, #tpu.memory_space<smem>>
    %165 = vector.broadcast %164 : f32 to vector<8x64xf32>
    %166 = arith.mulf %12, %165 : vector<8x64xf32>
    %167 = arith.addf %163, %166 : vector<8x64xf32>
    %c9_74 = arith.constant 9 : index
    %168 = memref.load %arg3[%c9_74] : memref<16xf32, #tpu.memory_space<smem>>
    %169 = vector.broadcast %168 : f32 to vector<8x64xf32>
    %170 = arith.addf %167, %169 : vector<8x64xf32>
    %cst_75 = arith.constant 0.000000e+00 : f32
    %171 = vector.broadcast %cst_75 : f32 to vector<8x64xf32>
    %172 = arith.maximumf %170, %171 : vector<8x64xf32>
    %c0_76 = arith.constant 0 : index
    %c10 = arith.constant 10 : index
    %173 = memref.load %arg2[%c0_76, %c10] : memref<3x16xf32, #tpu.memory_space<smem>>
    %174 = vector.broadcast %173 : f32 to vector<8x64xf32>
    %175 = arith.mulf %6, %174 : vector<8x64xf32>
    %c1_77 = arith.constant 1 : index
    %c10_78 = arith.constant 10 : index
    %176 = memref.load %arg2[%c1_77, %c10_78] : memref<3x16xf32, #tpu.memory_space<smem>>
    %177 = vector.broadcast %176 : f32 to vector<8x64xf32>
    %178 = arith.mulf %9, %177 : vector<8x64xf32>
    %179 = arith.addf %175, %178 : vector<8x64xf32>
    %c2_79 = arith.constant 2 : index
    %c10_80 = arith.constant 10 : index
    %180 = memref.load %arg2[%c2_79, %c10_80] : memref<3x16xf32, #tpu.memory_space<smem>>
    %181 = vector.broadcast %180 : f32 to vector<8x64xf32>
    %182 = arith.mulf %12, %181 : vector<8x64xf32>
    %183 = arith.addf %179, %182 : vector<8x64xf32>
    %c10_81 = arith.constant 10 : index
    %184 = memref.load %arg3[%c10_81] : memref<16xf32, #tpu.memory_space<smem>>
    %185 = vector.broadcast %184 : f32 to vector<8x64xf32>
    %186 = arith.addf %183, %185 : vector<8x64xf32>
    %cst_82 = arith.constant 0.000000e+00 : f32
    %187 = vector.broadcast %cst_82 : f32 to vector<8x64xf32>
    %188 = arith.maximumf %186, %187 : vector<8x64xf32>
    %c0_83 = arith.constant 0 : index
    %c11 = arith.constant 11 : index
    %189 = memref.load %arg2[%c0_83, %c11] : memref<3x16xf32, #tpu.memory_space<smem>>
    %190 = vector.broadcast %189 : f32 to vector<8x64xf32>
    %191 = arith.mulf %6, %190 : vector<8x64xf32>
    %c1_84 = arith.constant 1 : index
    %c11_85 = arith.constant 11 : index
    %192 = memref.load %arg2[%c1_84, %c11_85] : memref<3x16xf32, #tpu.memory_space<smem>>
    %193 = vector.broadcast %192 : f32 to vector<8x64xf32>
    %194 = arith.mulf %9, %193 : vector<8x64xf32>
    %195 = arith.addf %191, %194 : vector<8x64xf32>
    %c2_86 = arith.constant 2 : index
    %c11_87 = arith.constant 11 : index
    %196 = memref.load %arg2[%c2_86, %c11_87] : memref<3x16xf32, #tpu.memory_space<smem>>
    %197 = vector.broadcast %196 : f32 to vector<8x64xf32>
    %198 = arith.mulf %12, %197 : vector<8x64xf32>
    %199 = arith.addf %195, %198 : vector<8x64xf32>
    %c11_88 = arith.constant 11 : index
    %200 = memref.load %arg3[%c11_88] : memref<16xf32, #tpu.memory_space<smem>>
    %201 = vector.broadcast %200 : f32 to vector<8x64xf32>
    %202 = arith.addf %199, %201 : vector<8x64xf32>
    %cst_89 = arith.constant 0.000000e+00 : f32
    %203 = vector.broadcast %cst_89 : f32 to vector<8x64xf32>
    %204 = arith.maximumf %202, %203 : vector<8x64xf32>
    %c0_90 = arith.constant 0 : index
    %c12 = arith.constant 12 : index
    %205 = memref.load %arg2[%c0_90, %c12] : memref<3x16xf32, #tpu.memory_space<smem>>
    %206 = vector.broadcast %205 : f32 to vector<8x64xf32>
    %207 = arith.mulf %6, %206 : vector<8x64xf32>
    %c1_91 = arith.constant 1 : index
    %c12_92 = arith.constant 12 : index
    %208 = memref.load %arg2[%c1_91, %c12_92] : memref<3x16xf32, #tpu.memory_space<smem>>
    %209 = vector.broadcast %208 : f32 to vector<8x64xf32>
    %210 = arith.mulf %9, %209 : vector<8x64xf32>
    %211 = arith.addf %207, %210 : vector<8x64xf32>
    %c2_93 = arith.constant 2 : index
    %c12_94 = arith.constant 12 : index
    %212 = memref.load %arg2[%c2_93, %c12_94] : memref<3x16xf32, #tpu.memory_space<smem>>
    %213 = vector.broadcast %212 : f32 to vector<8x64xf32>
    %214 = arith.mulf %12, %213 : vector<8x64xf32>
    %215 = arith.addf %211, %214 : vector<8x64xf32>
    %c12_95 = arith.constant 12 : index
    %216 = memref.load %arg3[%c12_95] : memref<16xf32, #tpu.memory_space<smem>>
    %217 = vector.broadcast %216 : f32 to vector<8x64xf32>
    %218 = arith.addf %215, %217 : vector<8x64xf32>
    %cst_96 = arith.constant 0.000000e+00 : f32
    %219 = vector.broadcast %cst_96 : f32 to vector<8x64xf32>
    %220 = arith.maximumf %218, %219 : vector<8x64xf32>
    %c0_97 = arith.constant 0 : index
    %c13 = arith.constant 13 : index
    %221 = memref.load %arg2[%c0_97, %c13] : memref<3x16xf32, #tpu.memory_space<smem>>
    %222 = vector.broadcast %221 : f32 to vector<8x64xf32>
    %223 = arith.mulf %6, %222 : vector<8x64xf32>
    %c1_98 = arith.constant 1 : index
    %c13_99 = arith.constant 13 : index
    %224 = memref.load %arg2[%c1_98, %c13_99] : memref<3x16xf32, #tpu.memory_space<smem>>
    %225 = vector.broadcast %224 : f32 to vector<8x64xf32>
    %226 = arith.mulf %9, %225 : vector<8x64xf32>
    %227 = arith.addf %223, %226 : vector<8x64xf32>
    %c2_100 = arith.constant 2 : index
    %c13_101 = arith.constant 13 : index
    %228 = memref.load %arg2[%c2_100, %c13_101] : memref<3x16xf32, #tpu.memory_space<smem>>
    %229 = vector.broadcast %228 : f32 to vector<8x64xf32>
    %230 = arith.mulf %12, %229 : vector<8x64xf32>
    %231 = arith.addf %227, %230 : vector<8x64xf32>
    %c13_102 = arith.constant 13 : index
    %232 = memref.load %arg3[%c13_102] : memref<16xf32, #tpu.memory_space<smem>>
    %233 = vector.broadcast %232 : f32 to vector<8x64xf32>
    %234 = arith.addf %231, %233 : vector<8x64xf32>
    %cst_103 = arith.constant 0.000000e+00 : f32
    %235 = vector.broadcast %cst_103 : f32 to vector<8x64xf32>
    %236 = arith.maximumf %234, %235 : vector<8x64xf32>
    %c0_104 = arith.constant 0 : index
    %c14 = arith.constant 14 : index
    %237 = memref.load %arg2[%c0_104, %c14] : memref<3x16xf32, #tpu.memory_space<smem>>
    %238 = vector.broadcast %237 : f32 to vector<8x64xf32>
    %239 = arith.mulf %6, %238 : vector<8x64xf32>
    %c1_105 = arith.constant 1 : index
    %c14_106 = arith.constant 14 : index
    %240 = memref.load %arg2[%c1_105, %c14_106] : memref<3x16xf32, #tpu.memory_space<smem>>
    %241 = vector.broadcast %240 : f32 to vector<8x64xf32>
    %242 = arith.mulf %9, %241 : vector<8x64xf32>
    %243 = arith.addf %239, %242 : vector<8x64xf32>
    %c2_107 = arith.constant 2 : index
    %c14_108 = arith.constant 14 : index
    %244 = memref.load %arg2[%c2_107, %c14_108] : memref<3x16xf32, #tpu.memory_space<smem>>
    %245 = vector.broadcast %244 : f32 to vector<8x64xf32>
    %246 = arith.mulf %12, %245 : vector<8x64xf32>
    %247 = arith.addf %243, %246 : vector<8x64xf32>
    %c14_109 = arith.constant 14 : index
    %248 = memref.load %arg3[%c14_109] : memref<16xf32, #tpu.memory_space<smem>>
    %249 = vector.broadcast %248 : f32 to vector<8x64xf32>
    %250 = arith.addf %247, %249 : vector<8x64xf32>
    %cst_110 = arith.constant 0.000000e+00 : f32
    %251 = vector.broadcast %cst_110 : f32 to vector<8x64xf32>
    %252 = arith.maximumf %250, %251 : vector<8x64xf32>
    %c0_111 = arith.constant 0 : index
    %c15 = arith.constant 15 : index
    %253 = memref.load %arg2[%c0_111, %c15] : memref<3x16xf32, #tpu.memory_space<smem>>
    %254 = vector.broadcast %253 : f32 to vector<8x64xf32>
    %255 = arith.mulf %6, %254 : vector<8x64xf32>
    %c1_112 = arith.constant 1 : index
    %c15_113 = arith.constant 15 : index
    %256 = memref.load %arg2[%c1_112, %c15_113] : memref<3x16xf32, #tpu.memory_space<smem>>
    %257 = vector.broadcast %256 : f32 to vector<8x64xf32>
    %258 = arith.mulf %9, %257 : vector<8x64xf32>
    %259 = arith.addf %255, %258 : vector<8x64xf32>
    %c2_114 = arith.constant 2 : index
    %c15_115 = arith.constant 15 : index
    %260 = memref.load %arg2[%c2_114, %c15_115] : memref<3x16xf32, #tpu.memory_space<smem>>
    %261 = vector.broadcast %260 : f32 to vector<8x64xf32>
    %262 = arith.mulf %12, %261 : vector<8x64xf32>
    %263 = arith.addf %259, %262 : vector<8x64xf32>
    %c15_116 = arith.constant 15 : index
    %264 = memref.load %arg3[%c15_116] : memref<16xf32, #tpu.memory_space<smem>>
    %265 = vector.broadcast %264 : f32 to vector<8x64xf32>
    %266 = arith.addf %263, %265 : vector<8x64xf32>
    %cst_117 = arith.constant 0.000000e+00 : f32
    %267 = vector.broadcast %cst_117 : f32 to vector<8x64xf32>
    %268 = arith.maximumf %266, %267 : vector<8x64xf32>
    %c0_118 = arith.constant 0 : index
    %c0_119 = arith.constant 0 : index
    %269 = memref.load %arg4[%c0_118, %c0_119] : memref<16x20xf32, #tpu.memory_space<smem>>
    %270 = vector.broadcast %269 : f32 to vector<8x64xf32>
    %271 = arith.mulf %28, %270 : vector<8x64xf32>
    %c1_120 = arith.constant 1 : index
    %c0_121 = arith.constant 0 : index
    %272 = memref.load %arg4[%c1_120, %c0_121] : memref<16x20xf32, #tpu.memory_space<smem>>
    %273 = vector.broadcast %272 : f32 to vector<8x64xf32>
    %274 = arith.mulf %44, %273 : vector<8x64xf32>
    %275 = arith.addf %271, %274 : vector<8x64xf32>
    %c2_122 = arith.constant 2 : index
    %c0_123 = arith.constant 0 : index
    %276 = memref.load %arg4[%c2_122, %c0_123] : memref<16x20xf32, #tpu.memory_space<smem>>
    %277 = vector.broadcast %276 : f32 to vector<8x64xf32>
    %278 = arith.mulf %60, %277 : vector<8x64xf32>
    %279 = arith.addf %275, %278 : vector<8x64xf32>
    %c3_124 = arith.constant 3 : index
    %c0_125 = arith.constant 0 : index
    %280 = memref.load %arg4[%c3_124, %c0_125] : memref<16x20xf32, #tpu.memory_space<smem>>
    %281 = vector.broadcast %280 : f32 to vector<8x64xf32>
    %282 = arith.mulf %76, %281 : vector<8x64xf32>
    %283 = arith.addf %279, %282 : vector<8x64xf32>
    %c4_126 = arith.constant 4 : index
    %c0_127 = arith.constant 0 : index
    %284 = memref.load %arg4[%c4_126, %c0_127] : memref<16x20xf32, #tpu.memory_space<smem>>
    %285 = vector.broadcast %284 : f32 to vector<8x64xf32>
    %286 = arith.mulf %92, %285 : vector<8x64xf32>
    %287 = arith.addf %283, %286 : vector<8x64xf32>
    %c5_128 = arith.constant 5 : index
    %c0_129 = arith.constant 0 : index
    %288 = memref.load %arg4[%c5_128, %c0_129] : memref<16x20xf32, #tpu.memory_space<smem>>
    %289 = vector.broadcast %288 : f32 to vector<8x64xf32>
    %290 = arith.mulf %108, %289 : vector<8x64xf32>
    %291 = arith.addf %287, %290 : vector<8x64xf32>
    %c6_130 = arith.constant 6 : index
    %c0_131 = arith.constant 0 : index
    %292 = memref.load %arg4[%c6_130, %c0_131] : memref<16x20xf32, #tpu.memory_space<smem>>
    %293 = vector.broadcast %292 : f32 to vector<8x64xf32>
    %294 = arith.mulf %124, %293 : vector<8x64xf32>
    %295 = arith.addf %291, %294 : vector<8x64xf32>
    %c7_132 = arith.constant 7 : index
    %c0_133 = arith.constant 0 : index
    %296 = memref.load %arg4[%c7_132, %c0_133] : memref<16x20xf32, #tpu.memory_space<smem>>
    %297 = vector.broadcast %296 : f32 to vector<8x64xf32>
    %298 = arith.mulf %140, %297 : vector<8x64xf32>
    %299 = arith.addf %295, %298 : vector<8x64xf32>
    %c8_134 = arith.constant 8 : index
    %c0_135 = arith.constant 0 : index
    %300 = memref.load %arg4[%c8_134, %c0_135] : memref<16x20xf32, #tpu.memory_space<smem>>
    %301 = vector.broadcast %300 : f32 to vector<8x64xf32>
    %302 = arith.mulf %156, %301 : vector<8x64xf32>
    %303 = arith.addf %299, %302 : vector<8x64xf32>
    %c9_136 = arith.constant 9 : index
    %c0_137 = arith.constant 0 : index
    %304 = memref.load %arg4[%c9_136, %c0_137] : memref<16x20xf32, #tpu.memory_space<smem>>
    %305 = vector.broadcast %304 : f32 to vector<8x64xf32>
    %306 = arith.mulf %172, %305 : vector<8x64xf32>
    %307 = arith.addf %303, %306 : vector<8x64xf32>
    %c10_138 = arith.constant 10 : index
    %c0_139 = arith.constant 0 : index
    %308 = memref.load %arg4[%c10_138, %c0_139] : memref<16x20xf32, #tpu.memory_space<smem>>
    %309 = vector.broadcast %308 : f32 to vector<8x64xf32>
    %310 = arith.mulf %188, %309 : vector<8x64xf32>
    %311 = arith.addf %307, %310 : vector<8x64xf32>
    %c11_140 = arith.constant 11 : index
    %c0_141 = arith.constant 0 : index
    %312 = memref.load %arg4[%c11_140, %c0_141] : memref<16x20xf32, #tpu.memory_space<smem>>
    %313 = vector.broadcast %312 : f32 to vector<8x64xf32>
    %314 = arith.mulf %204, %313 : vector<8x64xf32>
    %315 = arith.addf %311, %314 : vector<8x64xf32>
    %c12_142 = arith.constant 12 : index
    %c0_143 = arith.constant 0 : index
    %316 = memref.load %arg4[%c12_142, %c0_143] : memref<16x20xf32, #tpu.memory_space<smem>>
    %317 = vector.broadcast %316 : f32 to vector<8x64xf32>
    %318 = arith.mulf %220, %317 : vector<8x64xf32>
    %319 = arith.addf %315, %318 : vector<8x64xf32>
    %c13_144 = arith.constant 13 : index
    %c0_145 = arith.constant 0 : index
    %320 = memref.load %arg4[%c13_144, %c0_145] : memref<16x20xf32, #tpu.memory_space<smem>>
    %321 = vector.broadcast %320 : f32 to vector<8x64xf32>
    %322 = arith.mulf %236, %321 : vector<8x64xf32>
    %323 = arith.addf %319, %322 : vector<8x64xf32>
    %c14_146 = arith.constant 14 : index
    %c0_147 = arith.constant 0 : index
    %324 = memref.load %arg4[%c14_146, %c0_147] : memref<16x20xf32, #tpu.memory_space<smem>>
    %325 = vector.broadcast %324 : f32 to vector<8x64xf32>
    %326 = arith.mulf %252, %325 : vector<8x64xf32>
    %327 = arith.addf %323, %326 : vector<8x64xf32>
    %c15_148 = arith.constant 15 : index
    %c0_149 = arith.constant 0 : index
    %328 = memref.load %arg4[%c15_148, %c0_149] : memref<16x20xf32, #tpu.memory_space<smem>>
    %329 = vector.broadcast %328 : f32 to vector<8x64xf32>
    %330 = arith.mulf %268, %329 : vector<8x64xf32>
    %331 = arith.addf %327, %330 : vector<8x64xf32>
    %c0_150 = arith.constant 0 : index
    %332 = memref.load %arg5[%c0_150] : memref<20xf32, #tpu.memory_space<smem>>
    %333 = vector.broadcast %332 : f32 to vector<8x64xf32>
    %334 = arith.addf %331, %333 : vector<8x64xf32>
    %cst_151 = arith.constant 0.000000e+00 : f32
    %335 = vector.broadcast %cst_151 : f32 to vector<8x64xf32>
    %336 = arith.maximumf %334, %335 : vector<8x64xf32>
    %337 = arith.index_cast %3 : i32 to index
    %c0_152 = arith.constant 0 : index
    %338 = vector.load %arg9[%337, %c0_152] : memref<8x1280xf32, #tpu.memory_space<vmem>>, vector<8x64xf32>
    tpu.vector_store %arg9[%337, %c0_152], %336 {strides = array<i32>} : memref<8x1280xf32, #tpu.memory_space<vmem>>, vector<8x64xf32>,
    %c0_153 = arith.constant 0 : index
    %c1_154 = arith.constant 1 : index
    %339 = memref.load %arg4[%c0_153, %c1_154] : memref<16x20xf32, #tpu.memory_space<smem>>
    %340 = vector.broadcast %339 : f32 to vector<8x64xf32>
    %341 = arith.mulf %28, %340 : vector<8x64xf32>
    %c1_155 = arith.constant 1 : index
    %c1_156 = arith.constant 1 : index
    %342 = memref.load %arg4[%c1_155, %c1_156] : memref<16x20xf32, #tpu.memory_space<smem>>
    %343 = vector.broadcast %342 : f32 to vector<8x64xf32>
    %344 = arith.mulf %44, %343 : vector<8x64xf32>
    %345 = arith.addf %341, %344 : vector<8x64xf32>
    %c2_157 = arith.constant 2 : index
    %c1_158 = arith.constant 1 : index
    %346 = memref.load %arg4[%c2_157, %c1_158] : memref<16x20xf32, #tpu.memory_space<smem>>
    %347 = vector.broadcast %346 : f32 to vector<8x64xf32>
    %348 = arith.mulf %60, %347 : vector<8x64xf32>
    %349 = arith.addf %345, %348 : vector<8x64xf32>
    %c3_159 = arith.constant 3 : index
    %c1_160 = arith.constant 1 : index
    %350 = memref.load %arg4[%c3_159, %c1_160] : memref<16x20xf32, #tpu.memory_space<smem>>
    %351 = vector.broadcast %350 : f32 to vector<8x64xf32>
    %352 = arith.mulf %76, %351 : vector<8x64xf32>
    %353 = arith.addf %349, %352 : vector<8x64xf32>
    %c4_161 = arith.constant 4 : index
    %c1_162 = arith.constant 1 : index
    %354 = memref.load %arg4[%c4_161, %c1_162] : memref<16x20xf32, #tpu.memory_space<smem>>
    %355 = vector.broadcast %354 : f32 to vector<8x64xf32>
    %356 = arith.mulf %92, %355 : vector<8x64xf32>
    %357 = arith.addf %353, %356 : vector<8x64xf32>
    %c5_163 = arith.constant 5 : index
    %c1_164 = arith.constant 1 : index
    %358 = memref.load %arg4[%c5_163, %c1_164] : memref<16x20xf32, #tpu.memory_space<smem>>
    %359 = vector.broadcast %358 : f32 to vector<8x64xf32>
    %360 = arith.mulf %108, %359 : vector<8x64xf32>
    %361 = arith.addf %357, %360 : vector<8x64xf32>
    %c6_165 = arith.constant 6 : index
    %c1_166 = arith.constant 1 : index
    %362 = memref.load %arg4[%c6_165, %c1_166] : memref<16x20xf32, #tpu.memory_space<smem>>
    %363 = vector.broadcast %362 : f32 to vector<8x64xf32>
    %364 = arith.mulf %124, %363 : vector<8x64xf32>
    %365 = arith.addf %361, %364 : vector<8x64xf32>
    %c7_167 = arith.constant 7 : index
    %c1_168 = arith.constant 1 : index
    %366 = memref.load %arg4[%c7_167, %c1_168] : memref<16x20xf32, #tpu.memory_space<smem>>
    %367 = vector.broadcast %366 : f32 to vector<8x64xf32>
    %368 = arith.mulf %140, %367 : vector<8x64xf32>
    %369 = arith.addf %365, %368 : vector<8x64xf32>
    %c8_169 = arith.constant 8 : index
    %c1_170 = arith.constant 1 : index
    %370 = memref.load %arg4[%c8_169, %c1_170] : memref<16x20xf32, #tpu.memory_space<smem>>
    %371 = vector.broadcast %370 : f32 to vector<8x64xf32>
    %372 = arith.mulf %156, %371 : vector<8x64xf32>
    %373 = arith.addf %369, %372 : vector<8x64xf32>
    %c9_171 = arith.constant 9 : index
    %c1_172 = arith.constant 1 : index
    %374 = memref.load %arg4[%c9_171, %c1_172] : memref<16x20xf32, #tpu.memory_space<smem>>
    %375 = vector.broadcast %374 : f32 to vector<8x64xf32>
    %376 = arith.mulf %172, %375 : vector<8x64xf32>
    %377 = arith.addf %373, %376 : vector<8x64xf32>
    %c10_173 = arith.constant 10 : index
    %c1_174 = arith.constant 1 : index
    %378 = memref.load %arg4[%c10_173, %c1_174] : memref<16x20xf32, #tpu.memory_space<smem>>
    %379 = vector.broadcast %378 : f32 to vector<8x64xf32>
    %380 = arith.mulf %188, %379 : vector<8x64xf32>
    %381 = arith.addf %377, %380 : vector<8x64xf32>
    %c11_175 = arith.constant 11 : index
    %c1_176 = arith.constant 1 : index
    %382 = memref.load %arg4[%c11_175, %c1_176] : memref<16x20xf32, #tpu.memory_space<smem>>
    %383 = vector.broadcast %382 : f32 to vector<8x64xf32>
    %384 = arith.mulf %204, %383 : vector<8x64xf32>
    %385 = arith.addf %381, %384 : vector<8x64xf32>
    %c12_177 = arith.constant 12 : index
    %c1_178 = arith.constant 1 : index
    %386 = memref.load %arg4[%c12_177, %c1_178] : memref<16x20xf32, #tpu.memory_space<smem>>
    %387 = vector.broadcast %386 : f32 to vector<8x64xf32>
    %388 = arith.mulf %220, %387 : vector<8x64xf32>
    %389 = arith.addf %385, %388 : vector<8x64xf32>
    %c13_179 = arith.constant 13 : index
    %c1_180 = arith.constant 1 : index
    %390 = memref.load %arg4[%c13_179, %c1_180] : memref<16x20xf32, #tpu.memory_space<smem>>
    %391 = vector.broadcast %390 : f32 to vector<8x64xf32>
    %392 = arith.mulf %236, %391 : vector<8x64xf32>
    %393 = arith.addf %389, %392 : vector<8x64xf32>
    %c14_181 = arith.constant 14 : index
    %c1_182 = arith.constant 1 : index
    %394 = memref.load %arg4[%c14_181, %c1_182] : memref<16x20xf32, #tpu.memory_space<smem>>
    %395 = vector.broadcast %394 : f32 to vector<8x64xf32>
    %396 = arith.mulf %252, %395 : vector<8x64xf32>
    %397 = arith.addf %393, %396 : vector<8x64xf32>
    %c15_183 = arith.constant 15 : index
    %c1_184 = arith.constant 1 : index
    %398 = memref.load %arg4[%c15_183, %c1_184] : memref<16x20xf32, #tpu.memory_space<smem>>
    %399 = vector.broadcast %398 : f32 to vector<8x64xf32>
    %400 = arith.mulf %268, %399 : vector<8x64xf32>
    %401 = arith.addf %397, %400 : vector<8x64xf32>
    %c1_185 = arith.constant 1 : index
    %402 = memref.load %arg5[%c1_185] : memref<20xf32, #tpu.memory_space<smem>>
    %403 = vector.broadcast %402 : f32 to vector<8x64xf32>
    %404 = arith.addf %401, %403 : vector<8x64xf32>
    %cst_186 = arith.constant 0.000000e+00 : f32
    %405 = vector.broadcast %cst_186 : f32 to vector<8x64xf32>
    %406 = arith.maximumf %404, %405 : vector<8x64xf32>
    %407 = arith.index_cast %3 : i32 to index
    %c64 = arith.constant 64 : index
    %408 = vector.load %arg9[%407, %c64] : memref<8x1280xf32, #tpu.memory_space<vmem>>, vector<8x64xf32>
    tpu.vector_store %arg9[%407, %c64], %406 {strides = array<i32>} : memref<8x1280xf32, #tpu.memory_space<vmem>>, vector<8x64xf32>,
    %c0_187 = arith.constant 0 : index
    %c2_188 = arith.constant 2 : index
    %409 = memref.load %arg4[%c0_187, %c2_188] : memref<16x20xf32, #tpu.memory_space<smem>>
    %410 = vector.broadcast %409 : f32 to vector<8x64xf32>
    %411 = arith.mulf %28, %410 : vector<8x64xf32>
    %c1_189 = arith.constant 1 : index
    %c2_190 = arith.constant 2 : index
    %412 = memref.load %arg4[%c1_189, %c2_190] : memref<16x20xf32, #tpu.memory_space<smem>>
    %413 = vector.broadcast %412 : f32 to vector<8x64xf32>
    %414 = arith.mulf %44, %413 : vector<8x64xf32>
    %415 = arith.addf %411, %414 : vector<8x64xf32>
    %c2_191 = arith.constant 2 : index
    %c2_192 = arith.constant 2 : index
    %416 = memref.load %arg4[%c2_191, %c2_192] : memref<16x20xf32, #tpu.memory_space<smem>>
    %417 = vector.broadcast %416 : f32 to vector<8x64xf32>
    %418 = arith.mulf %60, %417 : vector<8x64xf32>
    %419 = arith.addf %415, %418 : vector<8x64xf32>
    %c3_193 = arith.constant 3 : index
    %c2_194 = arith.constant 2 : index
    %420 = memref.load %arg4[%c3_193, %c2_194] : memref<16x20xf32, #tpu.memory_space<smem>>
    %421 = vector.broadcast %420 : f32 to vector<8x64xf32>
    %422 = arith.mulf %76, %421 : vector<8x64xf32>
    %423 = arith.addf %419, %422 : vector<8x64xf32>
    %c4_195 = arith.constant 4 : index
    %c2_196 = arith.constant 2 : index
    %424 = memref.load %arg4[%c4_195, %c2_196] : memref<16x20xf32, #tpu.memory_space<smem>>
    %425 = vector.broadcast %424 : f32 to vector<8x64xf32>
    %426 = arith.mulf %92, %425 : vector<8x64xf32>
    %427 = arith.addf %423, %426 : vector<8x64xf32>
    %c5_197 = arith.constant 5 : index
    %c2_198 = arith.constant 2 : index
    %428 = memref.load %arg4[%c5_197, %c2_198] : memref<16x20xf32, #tpu.memory_space<smem>>
    %429 = vector.broadcast %428 : f32 to vector<8x64xf32>
    %430 = arith.mulf %108, %429 : vector<8x64xf32>
    %431 = arith.addf %427, %430 : vector<8x64xf32>
    %c6_199 = arith.constant 6 : index
    %c2_200 = arith.constant 2 : index
    %432 = memref.load %arg4[%c6_199, %c2_200] : memref<16x20xf32, #tpu.memory_space<smem>>
    %433 = vector.broadcast %432 : f32 to vector<8x64xf32>
    %434 = arith.mulf %124, %433 : vector<8x64xf32>
    %435 = arith.addf %431, %434 : vector<8x64xf32>
    %c7_201 = arith.constant 7 : index
    %c2_202 = arith.constant 2 : index
    %436 = memref.load %arg4[%c7_201, %c2_202] : memref<16x20xf32, #tpu.memory_space<smem>>
    %437 = vector.broadcast %436 : f32 to vector<8x64xf32>
    %438 = arith.mulf %140, %437 : vector<8x64xf32>
    %439 = arith.addf %435, %438 : vector<8x64xf32>
    %c8_203 = arith.constant 8 : index
    %c2_204 = arith.constant 2 : index
    %440 = memref.load %arg4[%c8_203, %c2_204] : memref<16x20xf32, #tpu.memory_space<smem>>
    %441 = vector.broadcast %440 : f32 to vector<8x64xf32>
    %442 = arith.mulf %156, %441 : vector<8x64xf32>
    %443 = arith.addf %439, %442 : vector<8x64xf32>
    %c9_205 = arith.constant 9 : index
    %c2_206 = arith.constant 2 : index
    %444 = memref.load %arg4[%c9_205, %c2_206] : memref<16x20xf32, #tpu.memory_space<smem>>
    %445 = vector.broadcast %444 : f32 to vector<8x64xf32>
    %446 = arith.mulf %172, %445 : vector<8x64xf32>
    %447 = arith.addf %443, %446 : vector<8x64xf32>
    %c10_207 = arith.constant 10 : index
    %c2_208 = arith.constant 2 : index
    %448 = memref.load %arg4[%c10_207, %c2_208] : memref<16x20xf32, #tpu.memory_space<smem>>
    %449 = vector.broadcast %448 : f32 to vector<8x64xf32>
    %450 = arith.mulf %188, %449 : vector<8x64xf32>
    %451 = arith.addf %447, %450 : vector<8x64xf32>
    %c11_209 = arith.constant 11 : index
    %c2_210 = arith.constant 2 : index
    %452 = memref.load %arg4[%c11_209, %c2_210] : memref<16x20xf32, #tpu.memory_space<smem>>
    %453 = vector.broadcast %452 : f32 to vector<8x64xf32>
    %454 = arith.mulf %204, %453 : vector<8x64xf32>
    %455 = arith.addf %451, %454 : vector<8x64xf32>
    %c12_211 = arith.constant 12 : index
    %c2_212 = arith.constant 2 : index
    %456 = memref.load %arg4[%c12_211, %c2_212] : memref<16x20xf32, #tpu.memory_space<smem>>
    %457 = vector.broadcast %456 : f32 to vector<8x64xf32>
    %458 = arith.mulf %220, %457 : vector<8x64xf32>
    %459 = arith.addf %455, %458 : vector<8x64xf32>
    %c13_213 = arith.constant 13 : index
    %c2_214 = arith.constant 2 : index
    %460 = memref.load %arg4[%c13_213, %c2_214] : memref<16x20xf32, #tpu.memory_space<smem>>
    %461 = vector.broadcast %460 : f32 to vector<8x64xf32>
    %462 = arith.mulf %236, %461 : vector<8x64xf32>
    %463 = arith.addf %459, %462 : vector<8x64xf32>
    %c14_215 = arith.constant 14 : index
    %c2_216 = arith.constant 2 : index
    %464 = memref.load %arg4[%c14_215, %c2_216] : memref<16x20xf32, #tpu.memory_space<smem>>
    %465 = vector.broadcast %464 : f32 to vector<8x64xf32>
    %466 = arith.mulf %252, %465 : vector<8x64xf32>
    %467 = arith.addf %463, %466 : vector<8x64xf32>
    %c15_217 = arith.constant 15 : index
    %c2_218 = arith.constant 2 : index
    %468 = memref.load %arg4[%c15_217, %c2_218] : memref<16x20xf32, #tpu.memory_space<smem>>
    %469 = vector.broadcast %468 : f32 to vector<8x64xf32>
    %470 = arith.mulf %268, %469 : vector<8x64xf32>
    %471 = arith.addf %467, %470 : vector<8x64xf32>
    %c2_219 = arith.constant 2 : index
    %472 = memref.load %arg5[%c2_219] : memref<20xf32, #tpu.memory_space<smem>>
    %473 = vector.broadcast %472 : f32 to vector<8x64xf32>
    %474 = arith.addf %471, %473 : vector<8x64xf32>
    %cst_220 = arith.constant 0.000000e+00 : f32
    %475 = vector.broadcast %cst_220 : f32 to vector<8x64xf32>
    %476 = arith.maximumf %474, %475 : vector<8x64xf32>
    %477 = arith.index_cast %3 : i32 to index
    %c128 = arith.constant 128 : index
    %478 = vector.load %arg9[%477, %c128] : memref<8x1280xf32, #tpu.memory_space<vmem>>, vector<8x64xf32>
    tpu.vector_store %arg9[%477, %c128], %476 {strides = array<i32>} : memref<8x1280xf32, #tpu.memory_space<vmem>>, vector<8x64xf32>,
    %c0_221 = arith.constant 0 : index
    %c3_222 = arith.constant 3 : index
    %479 = memref.load %arg4[%c0_221, %c3_222] : memref<16x20xf32, #tpu.memory_space<smem>>
    %480 = vector.broadcast %479 : f32 to vector<8x64xf32>
    %481 = arith.mulf %28, %480 : vector<8x64xf32>
    %c1_223 = arith.constant 1 : index
    %c3_224 = arith.constant 3 : index
    %482 = memref.load %arg4[%c1_223, %c3_224] : memref<16x20xf32, #tpu.memory_space<smem>>
    %483 = vector.broadcast %482 : f32 to vector<8x64xf32>
    %484 = arith.mulf %44, %483 : vector<8x64xf32>
    %485 = arith.addf %481, %484 : vector<8x64xf32>
    %c2_225 = arith.constant 2 : index
    %c3_226 = arith.constant 3 : index
    %486 = memref.load %arg4[%c2_225, %c3_226] : memref<16x20xf32, #tpu.memory_space<smem>>
    %487 = vector.broadcast %486 : f32 to vector<8x64xf32>
    %488 = arith.mulf %60, %487 : vector<8x64xf32>
    %489 = arith.addf %485, %488 : vector<8x64xf32>
    %c3_227 = arith.constant 3 : index
    %c3_228 = arith.constant 3 : index
    %490 = memref.load %arg4[%c3_227, %c3_228] : memref<16x20xf32, #tpu.memory_space<smem>>
    %491 = vector.broadcast %490 : f32 to vector<8x64xf32>
    %492 = arith.mulf %76, %491 : vector<8x64xf32>
    %493 = arith.addf %489, %492 : vector<8x64xf32>
    %c4_229 = arith.constant 4 : index
    %c3_230 = arith.constant 3 : index
    %494 = memref.load %arg4[%c4_229, %c3_230] : memref<16x20xf32, #tpu.memory_space<smem>>
    %495 = vector.broadcast %494 : f32 to vector<8x64xf32>
    %496 = arith.mulf %92, %495 : vector<8x64xf32>
    %497 = arith.addf %493, %496 : vector<8x64xf32>
    %c5_231 = arith.constant 5 : index
    %c3_232 = arith.constant 3 : index
    %498 = memref.load %arg4[%c5_231, %c3_232] : memref<16x20xf32, #tpu.memory_space<smem>>
    %499 = vector.broadcast %498 : f32 to vector<8x64xf32>
    %500 = arith.mulf %108, %499 : vector<8x64xf32>
    %501 = arith.addf %497, %500 : vector<8x64xf32>
    %c6_233 = arith.constant 6 : index
    %c3_234 = arith.constant 3 : index
    %502 = memref.load %arg4[%c6_233, %c3_234] : memref<16x20xf32, #tpu.memory_space<smem>>
    %503 = vector.broadcast %502 : f32 to vector<8x64xf32>
    %504 = arith.mulf %124, %503 : vector<8x64xf32>
    %505 = arith.addf %501, %504 : vector<8x64xf32>
    %c7_235 = arith.constant 7 : index
    %c3_236 = arith.constant 3 : index
    %506 = memref.load %arg4[%c7_235, %c3_236] : memref<16x20xf32, #tpu.memory_space<smem>>
    %507 = vector.broadcast %506 : f32 to vector<8x64xf32>
    %508 = arith.mulf %140, %507 : vector<8x64xf32>
    %509 = arith.addf %505, %508 : vector<8x64xf32>
    %c8_237 = arith.constant 8 : index
    %c3_238 = arith.constant 3 : index
    %510 = memref.load %arg4[%c8_237, %c3_238] : memref<16x20xf32, #tpu.memory_space<smem>>
    %511 = vector.broadcast %510 : f32 to vector<8x64xf32>
    %512 = arith.mulf %156, %511 : vector<8x64xf32>
    %513 = arith.addf %509, %512 : vector<8x64xf32>
    %c9_239 = arith.constant 9 : index
    %c3_240 = arith.constant 3 : index
    %514 = memref.load %arg4[%c9_239, %c3_240] : memref<16x20xf32, #tpu.memory_space<smem>>
    %515 = vector.broadcast %514 : f32 to vector<8x64xf32>
    %516 = arith.mulf %172, %515 : vector<8x64xf32>
    %517 = arith.addf %513, %516 : vector<8x64xf32>
    %c10_241 = arith.constant 10 : index
    %c3_242 = arith.constant 3 : index
    %518 = memref.load %arg4[%c10_241, %c3_242] : memref<16x20xf32, #tpu.memory_space<smem>>
    %519 = vector.broadcast %518 : f32 to vector<8x64xf32>
    %520 = arith.mulf %188, %519 : vector<8x64xf32>
    %521 = arith.addf %517, %520 : vector<8x64xf32>
    %c11_243 = arith.constant 11 : index
    %c3_244 = arith.constant 3 : index
    %522 = memref.load %arg4[%c11_243, %c3_244] : memref<16x20xf32, #tpu.memory_space<smem>>
    %523 = vector.broadcast %522 : f32 to vector<8x64xf32>
    %524 = arith.mulf %204, %523 : vector<8x64xf32>
    %525 = arith.addf %521, %524 : vector<8x64xf32>
    %c12_245 = arith.constant 12 : index
    %c3_246 = arith.constant 3 : index
    %526 = memref.load %arg4[%c12_245, %c3_246] : memref<16x20xf32, #tpu.memory_space<smem>>
    %527 = vector.broadcast %526 : f32 to vector<8x64xf32>
    %528 = arith.mulf %220, %527 : vector<8x64xf32>
    %529 = arith.addf %525, %528 : vector<8x64xf32>
    %c13_247 = arith.constant 13 : index
    %c3_248 = arith.constant 3 : index
    %530 = memref.load %arg4[%c13_247, %c3_248] : memref<16x20xf32, #tpu.memory_space<smem>>
    %531 = vector.broadcast %530 : f32 to vector<8x64xf32>
    %532 = arith.mulf %236, %531 : vector<8x64xf32>
    %533 = arith.addf %529, %532 : vector<8x64xf32>
    %c14_249 = arith.constant 14 : index
    %c3_250 = arith.constant 3 : index
    %534 = memref.load %arg4[%c14_249, %c3_250] : memref<16x20xf32, #tpu.memory_space<smem>>
    %535 = vector.broadcast %534 : f32 to vector<8x64xf32>
    %536 = arith.mulf %252, %535 : vector<8x64xf32>
    %537 = arith.addf %533, %536 : vector<8x64xf32>
    %c15_251 = arith.constant 15 : index
    %c3_252 = arith.constant 3 : index
    %538 = memref.load %arg4[%c15_251, %c3_252] : memref<16x20xf32, #tpu.memory_space<smem>>
    %539 = vector.broadcast %538 : f32 to vector<8x64xf32>
    %540 = arith.mulf %268, %539 : vector<8x64xf32>
    %541 = arith.addf %537, %540 : vector<8x64xf32>
    %c3_253 = arith.constant 3 : index
    %542 = memref.load %arg5[%c3_253] : memref<20xf32, #tpu.memory_space<smem>>
    %543 = vector.broadcast %542 : f32 to vector<8x64xf32>
    %544 = arith.addf %541, %543 : vector<8x64xf32>
    %cst_254 = arith.constant 0.000000e+00 : f32
    %545 = vector.broadcast %cst_254 : f32 to vector<8x64xf32>
    %546 = arith.maximumf %544, %545 : vector<8x64xf32>
    %547 = arith.index_cast %3 : i32 to index
    %c192 = arith.constant 192 : index
    %548 = vector.load %arg9[%547, %c192] : memref<8x1280xf32, #tpu.memory_space<vmem>>, vector<8x64xf32>
    tpu.vector_store %arg9[%547, %c192], %546 {strides = array<i32>} : memref<8x1280xf32, #tpu.memory_space<vmem>>, vector<8x64xf32>,
    %c0_255 = arith.constant 0 : index
    %c4_256 = arith.constant 4 : index
    %549 = memref.load %arg4[%c0_255, %c4_256] : memref<16x20xf32, #tpu.memory_space<smem>>
    %550 = vector.broadcast %549 : f32 to vector<8x64xf32>
    %551 = arith.mulf %28, %550 : vector<8x64xf32>
    %c1_257 = arith.constant 1 : index
    %c4_258 = arith.constant 4 : index
    %552 = memref.load %arg4[%c1_257, %c4_258] : memref<16x20xf32, #tpu.memory_space<smem>>
    %553 = vector.broadcast %552 : f32 to vector<8x64xf32>
    %554 = arith.mulf %44, %553 : vector<8x64xf32>
    %555 = arith.addf %551, %554 : vector<8x64xf32>
    %c2_259 = arith.constant 2 : index
    %c4_260 = arith.constant 4 : index
    %556 = memref.load %arg4[%c2_259, %c4_260] : memref<16x20xf32, #tpu.memory_space<smem>>
    %557 = vector.broadcast %556 : f32 to vector<8x64xf32>
    %558 = arith.mulf %60, %557 : vector<8x64xf32>
    %559 = arith.addf %555, %558 : vector<8x64xf32>
    %c3_261 = arith.constant 3 : index
    %c4_262 = arith.constant 4 : index
    %560 = memref.load %arg4[%c3_261, %c4_262] : memref<16x20xf32, #tpu.memory_space<smem>>
    %561 = vector.broadcast %560 : f32 to vector<8x64xf32>
    %562 = arith.mulf %76, %561 : vector<8x64xf32>
    %563 = arith.addf %559, %562 : vector<8x64xf32>
    %c4_263 = arith.constant 4 : index
    %c4_264 = arith.constant 4 : index
    %564 = memref.load %arg4[%c4_263, %c4_264] : memref<16x20xf32, #tpu.memory_space<smem>>
    %565 = vector.broadcast %564 : f32 to vector<8x64xf32>
    %566 = arith.mulf %92, %565 : vector<8x64xf32>
    %567 = arith.addf %563, %566 : vector<8x64xf32>
    %c5_265 = arith.constant 5 : index
    %c4_266 = arith.constant 4 : index
    %568 = memref.load %arg4[%c5_265, %c4_266] : memref<16x20xf32, #tpu.memory_space<smem>>
    %569 = vector.broadcast %568 : f32 to vector<8x64xf32>
    %570 = arith.mulf %108, %569 : vector<8x64xf32>
    %571 = arith.addf %567, %570 : vector<8x64xf32>
    %c6_267 = arith.constant 6 : index
    %c4_268 = arith.constant 4 : index
    %572 = memref.load %arg4[%c6_267, %c4_268] : memref<16x20xf32, #tpu.memory_space<smem>>
    %573 = vector.broadcast %572 : f32 to vector<8x64xf32>
    %574 = arith.mulf %124, %573 : vector<8x64xf32>
    %575 = arith.addf %571, %574 : vector<8x64xf32>
    %c7_269 = arith.constant 7 : index
    %c4_270 = arith.constant 4 : index
    %576 = memref.load %arg4[%c7_269, %c4_270] : memref<16x20xf32, #tpu.memory_space<smem>>
    %577 = vector.broadcast %576 : f32 to vector<8x64xf32>
    %578 = arith.mulf %140, %577 : vector<8x64xf32>
    %579 = arith.addf %575, %578 : vector<8x64xf32>
    %c8_271 = arith.constant 8 : index
    %c4_272 = arith.constant 4 : index
    %580 = memref.load %arg4[%c8_271, %c4_272] : memref<16x20xf32, #tpu.memory_space<smem>>
    %581 = vector.broadcast %580 : f32 to vector<8x64xf32>
    %582 = arith.mulf %156, %581 : vector<8x64xf32>
    %583 = arith.addf %579, %582 : vector<8x64xf32>
    %c9_273 = arith.constant 9 : index
    %c4_274 = arith.constant 4 : index
    %584 = memref.load %arg4[%c9_273, %c4_274] : memref<16x20xf32, #tpu.memory_space<smem>>
    %585 = vector.broadcast %584 : f32 to vector<8x64xf32>
    %586 = arith.mulf %172, %585 : vector<8x64xf32>
    %587 = arith.addf %583, %586 : vector<8x64xf32>
    %c10_275 = arith.constant 10 : index
    %c4_276 = arith.constant 4 : index
    %588 = memref.load %arg4[%c10_275, %c4_276] : memref<16x20xf32, #tpu.memory_space<smem>>
    %589 = vector.broadcast %588 : f32 to vector<8x64xf32>
    %590 = arith.mulf %188, %589 : vector<8x64xf32>
    %591 = arith.addf %587, %590 : vector<8x64xf32>
    %c11_277 = arith.constant 11 : index
    %c4_278 = arith.constant 4 : index
    %592 = memref.load %arg4[%c11_277, %c4_278] : memref<16x20xf32, #tpu.memory_space<smem>>
    %593 = vector.broadcast %592 : f32 to vector<8x64xf32>
    %594 = arith.mulf %204, %593 : vector<8x64xf32>
    %595 = arith.addf %591, %594 : vector<8x64xf32>
    %c12_279 = arith.constant 12 : index
    %c4_280 = arith.constant 4 : index
    %596 = memref.load %arg4[%c12_279, %c4_280] : memref<16x20xf32, #tpu.memory_space<smem>>
    %597 = vector.broadcast %596 : f32 to vector<8x64xf32>
    %598 = arith.mulf %220, %597 : vector<8x64xf32>
    %599 = arith.addf %595, %598 : vector<8x64xf32>
    %c13_281 = arith.constant 13 : index
    %c4_282 = arith.constant 4 : index
    %600 = memref.load %arg4[%c13_281, %c4_282] : memref<16x20xf32, #tpu.memory_space<smem>>
    %601 = vector.broadcast %600 : f32 to vector<8x64xf32>
    %602 = arith.mulf %236, %601 : vector<8x64xf32>
    %603 = arith.addf %599, %602 : vector<8x64xf32>
    %c14_283 = arith.constant 14 : index
    %c4_284 = arith.constant 4 : index
    %604 = memref.load %arg4[%c14_283, %c4_284] : memref<16x20xf32, #tpu.memory_space<smem>>
    %605 = vector.broadcast %604 : f32 to vector<8x64xf32>
    %606 = arith.mulf %252, %605 : vector<8x64xf32>
    %607 = arith.addf %603, %606 : vector<8x64xf32>
    %c15_285 = arith.constant 15 : index
    %c4_286 = arith.constant 4 : index
    %608 = memref.load %arg4[%c15_285, %c4_286] : memref<16x20xf32, #tpu.memory_space<smem>>
    %609 = vector.broadcast %608 : f32 to vector<8x64xf32>
    %610 = arith.mulf %268, %609 : vector<8x64xf32>
    %611 = arith.addf %607, %610 : vector<8x64xf32>
    %c4_287 = arith.constant 4 : index
    %612 = memref.load %arg5[%c4_287] : memref<20xf32, #tpu.memory_space<smem>>
    %613 = vector.broadcast %612 : f32 to vector<8x64xf32>
    %614 = arith.addf %611, %613 : vector<8x64xf32>
    %cst_288 = arith.constant 0.000000e+00 : f32
    %615 = vector.broadcast %cst_288 : f32 to vector<8x64xf32>
    %616 = arith.maximumf %614, %615 : vector<8x64xf32>
    %617 = arith.index_cast %3 : i32 to index
    %c256 = arith.constant 256 : index
    %618 = vector.load %arg9[%617, %c256] : memref<8x1280xf32, #tpu.memory_space<vmem>>, vector<8x64xf32>
    tpu.vector_store %arg9[%617, %c256], %616 {strides = array<i32>} : memref<8x1280xf32, #tpu.memory_space<vmem>>, vector<8x64xf32>,
    %c0_289 = arith.constant 0 : index
    %c5_290 = arith.constant 5 : index
    %619 = memref.load %arg4[%c0_289, %c5_290] : memref<16x20xf32, #tpu.memory_space<smem>>
    %620 = vector.broadcast %619 : f32 to vector<8x64xf32>
    %621 = arith.mulf %28, %620 : vector<8x64xf32>
    %c1_291 = arith.constant 1 : index
    %c5_292 = arith.constant 5 : index
    %622 = memref.load %arg4[%c1_291, %c5_292] : memref<16x20xf32, #tpu.memory_space<smem>>
    %623 = vector.broadcast %622 : f32 to vector<8x64xf32>
    %624 = arith.mulf %44, %623 : vector<8x64xf32>
    %625 = arith.addf %621, %624 : vector<8x64xf32>
    %c2_293 = arith.constant 2 : index
    %c5_294 = arith.constant 5 : index
    %626 = memref.load %arg4[%c2_293, %c5_294] : memref<16x20xf32, #tpu.memory_space<smem>>
    %627 = vector.broadcast %626 : f32 to vector<8x64xf32>
    %628 = arith.mulf %60, %627 : vector<8x64xf32>
    %629 = arith.addf %625, %628 : vector<8x64xf32>
    %c3_295 = arith.constant 3 : index
    %c5_296 = arith.constant 5 : index
    %630 = memref.load %arg4[%c3_295, %c5_296] : memref<16x20xf32, #tpu.memory_space<smem>>
    %631 = vector.broadcast %630 : f32 to vector<8x64xf32>
    %632 = arith.mulf %76, %631 : vector<8x64xf32>
    %633 = arith.addf %629, %632 : vector<8x64xf32>
    %c4_297 = arith.constant 4 : index
    %c5_298 = arith.constant 5 : index
    %634 = memref.load %arg4[%c4_297, %c5_298] : memref<16x20xf32, #tpu.memory_space<smem>>
    %635 = vector.broadcast %634 : f32 to vector<8x64xf32>
    %636 = arith.mulf %92, %635 : vector<8x64xf32>
    %637 = arith.addf %633, %636 : vector<8x64xf32>
    %c5_299 = arith.constant 5 : index
    %c5_300 = arith.constant 5 : index
    %638 = memref.load %arg4[%c5_299, %c5_300] : memref<16x20xf32, #tpu.memory_space<smem>>
    %639 = vector.broadcast %638 : f32 to vector<8x64xf32>
    %640 = arith.mulf %108, %639 : vector<8x64xf32>
    %641 = arith.addf %637, %640 : vector<8x64xf32>
    %c6_301 = arith.constant 6 : index
    %c5_302 = arith.constant 5 : index
    %642 = memref.load %arg4[%c6_301, %c5_302] : memref<16x20xf32, #tpu.memory_space<smem>>
    %643 = vector.broadcast %642 : f32 to vector<8x64xf32>
    %644 = arith.mulf %124, %643 : vector<8x64xf32>
    %645 = arith.addf %641, %644 : vector<8x64xf32>
    %c7_303 = arith.constant 7 : index
    %c5_304 = arith.constant 5 : index
    %646 = memref.load %arg4[%c7_303, %c5_304] : memref<16x20xf32, #tpu.memory_space<smem>>
    %647 = vector.broadcast %646 : f32 to vector<8x64xf32>
    %648 = arith.mulf %140, %647 : vector<8x64xf32>
    %649 = arith.addf %645, %648 : vector<8x64xf32>
    %c8_305 = arith.constant 8 : index
    %c5_306 = arith.constant 5 : index
    %650 = memref.load %arg4[%c8_305, %c5_306] : memref<16x20xf32, #tpu.memory_space<smem>>
    %651 = vector.broadcast %650 : f32 to vector<8x64xf32>
    %652 = arith.mulf %156, %651 : vector<8x64xf32>
    %653 = arith.addf %649, %652 : vector<8x64xf32>
    %c9_307 = arith.constant 9 : index
    %c5_308 = arith.constant 5 : index
    %654 = memref.load %arg4[%c9_307, %c5_308] : memref<16x20xf32, #tpu.memory_space<smem>>
    %655 = vector.broadcast %654 : f32 to vector<8x64xf32>
    %656 = arith.mulf %172, %655 : vector<8x64xf32>
    %657 = arith.addf %653, %656 : vector<8x64xf32>
    %c10_309 = arith.constant 10 : index
    %c5_310 = arith.constant 5 : index
    %658 = memref.load %arg4[%c10_309, %c5_310] : memref<16x20xf32, #tpu.memory_space<smem>>
    %659 = vector.broadcast %658 : f32 to vector<8x64xf32>
    %660 = arith.mulf %188, %659 : vector<8x64xf32>
    %661 = arith.addf %657, %660 : vector<8x64xf32>
    %c11_311 = arith.constant 11 : index
    %c5_312 = arith.constant 5 : index
    %662 = memref.load %arg4[%c11_311, %c5_312] : memref<16x20xf32, #tpu.memory_space<smem>>
    %663 = vector.broadcast %662 : f32 to vector<8x64xf32>
    %664 = arith.mulf %204, %663 : vector<8x64xf32>
    %665 = arith.addf %661, %664 : vector<8x64xf32>
    %c12_313 = arith.constant 12 : index
    %c5_314 = arith.constant 5 : index
    %666 = memref.load %arg4[%c12_313, %c5_314] : memref<16x20xf32, #tpu.memory_space<smem>>
    %667 = vector.broadcast %666 : f32 to vector<8x64xf32>
    %668 = arith.mulf %220, %667 : vector<8x64xf32>
    %669 = arith.addf %665, %668 : vector<8x64xf32>
    %c13_315 = arith.constant 13 : index
    %c5_316 = arith.constant 5 : index
    %670 = memref.load %arg4[%c13_315, %c5_316] : memref<16x20xf32, #tpu.memory_space<smem>>
    %671 = vector.broadcast %670 : f32 to vector<8x64xf32>
    %672 = arith.mulf %236, %671 : vector<8x64xf32>
    %673 = arith.addf %669, %672 : vector<8x64xf32>
    %c14_317 = arith.constant 14 : index
    %c5_318 = arith.constant 5 : index
    %674 = memref.load %arg4[%c14_317, %c5_318] : memref<16x20xf32, #tpu.memory_space<smem>>
    %675 = vector.broadcast %674 : f32 to vector<8x64xf32>
    %676 = arith.mulf %252, %675 : vector<8x64xf32>
    %677 = arith.addf %673, %676 : vector<8x64xf32>
    %c15_319 = arith.constant 15 : index
    %c5_320 = arith.constant 5 : index
    %678 = memref.load %arg4[%c15_319, %c5_320] : memref<16x20xf32, #tpu.memory_space<smem>>
    %679 = vector.broadcast %678 : f32 to vector<8x64xf32>
    %680 = arith.mulf %268, %679 : vector<8x64xf32>
    %681 = arith.addf %677, %680 : vector<8x64xf32>
    %c5_321 = arith.constant 5 : index
    %682 = memref.load %arg5[%c5_321] : memref<20xf32, #tpu.memory_space<smem>>
    %683 = vector.broadcast %682 : f32 to vector<8x64xf32>
    %684 = arith.addf %681, %683 : vector<8x64xf32>
    %cst_322 = arith.constant 0.000000e+00 : f32
    %685 = vector.broadcast %cst_322 : f32 to vector<8x64xf32>
    %686 = arith.maximumf %684, %685 : vector<8x64xf32>
    %687 = arith.index_cast %3 : i32 to index
    %c320 = arith.constant 320 : index
    %688 = vector.load %arg9[%687, %c320] : memref<8x1280xf32, #tpu.memory_space<vmem>>, vector<8x64xf32>
    tpu.vector_store %arg9[%687, %c320], %686 {strides = array<i32>} : memref<8x1280xf32, #tpu.memory_space<vmem>>, vector<8x64xf32>,
    %c0_323 = arith.constant 0 : index
    %c6_324 = arith.constant 6 : index
    %689 = memref.load %arg4[%c0_323, %c6_324] : memref<16x20xf32, #tpu.memory_space<smem>>
    %690 = vector.broadcast %689 : f32 to vector<8x64xf32>
    %691 = arith.mulf %28, %690 : vector<8x64xf32>
    %c1_325 = arith.constant 1 : index
    %c6_326 = arith.constant 6 : index
    %692 = memref.load %arg4[%c1_325, %c6_326] : memref<16x20xf32, #tpu.memory_space<smem>>
    %693 = vector.broadcast %692 : f32 to vector<8x64xf32>
    %694 = arith.mulf %44, %693 : vector<8x64xf32>
    %695 = arith.addf %691, %694 : vector<8x64xf32>
    %c2_327 = arith.constant 2 : index
    %c6_328 = arith.constant 6 : index
    %696 = memref.load %arg4[%c2_327, %c6_328] : memref<16x20xf32, #tpu.memory_space<smem>>
    %697 = vector.broadcast %696 : f32 to vector<8x64xf32>
    %698 = arith.mulf %60, %697 : vector<8x64xf32>
    %699 = arith.addf %695, %698 : vector<8x64xf32>
    %c3_329 = arith.constant 3 : index
    %c6_330 = arith.constant 6 : index
    %700 = memref.load %arg4[%c3_329, %c6_330] : memref<16x20xf32, #tpu.memory_space<smem>>
    %701 = vector.broadcast %700 : f32 to vector<8x64xf32>
    %702 = arith.mulf %76, %701 : vector<8x64xf32>
    %703 = arith.addf %699, %702 : vector<8x64xf32>
    %c4_331 = arith.constant 4 : index
    %c6_332 = arith.constant 6 : index
    %704 = memref.load %arg4[%c4_331, %c6_332] : memref<16x20xf32, #tpu.memory_space<smem>>
    %705 = vector.broadcast %704 : f32 to vector<8x64xf32>
    %706 = arith.mulf %92, %705 : vector<8x64xf32>
    %707 = arith.addf %703, %706 : vector<8x64xf32>
    %c5_333 = arith.constant 5 : index
    %c6_334 = arith.constant 6 : index
    %708 = memref.load %arg4[%c5_333, %c6_334] : memref<16x20xf32, #tpu.memory_space<smem>>
    %709 = vector.broadcast %708 : f32 to vector<8x64xf32>
    %710 = arith.mulf %108, %709 : vector<8x64xf32>
    %711 = arith.addf %707, %710 : vector<8x64xf32>
    %c6_335 = arith.constant 6 : index
    %c6_336 = arith.constant 6 : index
    %712 = memref.load %arg4[%c6_335, %c6_336] : memref<16x20xf32, #tpu.memory_space<smem>>
    %713 = vector.broadcast %712 : f32 to vector<8x64xf32>
    %714 = arith.mulf %124, %713 : vector<8x64xf32>
    %715 = arith.addf %711, %714 : vector<8x64xf32>
    %c7_337 = arith.constant 7 : index
    %c6_338 = arith.constant 6 : index
    %716 = memref.load %arg4[%c7_337, %c6_338] : memref<16x20xf32, #tpu.memory_space<smem>>
    %717 = vector.broadcast %716 : f32 to vector<8x64xf32>
    %718 = arith.mulf %140, %717 : vector<8x64xf32>
    %719 = arith.addf %715, %718 : vector<8x64xf32>
    %c8_339 = arith.constant 8 : index
    %c6_340 = arith.constant 6 : index
    %720 = memref.load %arg4[%c8_339, %c6_340] : memref<16x20xf32, #tpu.memory_space<smem>>
    %721 = vector.broadcast %720 : f32 to vector<8x64xf32>
    %722 = arith.mulf %156, %721 : vector<8x64xf32>
    %723 = arith.addf %719, %722 : vector<8x64xf32>
    %c9_341 = arith.constant 9 : index
    %c6_342 = arith.constant 6 : index
    %724 = memref.load %arg4[%c9_341, %c6_342] : memref<16x20xf32, #tpu.memory_space<smem>>
    %725 = vector.broadcast %724 : f32 to vector<8x64xf32>
    %726 = arith.mulf %172, %725 : vector<8x64xf32>
    %727 = arith.addf %723, %726 : vector<8x64xf32>
    %c10_343 = arith.constant 10 : index
    %c6_344 = arith.constant 6 : index
    %728 = memref.load %arg4[%c10_343, %c6_344] : memref<16x20xf32, #tpu.memory_space<smem>>
    %729 = vector.broadcast %728 : f32 to vector<8x64xf32>
    %730 = arith.mulf %188, %729 : vector<8x64xf32>
    %731 = arith.addf %727, %730 : vector<8x64xf32>
    %c11_345 = arith.constant 11 : index
    %c6_346 = arith.constant 6 : index
    %732 = memref.load %arg4[%c11_345, %c6_346] : memref<16x20xf32, #tpu.memory_space<smem>>
    %733 = vector.broadcast %732 : f32 to vector<8x64xf32>
    %734 = arith.mulf %204, %733 : vector<8x64xf32>
    %735 = arith.addf %731, %734 : vector<8x64xf32>
    %c12_347 = arith.constant 12 : index
    %c6_348 = arith.constant 6 : index
    %736 = memref.load %arg4[%c12_347, %c6_348] : memref<16x20xf32, #tpu.memory_space<smem>>
    %737 = vector.broadcast %736 : f32 to vector<8x64xf32>
    %738 = arith.mulf %220, %737 : vector<8x64xf32>
    %739 = arith.addf %735, %738 : vector<8x64xf32>
    %c13_349 = arith.constant 13 : index
    %c6_350 = arith.constant 6 : index
    %740 = memref.load %arg4[%c13_349, %c6_350] : memref<16x20xf32, #tpu.memory_space<smem>>
    %741 = vector.broadcast %740 : f32 to vector<8x64xf32>
    %742 = arith.mulf %236, %741 : vector<8x64xf32>
    %743 = arith.addf %739, %742 : vector<8x64xf32>
    %c14_351 = arith.constant 14 : index
    %c6_352 = arith.constant 6 : index
    %744 = memref.load %arg4[%c14_351, %c6_352] : memref<16x20xf32, #tpu.memory_space<smem>>
    %745 = vector.broadcast %744 : f32 to vector<8x64xf32>
    %746 = arith.mulf %252, %745 : vector<8x64xf32>
    %747 = arith.addf %743, %746 : vector<8x64xf32>
    %c15_353 = arith.constant 15 : index
    %c6_354 = arith.constant 6 : index
    %748 = memref.load %arg4[%c15_353, %c6_354] : memref<16x20xf32, #tpu.memory_space<smem>>
    %749 = vector.broadcast %748 : f32 to vector<8x64xf32>
    %750 = arith.mulf %268, %749 : vector<8x64xf32>
    %751 = arith.addf %747, %750 : vector<8x64xf32>
    %c6_355 = arith.constant 6 : index
    %752 = memref.load %arg5[%c6_355] : memref<20xf32, #tpu.memory_space<smem>>
    %753 = vector.broadcast %752 : f32 to vector<8x64xf32>
    %754 = arith.addf %751, %753 : vector<8x64xf32>
    %cst_356 = arith.constant 0.000000e+00 : f32
    %755 = vector.broadcast %cst_356 : f32 to vector<8x64xf32>
    %756 = arith.maximumf %754, %755 : vector<8x64xf32>
    %757 = arith.index_cast %3 : i32 to index
    %c384 = arith.constant 384 : index
    %758 = vector.load %arg9[%757, %c384] : memref<8x1280xf32, #tpu.memory_space<vmem>>, vector<8x64xf32>
    tpu.vector_store %arg9[%757, %c384], %756 {strides = array<i32>} : memref<8x1280xf32, #tpu.memory_space<vmem>>, vector<8x64xf32>,
    %c0_357 = arith.constant 0 : index
    %c7_358 = arith.constant 7 : index
    %759 = memref.load %arg4[%c0_357, %c7_358] : memref<16x20xf32, #tpu.memory_space<smem>>
    %760 = vector.broadcast %759 : f32 to vector<8x64xf32>
    %761 = arith.mulf %28, %760 : vector<8x64xf32>
    %c1_359 = arith.constant 1 : index
    %c7_360 = arith.constant 7 : index
    %762 = memref.load %arg4[%c1_359, %c7_360] : memref<16x20xf32, #tpu.memory_space<smem>>
    %763 = vector.broadcast %762 : f32 to vector<8x64xf32>
    %764 = arith.mulf %44, %763 : vector<8x64xf32>
    %765 = arith.addf %761, %764 : vector<8x64xf32>
    %c2_361 = arith.constant 2 : index
    %c7_362 = arith.constant 7 : index
    %766 = memref.load %arg4[%c2_361, %c7_362] : memref<16x20xf32, #tpu.memory_space<smem>>
    %767 = vector.broadcast %766 : f32 to vector<8x64xf32>
    %768 = arith.mulf %60, %767 : vector<8x64xf32>
    %769 = arith.addf %765, %768 : vector<8x64xf32>
    %c3_363 = arith.constant 3 : index
    %c7_364 = arith.constant 7 : index
    %770 = memref.load %arg4[%c3_363, %c7_364] : memref<16x20xf32, #tpu.memory_space<smem>>
    %771 = vector.broadcast %770 : f32 to vector<8x64xf32>
    %772 = arith.mulf %76, %771 : vector<8x64xf32>
    %773 = arith.addf %769, %772 : vector<8x64xf32>
    %c4_365 = arith.constant 4 : index
    %c7_366 = arith.constant 7 : index
    %774 = memref.load %arg4[%c4_365, %c7_366] : memref<16x20xf32, #tpu.memory_space<smem>>
    %775 = vector.broadcast %774 : f32 to vector<8x64xf32>
    %776 = arith.mulf %92, %775 : vector<8x64xf32>
    %777 = arith.addf %773, %776 : vector<8x64xf32>
    %c5_367 = arith.constant 5 : index
    %c7_368 = arith.constant 7 : index
    %778 = memref.load %arg4[%c5_367, %c7_368] : memref<16x20xf32, #tpu.memory_space<smem>>
    %779 = vector.broadcast %778 : f32 to vector<8x64xf32>
    %780 = arith.mulf %108, %779 : vector<8x64xf32>
    %781 = arith.addf %777, %780 : vector<8x64xf32>
    %c6_369 = arith.constant 6 : index
    %c7_370 = arith.constant 7 : index
    %782 = memref.load %arg4[%c6_369, %c7_370] : memref<16x20xf32, #tpu.memory_space<smem>>
    %783 = vector.broadcast %782 : f32 to vector<8x64xf32>
    %784 = arith.mulf %124, %783 : vector<8x64xf32>
    %785 = arith.addf %781, %784 : vector<8x64xf32>
    %c7_371 = arith.constant 7 : index
    %c7_372 = arith.constant 7 : index
    %786 = memref.load %arg4[%c7_371, %c7_372] : memref<16x20xf32, #tpu.memory_space<smem>>
    %787 = vector.broadcast %786 : f32 to vector<8x64xf32>
    %788 = arith.mulf %140, %787 : vector<8x64xf32>
    %789 = arith.addf %785, %788 : vector<8x64xf32>
    %c8_373 = arith.constant 8 : index
    %c7_374 = arith.constant 7 : index
    %790 = memref.load %arg4[%c8_373, %c7_374] : memref<16x20xf32, #tpu.memory_space<smem>>
    %791 = vector.broadcast %790 : f32 to vector<8x64xf32>
    %792 = arith.mulf %156, %791 : vector<8x64xf32>
    %793 = arith.addf %789, %792 : vector<8x64xf32>
    %c9_375 = arith.constant 9 : index
    %c7_376 = arith.constant 7 : index
    %794 = memref.load %arg4[%c9_375, %c7_376] : memref<16x20xf32, #tpu.memory_space<smem>>
    %795 = vector.broadcast %794 : f32 to vector<8x64xf32>
    %796 = arith.mulf %172, %795 : vector<8x64xf32>
    %797 = arith.addf %793, %796 : vector<8x64xf32>
    %c10_377 = arith.constant 10 : index
    %c7_378 = arith.constant 7 : index
    %798 = memref.load %arg4[%c10_377, %c7_378] : memref<16x20xf32, #tpu.memory_space<smem>>
    %799 = vector.broadcast %798 : f32 to vector<8x64xf32>
    %800 = arith.mulf %188, %799 : vector<8x64xf32>
    %801 = arith.addf %797, %800 : vector<8x64xf32>
    %c11_379 = arith.constant 11 : index
    %c7_380 = arith.constant 7 : index
    %802 = memref.load %arg4[%c11_379, %c7_380] : memref<16x20xf32, #tpu.memory_space<smem>>
    %803 = vector.broadcast %802 : f32 to vector<8x64xf32>
    %804 = arith.mulf %204, %803 : vector<8x64xf32>
    %805 = arith.addf %801, %804 : vector<8x64xf32>
    %c12_381 = arith.constant 12 : index
    %c7_382 = arith.constant 7 : index
    %806 = memref.load %arg4[%c12_381, %c7_382] : memref<16x20xf32, #tpu.memory_space<smem>>
    %807 = vector.broadcast %806 : f32 to vector<8x64xf32>
    %808 = arith.mulf %220, %807 : vector<8x64xf32>
    %809 = arith.addf %805, %808 : vector<8x64xf32>
    %c13_383 = arith.constant 13 : index
    %c7_384 = arith.constant 7 : index
    %810 = memref.load %arg4[%c13_383, %c7_384] : memref<16x20xf32, #tpu.memory_space<smem>>
    %811 = vector.broadcast %810 : f32 to vector<8x64xf32>
    %812 = arith.mulf %236, %811 : vector<8x64xf32>
    %813 = arith.addf %809, %812 : vector<8x64xf32>
    %c14_385 = arith.constant 14 : index
    %c7_386 = arith.constant 7 : index
    %814 = memref.load %arg4[%c14_385, %c7_386] : memref<16x20xf32, #tpu.memory_space<smem>>
    %815 = vector.broadcast %814 : f32 to vector<8x64xf32>
    %816 = arith.mulf %252, %815 : vector<8x64xf32>
    %817 = arith.addf %813, %816 : vector<8x64xf32>
    %c15_387 = arith.constant 15 : index
    %c7_388 = arith.constant 7 : index
    %818 = memref.load %arg4[%c15_387, %c7_388] : memref<16x20xf32, #tpu.memory_space<smem>>
    %819 = vector.broadcast %818 : f32 to vector<8x64xf32>
    %820 = arith.mulf %268, %819 : vector<8x64xf32>
    %821 = arith.addf %817, %820 : vector<8x64xf32>
    %c7_389 = arith.constant 7 : index
    %822 = memref.load %arg5[%c7_389] : memref<20xf32, #tpu.memory_space<smem>>
    %823 = vector.broadcast %822 : f32 to vector<8x64xf32>
    %824 = arith.addf %821, %823 : vector<8x64xf32>
    %cst_390 = arith.constant 0.000000e+00 : f32
    %825 = vector.broadcast %cst_390 : f32 to vector<8x64xf32>
    %826 = arith.maximumf %824, %825 : vector<8x64xf32>
    %827 = arith.index_cast %3 : i32 to index
    %c448 = arith.constant 448 : index
    %828 = vector.load %arg9[%827, %c448] : memref<8x1280xf32, #tpu.memory_space<vmem>>, vector<8x64xf32>
    tpu.vector_store %arg9[%827, %c448], %826 {strides = array<i32>} : memref<8x1280xf32, #tpu.memory_space<vmem>>, vector<8x64xf32>,
    %c0_391 = arith.constant 0 : index
    %c8_392 = arith.constant 8 : index
    %829 = memref.load %arg4[%c0_391, %c8_392] : memref<16x20xf32, #tpu.memory_space<smem>>
    %830 = vector.broadcast %829 : f32 to vector<8x64xf32>
    %831 = arith.mulf %28, %830 : vector<8x64xf32>
    %c1_393 = arith.constant 1 : index
    %c8_394 = arith.constant 8 : index
    %832 = memref.load %arg4[%c1_393, %c8_394] : memref<16x20xf32, #tpu.memory_space<smem>>
    %833 = vector.broadcast %832 : f32 to vector<8x64xf32>
    %834 = arith.mulf %44, %833 : vector<8x64xf32>
    %835 = arith.addf %831, %834 : vector<8x64xf32>
    %c2_395 = arith.constant 2 : index
    %c8_396 = arith.constant 8 : index
    %836 = memref.load %arg4[%c2_395, %c8_396] : memref<16x20xf32, #tpu.memory_space<smem>>
    %837 = vector.broadcast %836 : f32 to vector<8x64xf32>
    %838 = arith.mulf %60, %837 : vector<8x64xf32>
    %839 = arith.addf %835, %838 : vector<8x64xf32>
    %c3_397 = arith.constant 3 : index
    %c8_398 = arith.constant 8 : index
    %840 = memref.load %arg4[%c3_397, %c8_398] : memref<16x20xf32, #tpu.memory_space<smem>>
    %841 = vector.broadcast %840 : f32 to vector<8x64xf32>
    %842 = arith.mulf %76, %841 : vector<8x64xf32>
    %843 = arith.addf %839, %842 : vector<8x64xf32>
    %c4_399 = arith.constant 4 : index
    %c8_400 = arith.constant 8 : index
    %844 = memref.load %arg4[%c4_399, %c8_400] : memref<16x20xf32, #tpu.memory_space<smem>>
    %845 = vector.broadcast %844 : f32 to vector<8x64xf32>
    %846 = arith.mulf %92, %845 : vector<8x64xf32>
    %847 = arith.addf %843, %846 : vector<8x64xf32>
    %c5_401 = arith.constant 5 : index
    %c8_402 = arith.constant 8 : index
    %848 = memref.load %arg4[%c5_401, %c8_402] : memref<16x20xf32, #tpu.memory_space<smem>>
    %849 = vector.broadcast %848 : f32 to vector<8x64xf32>
    %850 = arith.mulf %108, %849 : vector<8x64xf32>
    %851 = arith.addf %847, %850 : vector<8x64xf32>
    %c6_403 = arith.constant 6 : index
    %c8_404 = arith.constant 8 : index
    %852 = memref.load %arg4[%c6_403, %c8_404] : memref<16x20xf32, #tpu.memory_space<smem>>
    %853 = vector.broadcast %852 : f32 to vector<8x64xf32>
    %854 = arith.mulf %124, %853 : vector<8x64xf32>
    %855 = arith.addf %851, %854 : vector<8x64xf32>
    %c7_405 = arith.constant 7 : index
    %c8_406 = arith.constant 8 : index
    %856 = memref.load %arg4[%c7_405, %c8_406] : memref<16x20xf32, #tpu.memory_space<smem>>
    %857 = vector.broadcast %856 : f32 to vector<8x64xf32>
    %858 = arith.mulf %140, %857 : vector<8x64xf32>
    %859 = arith.addf %855, %858 : vector<8x64xf32>
    %c8_407 = arith.constant 8 : index
    %c8_408 = arith.constant 8 : index
    %860 = memref.load %arg4[%c8_407, %c8_408] : memref<16x20xf32, #tpu.memory_space<smem>>
    %861 = vector.broadcast %860 : f32 to vector<8x64xf32>
    %862 = arith.mulf %156, %861 : vector<8x64xf32>
    %863 = arith.addf %859, %862 : vector<8x64xf32>
    %c9_409 = arith.constant 9 : index
    %c8_410 = arith.constant 8 : index
    %864 = memref.load %arg4[%c9_409, %c8_410] : memref<16x20xf32, #tpu.memory_space<smem>>
    %865 = vector.broadcast %864 : f32 to vector<8x64xf32>
    %866 = arith.mulf %172, %865 : vector<8x64xf32>
    %867 = arith.addf %863, %866 : vector<8x64xf32>
    %c10_411 = arith.constant 10 : index
    %c8_412 = arith.constant 8 : index
    %868 = memref.load %arg4[%c10_411, %c8_412] : memref<16x20xf32, #tpu.memory_space<smem>>
    %869 = vector.broadcast %868 : f32 to vector<8x64xf32>
    %870 = arith.mulf %188, %869 : vector<8x64xf32>
    %871 = arith.addf %867, %870 : vector<8x64xf32>
    %c11_413 = arith.constant 11 : index
    %c8_414 = arith.constant 8 : index
    %872 = memref.load %arg4[%c11_413, %c8_414] : memref<16x20xf32, #tpu.memory_space<smem>>
    %873 = vector.broadcast %872 : f32 to vector<8x64xf32>
    %874 = arith.mulf %204, %873 : vector<8x64xf32>
    %875 = arith.addf %871, %874 : vector<8x64xf32>
    %c12_415 = arith.constant 12 : index
    %c8_416 = arith.constant 8 : index
    %876 = memref.load %arg4[%c12_415, %c8_416] : memref<16x20xf32, #tpu.memory_space<smem>>
    %877 = vector.broadcast %876 : f32 to vector<8x64xf32>
    %878 = arith.mulf %220, %877 : vector<8x64xf32>
    %879 = arith.addf %875, %878 : vector<8x64xf32>
    %c13_417 = arith.constant 13 : index
    %c8_418 = arith.constant 8 : index
    %880 = memref.load %arg4[%c13_417, %c8_418] : memref<16x20xf32, #tpu.memory_space<smem>>
    %881 = vector.broadcast %880 : f32 to vector<8x64xf32>
    %882 = arith.mulf %236, %881 : vector<8x64xf32>
    %883 = arith.addf %879, %882 : vector<8x64xf32>
    %c14_419 = arith.constant 14 : index
    %c8_420 = arith.constant 8 : index
    %884 = memref.load %arg4[%c14_419, %c8_420] : memref<16x20xf32, #tpu.memory_space<smem>>
    %885 = vector.broadcast %884 : f32 to vector<8x64xf32>
    %886 = arith.mulf %252, %885 : vector<8x64xf32>
    %887 = arith.addf %883, %886 : vector<8x64xf32>
    %c15_421 = arith.constant 15 : index
    %c8_422 = arith.constant 8 : index
    %888 = memref.load %arg4[%c15_421, %c8_422] : memref<16x20xf32, #tpu.memory_space<smem>>
    %889 = vector.broadcast %888 : f32 to vector<8x64xf32>
    %890 = arith.mulf %268, %889 : vector<8x64xf32>
    %891 = arith.addf %887, %890 : vector<8x64xf32>
    %c8_423 = arith.constant 8 : index
    %892 = memref.load %arg5[%c8_423] : memref<20xf32, #tpu.memory_space<smem>>
    %893 = vector.broadcast %892 : f32 to vector<8x64xf32>
    %894 = arith.addf %891, %893 : vector<8x64xf32>
    %cst_424 = arith.constant 0.000000e+00 : f32
    %895 = vector.broadcast %cst_424 : f32 to vector<8x64xf32>
    %896 = arith.maximumf %894, %895 : vector<8x64xf32>
    %897 = arith.index_cast %3 : i32 to index
    %c512 = arith.constant 512 : index
    %898 = vector.load %arg9[%897, %c512] : memref<8x1280xf32, #tpu.memory_space<vmem>>, vector<8x64xf32>
    tpu.vector_store %arg9[%897, %c512], %896 {strides = array<i32>} : memref<8x1280xf32, #tpu.memory_space<vmem>>, vector<8x64xf32>,
    %c0_425 = arith.constant 0 : index
    %c9_426 = arith.constant 9 : index
    %899 = memref.load %arg4[%c0_425, %c9_426] : memref<16x20xf32, #tpu.memory_space<smem>>
    %900 = vector.broadcast %899 : f32 to vector<8x64xf32>
    %901 = arith.mulf %28, %900 : vector<8x64xf32>
    %c1_427 = arith.constant 1 : index
    %c9_428 = arith.constant 9 : index
    %902 = memref.load %arg4[%c1_427, %c9_428] : memref<16x20xf32, #tpu.memory_space<smem>>
    %903 = vector.broadcast %902 : f32 to vector<8x64xf32>
    %904 = arith.mulf %44, %903 : vector<8x64xf32>
    %905 = arith.addf %901, %904 : vector<8x64xf32>
    %c2_429 = arith.constant 2 : index
    %c9_430 = arith.constant 9 : index
    %906 = memref.load %arg4[%c2_429, %c9_430] : memref<16x20xf32, #tpu.memory_space<smem>>
    %907 = vector.broadcast %906 : f32 to vector<8x64xf32>
    %908 = arith.mulf %60, %907 : vector<8x64xf32>
    %909 = arith.addf %905, %908 : vector<8x64xf32>
    %c3_431 = arith.constant 3 : index
    %c9_432 = arith.constant 9 : index
    %910 = memref.load %arg4[%c3_431, %c9_432] : memref<16x20xf32, #tpu.memory_space<smem>>
    %911 = vector.broadcast %910 : f32 to vector<8x64xf32>
    %912 = arith.mulf %76, %911 : vector<8x64xf32>
    %913 = arith.addf %909, %912 : vector<8x64xf32>
    %c4_433 = arith.constant 4 : index
    %c9_434 = arith.constant 9 : index
    %914 = memref.load %arg4[%c4_433, %c9_434] : memref<16x20xf32, #tpu.memory_space<smem>>
    %915 = vector.broadcast %914 : f32 to vector<8x64xf32>
    %916 = arith.mulf %92, %915 : vector<8x64xf32>
    %917 = arith.addf %913, %916 : vector<8x64xf32>
    %c5_435 = arith.constant 5 : index
    %c9_436 = arith.constant 9 : index
    %918 = memref.load %arg4[%c5_435, %c9_436] : memref<16x20xf32, #tpu.memory_space<smem>>
    %919 = vector.broadcast %918 : f32 to vector<8x64xf32>
    %920 = arith.mulf %108, %919 : vector<8x64xf32>
    %921 = arith.addf %917, %920 : vector<8x64xf32>
    %c6_437 = arith.constant 6 : index
    %c9_438 = arith.constant 9 : index
    %922 = memref.load %arg4[%c6_437, %c9_438] : memref<16x20xf32, #tpu.memory_space<smem>>
    %923 = vector.broadcast %922 : f32 to vector<8x64xf32>
    %924 = arith.mulf %124, %923 : vector<8x64xf32>
    %925 = arith.addf %921, %924 : vector<8x64xf32>
    %c7_439 = arith.constant 7 : index
    %c9_440 = arith.constant 9 : index
    %926 = memref.load %arg4[%c7_439, %c9_440] : memref<16x20xf32, #tpu.memory_space<smem>>
    %927 = vector.broadcast %926 : f32 to vector<8x64xf32>
    %928 = arith.mulf %140, %927 : vector<8x64xf32>
    %929 = arith.addf %925, %928 : vector<8x64xf32>
    %c8_441 = arith.constant 8 : index
    %c9_442 = arith.constant 9 : index
    %930 = memref.load %arg4[%c8_441, %c9_442] : memref<16x20xf32, #tpu.memory_space<smem>>
    %931 = vector.broadcast %930 : f32 to vector<8x64xf32>
    %932 = arith.mulf %156, %931 : vector<8x64xf32>
    %933 = arith.addf %929, %932 : vector<8x64xf32>
    %c9_443 = arith.constant 9 : index
    %c9_444 = arith.constant 9 : index
    %934 = memref.load %arg4[%c9_443, %c9_444] : memref<16x20xf32, #tpu.memory_space<smem>>
    %935 = vector.broadcast %934 : f32 to vector<8x64xf32>
    %936 = arith.mulf %172, %935 : vector<8x64xf32>
    %937 = arith.addf %933, %936 : vector<8x64xf32>
    %c10_445 = arith.constant 10 : index
    %c9_446 = arith.constant 9 : index
    %938 = memref.load %arg4[%c10_445, %c9_446] : memref<16x20xf32, #tpu.memory_space<smem>>
    %939 = vector.broadcast %938 : f32 to vector<8x64xf32>
    %940 = arith.mulf %188, %939 : vector<8x64xf32>
    %941 = arith.addf %937, %940 : vector<8x64xf32>
    %c11_447 = arith.constant 11 : index
    %c9_448 = arith.constant 9 : index
    %942 = memref.load %arg4[%c11_447, %c9_448] : memref<16x20xf32, #tpu.memory_space<smem>>
    %943 = vector.broadcast %942 : f32 to vector<8x64xf32>
    %944 = arith.mulf %204, %943 : vector<8x64xf32>
    %945 = arith.addf %941, %944 : vector<8x64xf32>
    %c12_449 = arith.constant 12 : index
    %c9_450 = arith.constant 9 : index
    %946 = memref.load %arg4[%c12_449, %c9_450] : memref<16x20xf32, #tpu.memory_space<smem>>
    %947 = vector.broadcast %946 : f32 to vector<8x64xf32>
    %948 = arith.mulf %220, %947 : vector<8x64xf32>
    %949 = arith.addf %945, %948 : vector<8x64xf32>
    %c13_451 = arith.constant 13 : index
    %c9_452 = arith.constant 9 : index
    %950 = memref.load %arg4[%c13_451, %c9_452] : memref<16x20xf32, #tpu.memory_space<smem>>
    %951 = vector.broadcast %950 : f32 to vector<8x64xf32>
    %952 = arith.mulf %236, %951 : vector<8x64xf32>
    %953 = arith.addf %949, %952 : vector<8x64xf32>
    %c14_453 = arith.constant 14 : index
    %c9_454 = arith.constant 9 : index
    %954 = memref.load %arg4[%c14_453, %c9_454] : memref<16x20xf32, #tpu.memory_space<smem>>
    %955 = vector.broadcast %954 : f32 to vector<8x64xf32>
    %956 = arith.mulf %252, %955 : vector<8x64xf32>
    %957 = arith.addf %953, %956 : vector<8x64xf32>
    %c15_455 = arith.constant 15 : index
    %c9_456 = arith.constant 9 : index
    %958 = memref.load %arg4[%c15_455, %c9_456] : memref<16x20xf32, #tpu.memory_space<smem>>
    %959 = vector.broadcast %958 : f32 to vector<8x64xf32>
    %960 = arith.mulf %268, %959 : vector<8x64xf32>
    %961 = arith.addf %957, %960 : vector<8x64xf32>
    %c9_457 = arith.constant 9 : index
    %962 = memref.load %arg5[%c9_457] : memref<20xf32, #tpu.memory_space<smem>>
    %963 = vector.broadcast %962 : f32 to vector<8x64xf32>
    %964 = arith.addf %961, %963 : vector<8x64xf32>
    %cst_458 = arith.constant 0.000000e+00 : f32
    %965 = vector.broadcast %cst_458 : f32 to vector<8x64xf32>
    %966 = arith.maximumf %964, %965 : vector<8x64xf32>
    %967 = arith.index_cast %3 : i32 to index
    %c576 = arith.constant 576 : index
    %968 = vector.load %arg9[%967, %c576] : memref<8x1280xf32, #tpu.memory_space<vmem>>, vector<8x64xf32>
    tpu.vector_store %arg9[%967, %c576], %966 {strides = array<i32>} : memref<8x1280xf32, #tpu.memory_space<vmem>>, vector<8x64xf32>,
    %c0_459 = arith.constant 0 : index
    %c10_460 = arith.constant 10 : index
    %969 = memref.load %arg4[%c0_459, %c10_460] : memref<16x20xf32, #tpu.memory_space<smem>>
    %970 = vector.broadcast %969 : f32 to vector<8x64xf32>
    %971 = arith.mulf %28, %970 : vector<8x64xf32>
    %c1_461 = arith.constant 1 : index
    %c10_462 = arith.constant 10 : index
    %972 = memref.load %arg4[%c1_461, %c10_462] : memref<16x20xf32, #tpu.memory_space<smem>>
    %973 = vector.broadcast %972 : f32 to vector<8x64xf32>
    %974 = arith.mulf %44, %973 : vector<8x64xf32>
    %975 = arith.addf %971, %974 : vector<8x64xf32>
    %c2_463 = arith.constant 2 : index
    %c10_464 = arith.constant 10 : index
    %976 = memref.load %arg4[%c2_463, %c10_464] : memref<16x20xf32, #tpu.memory_space<smem>>
    %977 = vector.broadcast %976 : f32 to vector<8x64xf32>
    %978 = arith.mulf %60, %977 : vector<8x64xf32>
    %979 = arith.addf %975, %978 : vector<8x64xf32>
    %c3_465 = arith.constant 3 : index
    %c10_466 = arith.constant 10 : index
    %980 = memref.load %arg4[%c3_465, %c10_466] : memref<16x20xf32, #tpu.memory_space<smem>>
    %981 = vector.broadcast %980 : f32 to vector<8x64xf32>
    %982 = arith.mulf %76, %981 : vector<8x64xf32>
    %983 = arith.addf %979, %982 : vector<8x64xf32>
    %c4_467 = arith.constant 4 : index
    %c10_468 = arith.constant 10 : index
    %984 = memref.load %arg4[%c4_467, %c10_468] : memref<16x20xf32, #tpu.memory_space<smem>>
    %985 = vector.broadcast %984 : f32 to vector<8x64xf32>
    %986 = arith.mulf %92, %985 : vector<8x64xf32>
    %987 = arith.addf %983, %986 : vector<8x64xf32>
    %c5_469 = arith.constant 5 : index
    %c10_470 = arith.constant 10 : index
    %988 = memref.load %arg4[%c5_469, %c10_470] : memref<16x20xf32, #tpu.memory_space<smem>>
    %989 = vector.broadcast %988 : f32 to vector<8x64xf32>
    %990 = arith.mulf %108, %989 : vector<8x64xf32>
    %991 = arith.addf %987, %990 : vector<8x64xf32>
    %c6_471 = arith.constant 6 : index
    %c10_472 = arith.constant 10 : index
    %992 = memref.load %arg4[%c6_471, %c10_472] : memref<16x20xf32, #tpu.memory_space<smem>>
    %993 = vector.broadcast %992 : f32 to vector<8x64xf32>
    %994 = arith.mulf %124, %993 : vector<8x64xf32>
    %995 = arith.addf %991, %994 : vector<8x64xf32>
    %c7_473 = arith.constant 7 : index
    %c10_474 = arith.constant 10 : index
    %996 = memref.load %arg4[%c7_473, %c10_474] : memref<16x20xf32, #tpu.memory_space<smem>>
    %997 = vector.broadcast %996 : f32 to vector<8x64xf32>
    %998 = arith.mulf %140, %997 : vector<8x64xf32>
    %999 = arith.addf %995, %998 : vector<8x64xf32>
    %c8_475 = arith.constant 8 : index
    %c10_476 = arith.constant 10 : index
    %1000 = memref.load %arg4[%c8_475, %c10_476] : memref<16x20xf32, #tpu.memory_space<smem>>
    %1001 = vector.broadcast %1000 : f32 to vector<8x64xf32>
    %1002 = arith.mulf %156, %1001 : vector<8x64xf32>
    %1003 = arith.addf %999, %1002 : vector<8x64xf32>
    %c9_477 = arith.constant 9 : index
    %c10_478 = arith.constant 10 : index
    %1004 = memref.load %arg4[%c9_477, %c10_478] : memref<16x20xf32, #tpu.memory_space<smem>>
    %1005 = vector.broadcast %1004 : f32 to vector<8x64xf32>
    %1006 = arith.mulf %172, %1005 : vector<8x64xf32>
    %1007 = arith.addf %1003, %1006 : vector<8x64xf32>
    %c10_479 = arith.constant 10 : index
    %c10_480 = arith.constant 10 : index
    %1008 = memref.load %arg4[%c10_479, %c10_480] : memref<16x20xf32, #tpu.memory_space<smem>>
    %1009 = vector.broadcast %1008 : f32 to vector<8x64xf32>
    %1010 = arith.mulf %188, %1009 : vector<8x64xf32>
    %1011 = arith.addf %1007, %1010 : vector<8x64xf32>
    %c11_481 = arith.constant 11 : index
    %c10_482 = arith.constant 10 : index
    %1012 = memref.load %arg4[%c11_481, %c10_482] : memref<16x20xf32, #tpu.memory_space<smem>>
    %1013 = vector.broadcast %1012 : f32 to vector<8x64xf32>
    %1014 = arith.mulf %204, %1013 : vector<8x64xf32>
    %1015 = arith.addf %1011, %1014 : vector<8x64xf32>
    %c12_483 = arith.constant 12 : index
    %c10_484 = arith.constant 10 : index
    %1016 = memref.load %arg4[%c12_483, %c10_484] : memref<16x20xf32, #tpu.memory_space<smem>>
    %1017 = vector.broadcast %1016 : f32 to vector<8x64xf32>
    %1018 = arith.mulf %220, %1017 : vector<8x64xf32>
    %1019 = arith.addf %1015, %1018 : vector<8x64xf32>
    %c13_485 = arith.constant 13 : index
    %c10_486 = arith.constant 10 : index
    %1020 = memref.load %arg4[%c13_485, %c10_486] : memref<16x20xf32, #tpu.memory_space<smem>>
    %1021 = vector.broadcast %1020 : f32 to vector<8x64xf32>
    %1022 = arith.mulf %236, %1021 : vector<8x64xf32>
    %1023 = arith.addf %1019, %1022 : vector<8x64xf32>
    %c14_487 = arith.constant 14 : index
    %c10_488 = arith.constant 10 : index
    %1024 = memref.load %arg4[%c14_487, %c10_488] : memref<16x20xf32, #tpu.memory_space<smem>>
    %1025 = vector.broadcast %1024 : f32 to vector<8x64xf32>
    %1026 = arith.mulf %252, %1025 : vector<8x64xf32>
    %1027 = arith.addf %1023, %1026 : vector<8x64xf32>
    %c15_489 = arith.constant 15 : index
    %c10_490 = arith.constant 10 : index
    %1028 = memref.load %arg4[%c15_489, %c10_490] : memref<16x20xf32, #tpu.memory_space<smem>>
    %1029 = vector.broadcast %1028 : f32 to vector<8x64xf32>
    %1030 = arith.mulf %268, %1029 : vector<8x64xf32>
    %1031 = arith.addf %1027, %1030 : vector<8x64xf32>
    %c10_491 = arith.constant 10 : index
    %1032 = memref.load %arg5[%c10_491] : memref<20xf32, #tpu.memory_space<smem>>
    %1033 = vector.broadcast %1032 : f32 to vector<8x64xf32>
    %1034 = arith.addf %1031, %1033 : vector<8x64xf32>
    %cst_492 = arith.constant 0.000000e+00 : f32
    %1035 = vector.broadcast %cst_492 : f32 to vector<8x64xf32>
    %1036 = arith.maximumf %1034, %1035 : vector<8x64xf32>
    %1037 = arith.index_cast %3 : i32 to index
    %c640 = arith.constant 640 : index
    %1038 = vector.load %arg9[%1037, %c640] : memref<8x1280xf32, #tpu.memory_space<vmem>>, vector<8x64xf32>
    tpu.vector_store %arg9[%1037, %c640], %1036 {strides = array<i32>} : memref<8x1280xf32, #tpu.memory_space<vmem>>, vector<8x64xf32>,
    %c0_493 = arith.constant 0 : index
    %c11_494 = arith.constant 11 : index
    %1039 = memref.load %arg4[%c0_493, %c11_494] : memref<16x20xf32, #tpu.memory_space<smem>>
    %1040 = vector.broadcast %1039 : f32 to vector<8x64xf32>
    %1041 = arith.mulf %28, %1040 : vector<8x64xf32>
    %c1_495 = arith.constant 1 : index
    %c11_496 = arith.constant 11 : index
    %1042 = memref.load %arg4[%c1_495, %c11_496] : memref<16x20xf32, #tpu.memory_space<smem>>
    %1043 = vector.broadcast %1042 : f32 to vector<8x64xf32>
    %1044 = arith.mulf %44, %1043 : vector<8x64xf32>
    %1045 = arith.addf %1041, %1044 : vector<8x64xf32>
    %c2_497 = arith.constant 2 : index
    %c11_498 = arith.constant 11 : index
    %1046 = memref.load %arg4[%c2_497, %c11_498] : memref<16x20xf32, #tpu.memory_space<smem>>
    %1047 = vector.broadcast %1046 : f32 to vector<8x64xf32>
    %1048 = arith.mulf %60, %1047 : vector<8x64xf32>
    %1049 = arith.addf %1045, %1048 : vector<8x64xf32>
    %c3_499 = arith.constant 3 : index
    %c11_500 = arith.constant 11 : index
    %1050 = memref.load %arg4[%c3_499, %c11_500] : memref<16x20xf32, #tpu.memory_space<smem>>
    %1051 = vector.broadcast %1050 : f32 to vector<8x64xf32>
    %1052 = arith.mulf %76, %1051 : vector<8x64xf32>
    %1053 = arith.addf %1049, %1052 : vector<8x64xf32>
    %c4_501 = arith.constant 4 : index
    %c11_502 = arith.constant 11 : index
    %1054 = memref.load %arg4[%c4_501, %c11_502] : memref<16x20xf32, #tpu.memory_space<smem>>
    %1055 = vector.broadcast %1054 : f32 to vector<8x64xf32>
    %1056 = arith.mulf %92, %1055 : vector<8x64xf32>
    %1057 = arith.addf %1053, %1056 : vector<8x64xf32>
    %c5_503 = arith.constant 5 : index
    %c11_504 = arith.constant 11 : index
    %1058 = memref.load %arg4[%c5_503, %c11_504] : memref<16x20xf32, #tpu.memory_space<smem>>
    %1059 = vector.broadcast %1058 : f32 to vector<8x64xf32>
    %1060 = arith.mulf %108, %1059 : vector<8x64xf32>
    %1061 = arith.addf %1057, %1060 : vector<8x64xf32>
    %c6_505 = arith.constant 6 : index
    %c11_506 = arith.constant 11 : index
    %1062 = memref.load %arg4[%c6_505, %c11_506] : memref<16x20xf32, #tpu.memory_space<smem>>
    %1063 = vector.broadcast %1062 : f32 to vector<8x64xf32>
    %1064 = arith.mulf %124, %1063 : vector<8x64xf32>
    %1065 = arith.addf %1061, %1064 : vector<8x64xf32>
    %c7_507 = arith.constant 7 : index
    %c11_508 = arith.constant 11 : index
    %1066 = memref.load %arg4[%c7_507, %c11_508] : memref<16x20xf32, #tpu.memory_space<smem>>
    %1067 = vector.broadcast %1066 : f32 to vector<8x64xf32>
    %1068 = arith.mulf %140, %1067 : vector<8x64xf32>
    %1069 = arith.addf %1065, %1068 : vector<8x64xf32>
    %c8_509 = arith.constant 8 : index
    %c11_510 = arith.constant 11 : index
    %1070 = memref.load %arg4[%c8_509, %c11_510] : memref<16x20xf32, #tpu.memory_space<smem>>
    %1071 = vector.broadcast %1070 : f32 to vector<8x64xf32>
    %1072 = arith.mulf %156, %1071 : vector<8x64xf32>
    %1073 = arith.addf %1069, %1072 : vector<8x64xf32>
    %c9_511 = arith.constant 9 : index
    %c11_512 = arith.constant 11 : index
    %1074 = memref.load %arg4[%c9_511, %c11_512] : memref<16x20xf32, #tpu.memory_space<smem>>
    %1075 = vector.broadcast %1074 : f32 to vector<8x64xf32>
    %1076 = arith.mulf %172, %1075 : vector<8x64xf32>
    %1077 = arith.addf %1073, %1076 : vector<8x64xf32>
    %c10_513 = arith.constant 10 : index
    %c11_514 = arith.constant 11 : index
    %1078 = memref.load %arg4[%c10_513, %c11_514] : memref<16x20xf32, #tpu.memory_space<smem>>
    %1079 = vector.broadcast %1078 : f32 to vector<8x64xf32>
    %1080 = arith.mulf %188, %1079 : vector<8x64xf32>
    %1081 = arith.addf %1077, %1080 : vector<8x64xf32>
    %c11_515 = arith.constant 11 : index
    %c11_516 = arith.constant 11 : index
    %1082 = memref.load %arg4[%c11_515, %c11_516] : memref<16x20xf32, #tpu.memory_space<smem>>
    %1083 = vector.broadcast %1082 : f32 to vector<8x64xf32>
    %1084 = arith.mulf %204, %1083 : vector<8x64xf32>
    %1085 = arith.addf %1081, %1084 : vector<8x64xf32>
    %c12_517 = arith.constant 12 : index
    %c11_518 = arith.constant 11 : index
    %1086 = memref.load %arg4[%c12_517, %c11_518] : memref<16x20xf32, #tpu.memory_space<smem>>
    %1087 = vector.broadcast %1086 : f32 to vector<8x64xf32>
    %1088 = arith.mulf %220, %1087 : vector<8x64xf32>
    %1089 = arith.addf %1085, %1088 : vector<8x64xf32>
    %c13_519 = arith.constant 13 : index
    %c11_520 = arith.constant 11 : index
    %1090 = memref.load %arg4[%c13_519, %c11_520] : memref<16x20xf32, #tpu.memory_space<smem>>
    %1091 = vector.broadcast %1090 : f32 to vector<8x64xf32>
    %1092 = arith.mulf %236, %1091 : vector<8x64xf32>
    %1093 = arith.addf %1089, %1092 : vector<8x64xf32>
    %c14_521 = arith.constant 14 : index
    %c11_522 = arith.constant 11 : index
    %1094 = memref.load %arg4[%c14_521, %c11_522] : memref<16x20xf32, #tpu.memory_space<smem>>
    %1095 = vector.broadcast %1094 : f32 to vector<8x64xf32>
    %1096 = arith.mulf %252, %1095 : vector<8x64xf32>
    %1097 = arith.addf %1093, %1096 : vector<8x64xf32>
    %c15_523 = arith.constant 15 : index
    %c11_524 = arith.constant 11 : index
    %1098 = memref.load %arg4[%c15_523, %c11_524] : memref<16x20xf32, #tpu.memory_space<smem>>
    %1099 = vector.broadcast %1098 : f32 to vector<8x64xf32>
    %1100 = arith.mulf %268, %1099 : vector<8x64xf32>
    %1101 = arith.addf %1097, %1100 : vector<8x64xf32>
    %c11_525 = arith.constant 11 : index
    %1102 = memref.load %arg5[%c11_525] : memref<20xf32, #tpu.memory_space<smem>>
    %1103 = vector.broadcast %1102 : f32 to vector<8x64xf32>
    %1104 = arith.addf %1101, %1103 : vector<8x64xf32>
    %cst_526 = arith.constant 0.000000e+00 : f32
    %1105 = vector.broadcast %cst_526 : f32 to vector<8x64xf32>
    %1106 = arith.maximumf %1104, %1105 : vector<8x64xf32>
    %1107 = arith.index_cast %3 : i32 to index
    %c704 = arith.constant 704 : index
    %1108 = vector.load %arg9[%1107, %c704] : memref<8x1280xf32, #tpu.memory_space<vmem>>, vector<8x64xf32>
    tpu.vector_store %arg9[%1107, %c704], %1106 {strides = array<i32>} : memref<8x1280xf32, #tpu.memory_space<vmem>>, vector<8x64xf32>,
    %c0_527 = arith.constant 0 : index
    %c12_528 = arith.constant 12 : index
    %1109 = memref.load %arg4[%c0_527, %c12_528] : memref<16x20xf32, #tpu.memory_space<smem>>
    %1110 = vector.broadcast %1109 : f32 to vector<8x64xf32>
    %1111 = arith.mulf %28, %1110 : vector<8x64xf32>
    %c1_529 = arith.constant 1 : index
    %c12_530 = arith.constant 12 : index
    %1112 = memref.load %arg4[%c1_529, %c12_530] : memref<16x20xf32, #tpu.memory_space<smem>>
    %1113 = vector.broadcast %1112 : f32 to vector<8x64xf32>
    %1114 = arith.mulf %44, %1113 : vector<8x64xf32>
    %1115 = arith.addf %1111, %1114 : vector<8x64xf32>
    %c2_531 = arith.constant 2 : index
    %c12_532 = arith.constant 12 : index
    %1116 = memref.load %arg4[%c2_531, %c12_532] : memref<16x20xf32, #tpu.memory_space<smem>>
    %1117 = vector.broadcast %1116 : f32 to vector<8x64xf32>
    %1118 = arith.mulf %60, %1117 : vector<8x64xf32>
    %1119 = arith.addf %1115, %1118 : vector<8x64xf32>
    %c3_533 = arith.constant 3 : index
    %c12_534 = arith.constant 12 : index
    %1120 = memref.load %arg4[%c3_533, %c12_534] : memref<16x20xf32, #tpu.memory_space<smem>>
    %1121 = vector.broadcast %1120 : f32 to vector<8x64xf32>
    %1122 = arith.mulf %76, %1121 : vector<8x64xf32>
    %1123 = arith.addf %1119, %1122 : vector<8x64xf32>
    %c4_535 = arith.constant 4 : index
    %c12_536 = arith.constant 12 : index
    %1124 = memref.load %arg4[%c4_535, %c12_536] : memref<16x20xf32, #tpu.memory_space<smem>>
    %1125 = vector.broadcast %1124 : f32 to vector<8x64xf32>
    %1126 = arith.mulf %92, %1125 : vector<8x64xf32>
    %1127 = arith.addf %1123, %1126 : vector<8x64xf32>
    %c5_537 = arith.constant 5 : index
    %c12_538 = arith.constant 12 : index
    %1128 = memref.load %arg4[%c5_537, %c12_538] : memref<16x20xf32, #tpu.memory_space<smem>>
    %1129 = vector.broadcast %1128 : f32 to vector<8x64xf32>
    %1130 = arith.mulf %108, %1129 : vector<8x64xf32>
    %1131 = arith.addf %1127, %1130 : vector<8x64xf32>
    %c6_539 = arith.constant 6 : index
    %c12_540 = arith.constant 12 : index
    %1132 = memref.load %arg4[%c6_539, %c12_540] : memref<16x20xf32, #tpu.memory_space<smem>>
    %1133 = vector.broadcast %1132 : f32 to vector<8x64xf32>
    %1134 = arith.mulf %124, %1133 : vector<8x64xf32>
    %1135 = arith.addf %1131, %1134 : vector<8x64xf32>
    %c7_541 = arith.constant 7 : index
    %c12_542 = arith.constant 12 : index
    %1136 = memref.load %arg4[%c7_541, %c12_542] : memref<16x20xf32, #tpu.memory_space<smem>>
    %1137 = vector.broadcast %1136 : f32 to vector<8x64xf32>
    %1138 = arith.mulf %140, %1137 : vector<8x64xf32>
    %1139 = arith.addf %1135, %1138 : vector<8x64xf32>
    %c8_543 = arith.constant 8 : index
    %c12_544 = arith.constant 12 : index
    %1140 = memref.load %arg4[%c8_543, %c12_544] : memref<16x20xf32, #tpu.memory_space<smem>>
    %1141 = vector.broadcast %1140 : f32 to vector<8x64xf32>
    %1142 = arith.mulf %156, %1141 : vector<8x64xf32>
    %1143 = arith.addf %1139, %1142 : vector<8x64xf32>
    %c9_545 = arith.constant 9 : index
    %c12_546 = arith.constant 12 : index
    %1144 = memref.load %arg4[%c9_545, %c12_546] : memref<16x20xf32, #tpu.memory_space<smem>>
    %1145 = vector.broadcast %1144 : f32 to vector<8x64xf32>
    %1146 = arith.mulf %172, %1145 : vector<8x64xf32>
    %1147 = arith.addf %1143, %1146 : vector<8x64xf32>
    %c10_547 = arith.constant 10 : index
    %c12_548 = arith.constant 12 : index
    %1148 = memref.load %arg4[%c10_547, %c12_548] : memref<16x20xf32, #tpu.memory_space<smem>>
    %1149 = vector.broadcast %1148 : f32 to vector<8x64xf32>
    %1150 = arith.mulf %188, %1149 : vector<8x64xf32>
    %1151 = arith.addf %1147, %1150 : vector<8x64xf32>
    %c11_549 = arith.constant 11 : index
    %c12_550 = arith.constant 12 : index
    %1152 = memref.load %arg4[%c11_549, %c12_550] : memref<16x20xf32, #tpu.memory_space<smem>>
    %1153 = vector.broadcast %1152 : f32 to vector<8x64xf32>
    %1154 = arith.mulf %204, %1153 : vector<8x64xf32>
    %1155 = arith.addf %1151, %1154 : vector<8x64xf32>
    %c12_551 = arith.constant 12 : index
    %c12_552 = arith.constant 12 : index
    %1156 = memref.load %arg4[%c12_551, %c12_552] : memref<16x20xf32, #tpu.memory_space<smem>>
    %1157 = vector.broadcast %1156 : f32 to vector<8x64xf32>
    %1158 = arith.mulf %220, %1157 : vector<8x64xf32>
    %1159 = arith.addf %1155, %1158 : vector<8x64xf32>
    %c13_553 = arith.constant 13 : index
    %c12_554 = arith.constant 12 : index
    %1160 = memref.load %arg4[%c13_553, %c12_554] : memref<16x20xf32, #tpu.memory_space<smem>>
    %1161 = vector.broadcast %1160 : f32 to vector<8x64xf32>
    %1162 = arith.mulf %236, %1161 : vector<8x64xf32>
    %1163 = arith.addf %1159, %1162 : vector<8x64xf32>
    %c14_555 = arith.constant 14 : index
    %c12_556 = arith.constant 12 : index
    %1164 = memref.load %arg4[%c14_555, %c12_556] : memref<16x20xf32, #tpu.memory_space<smem>>
    %1165 = vector.broadcast %1164 : f32 to vector<8x64xf32>
    %1166 = arith.mulf %252, %1165 : vector<8x64xf32>
    %1167 = arith.addf %1163, %1166 : vector<8x64xf32>
    %c15_557 = arith.constant 15 : index
    %c12_558 = arith.constant 12 : index
    %1168 = memref.load %arg4[%c15_557, %c12_558] : memref<16x20xf32, #tpu.memory_space<smem>>
    %1169 = vector.broadcast %1168 : f32 to vector<8x64xf32>
    %1170 = arith.mulf %268, %1169 : vector<8x64xf32>
    %1171 = arith.addf %1167, %1170 : vector<8x64xf32>
    %c12_559 = arith.constant 12 : index
    %1172 = memref.load %arg5[%c12_559] : memref<20xf32, #tpu.memory_space<smem>>
    %1173 = vector.broadcast %1172 : f32 to vector<8x64xf32>
    %1174 = arith.addf %1171, %1173 : vector<8x64xf32>
    %cst_560 = arith.constant 0.000000e+00 : f32
    %1175 = vector.broadcast %cst_560 : f32 to vector<8x64xf32>
    %1176 = arith.maximumf %1174, %1175 : vector<8x64xf32>
    %1177 = arith.index_cast %3 : i32 to index
    %c768 = arith.constant 768 : index
    %1178 = vector.load %arg9[%1177, %c768] : memref<8x1280xf32, #tpu.memory_space<vmem>>, vector<8x64xf32>
    tpu.vector_store %arg9[%1177, %c768], %1176 {strides = array<i32>} : memref<8x1280xf32, #tpu.memory_space<vmem>>, vector<8x64xf32>,
    %c0_561 = arith.constant 0 : index
    %c13_562 = arith.constant 13 : index
    %1179 = memref.load %arg4[%c0_561, %c13_562] : memref<16x20xf32, #tpu.memory_space<smem>>
    %1180 = vector.broadcast %1179 : f32 to vector<8x64xf32>
    %1181 = arith.mulf %28, %1180 : vector<8x64xf32>
    %c1_563 = arith.constant 1 : index
    %c13_564 = arith.constant 13 : index
    %1182 = memref.load %arg4[%c1_563, %c13_564] : memref<16x20xf32, #tpu.memory_space<smem>>
    %1183 = vector.broadcast %1182 : f32 to vector<8x64xf32>
    %1184 = arith.mulf %44, %1183 : vector<8x64xf32>
    %1185 = arith.addf %1181, %1184 : vector<8x64xf32>
    %c2_565 = arith.constant 2 : index
    %c13_566 = arith.constant 13 : index
    %1186 = memref.load %arg4[%c2_565, %c13_566] : memref<16x20xf32, #tpu.memory_space<smem>>
    %1187 = vector.broadcast %1186 : f32 to vector<8x64xf32>
    %1188 = arith.mulf %60, %1187 : vector<8x64xf32>
    %1189 = arith.addf %1185, %1188 : vector<8x64xf32>
    %c3_567 = arith.constant 3 : index
    %c13_568 = arith.constant 13 : index
    %1190 = memref.load %arg4[%c3_567, %c13_568] : memref<16x20xf32, #tpu.memory_space<smem>>
    %1191 = vector.broadcast %1190 : f32 to vector<8x64xf32>
    %1192 = arith.mulf %76, %1191 : vector<8x64xf32>
    %1193 = arith.addf %1189, %1192 : vector<8x64xf32>
    %c4_569 = arith.constant 4 : index
    %c13_570 = arith.constant 13 : index
    %1194 = memref.load %arg4[%c4_569, %c13_570] : memref<16x20xf32, #tpu.memory_space<smem>>
    %1195 = vector.broadcast %1194 : f32 to vector<8x64xf32>
    %1196 = arith.mulf %92, %1195 : vector<8x64xf32>
    %1197 = arith.addf %1193, %1196 : vector<8x64xf32>
    %c5_571 = arith.constant 5 : index
    %c13_572 = arith.constant 13 : index
    %1198 = memref.load %arg4[%c5_571, %c13_572] : memref<16x20xf32, #tpu.memory_space<smem>>
    %1199 = vector.broadcast %1198 : f32 to vector<8x64xf32>
    %1200 = arith.mulf %108, %1199 : vector<8x64xf32>
    %1201 = arith.addf %1197, %1200 : vector<8x64xf32>
    %c6_573 = arith.constant 6 : index
    %c13_574 = arith.constant 13 : index
    %1202 = memref.load %arg4[%c6_573, %c13_574] : memref<16x20xf32, #tpu.memory_space<smem>>
    %1203 = vector.broadcast %1202 : f32 to vector<8x64xf32>
    %1204 = arith.mulf %124, %1203 : vector<8x64xf32>
    %1205 = arith.addf %1201, %1204 : vector<8x64xf32>
    %c7_575 = arith.constant 7 : index
    %c13_576 = arith.constant 13 : index
    %1206 = memref.load %arg4[%c7_575, %c13_576] : memref<16x20xf32, #tpu.memory_space<smem>>
    %1207 = vector.broadcast %1206 : f32 to vector<8x64xf32>
    %1208 = arith.mulf %140, %1207 : vector<8x64xf32>
    %1209 = arith.addf %1205, %1208 : vector<8x64xf32>
    %c8_577 = arith.constant 8 : index
    %c13_578 = arith.constant 13 : index
    %1210 = memref.load %arg4[%c8_577, %c13_578] : memref<16x20xf32, #tpu.memory_space<smem>>
    %1211 = vector.broadcast %1210 : f32 to vector<8x64xf32>
    %1212 = arith.mulf %156, %1211 : vector<8x64xf32>
    %1213 = arith.addf %1209, %1212 : vector<8x64xf32>
    %c9_579 = arith.constant 9 : index
    %c13_580 = arith.constant 13 : index
    %1214 = memref.load %arg4[%c9_579, %c13_580] : memref<16x20xf32, #tpu.memory_space<smem>>
    %1215 = vector.broadcast %1214 : f32 to vector<8x64xf32>
    %1216 = arith.mulf %172, %1215 : vector<8x64xf32>
    %1217 = arith.addf %1213, %1216 : vector<8x64xf32>
    %c10_581 = arith.constant 10 : index
    %c13_582 = arith.constant 13 : index
    %1218 = memref.load %arg4[%c10_581, %c13_582] : memref<16x20xf32, #tpu.memory_space<smem>>
    %1219 = vector.broadcast %1218 : f32 to vector<8x64xf32>
    %1220 = arith.mulf %188, %1219 : vector<8x64xf32>
    %1221 = arith.addf %1217, %1220 : vector<8x64xf32>
    %c11_583 = arith.constant 11 : index
    %c13_584 = arith.constant 13 : index
    %1222 = memref.load %arg4[%c11_583, %c13_584] : memref<16x20xf32, #tpu.memory_space<smem>>
    %1223 = vector.broadcast %1222 : f32 to vector<8x64xf32>
    %1224 = arith.mulf %204, %1223 : vector<8x64xf32>
    %1225 = arith.addf %1221, %1224 : vector<8x64xf32>
    %c12_585 = arith.constant 12 : index
    %c13_586 = arith.constant 13 : index
    %1226 = memref.load %arg4[%c12_585, %c13_586] : memref<16x20xf32, #tpu.memory_space<smem>>
    %1227 = vector.broadcast %1226 : f32 to vector<8x64xf32>
    %1228 = arith.mulf %220, %1227 : vector<8x64xf32>
    %1229 = arith.addf %1225, %1228 : vector<8x64xf32>
    %c13_587 = arith.constant 13 : index
    %c13_588 = arith.constant 13 : index
    %1230 = memref.load %arg4[%c13_587, %c13_588] : memref<16x20xf32, #tpu.memory_space<smem>>
    %1231 = vector.broadcast %1230 : f32 to vector<8x64xf32>
    %1232 = arith.mulf %236, %1231 : vector<8x64xf32>
    %1233 = arith.addf %1229, %1232 : vector<8x64xf32>
    %c14_589 = arith.constant 14 : index
    %c13_590 = arith.constant 13 : index
    %1234 = memref.load %arg4[%c14_589, %c13_590] : memref<16x20xf32, #tpu.memory_space<smem>>
    %1235 = vector.broadcast %1234 : f32 to vector<8x64xf32>
    %1236 = arith.mulf %252, %1235 : vector<8x64xf32>
    %1237 = arith.addf %1233, %1236 : vector<8x64xf32>
    %c15_591 = arith.constant 15 : index
    %c13_592 = arith.constant 13 : index
    %1238 = memref.load %arg4[%c15_591, %c13_592] : memref<16x20xf32, #tpu.memory_space<smem>>
    %1239 = vector.broadcast %1238 : f32 to vector<8x64xf32>
    %1240 = arith.mulf %268, %1239 : vector<8x64xf32>
    %1241 = arith.addf %1237, %1240 : vector<8x64xf32>
    %c13_593 = arith.constant 13 : index
    %1242 = memref.load %arg5[%c13_593] : memref<20xf32, #tpu.memory_space<smem>>
    %1243 = vector.broadcast %1242 : f32 to vector<8x64xf32>
    %1244 = arith.addf %1241, %1243 : vector<8x64xf32>
    %cst_594 = arith.constant 0.000000e+00 : f32
    %1245 = vector.broadcast %cst_594 : f32 to vector<8x64xf32>
    %1246 = arith.maximumf %1244, %1245 : vector<8x64xf32>
    %1247 = arith.index_cast %3 : i32 to index
    %c832 = arith.constant 832 : index
    %1248 = vector.load %arg9[%1247, %c832] : memref<8x1280xf32, #tpu.memory_space<vmem>>, vector<8x64xf32>
    tpu.vector_store %arg9[%1247, %c832], %1246 {strides = array<i32>} : memref<8x1280xf32, #tpu.memory_space<vmem>>, vector<8x64xf32>,
    %c0_595 = arith.constant 0 : index
    %c14_596 = arith.constant 14 : index
    %1249 = memref.load %arg4[%c0_595, %c14_596] : memref<16x20xf32, #tpu.memory_space<smem>>
    %1250 = vector.broadcast %1249 : f32 to vector<8x64xf32>
    %1251 = arith.mulf %28, %1250 : vector<8x64xf32>
    %c1_597 = arith.constant 1 : index
    %c14_598 = arith.constant 14 : index
    %1252 = memref.load %arg4[%c1_597, %c14_598] : memref<16x20xf32, #tpu.memory_space<smem>>
    %1253 = vector.broadcast %1252 : f32 to vector<8x64xf32>
    %1254 = arith.mulf %44, %1253 : vector<8x64xf32>
    %1255 = arith.addf %1251, %1254 : vector<8x64xf32>
    %c2_599 = arith.constant 2 : index
    %c14_600 = arith.constant 14 : index
    %1256 = memref.load %arg4[%c2_599, %c14_600] : memref<16x20xf32, #tpu.memory_space<smem>>
    %1257 = vector.broadcast %1256 : f32 to vector<8x64xf32>
    %1258 = arith.mulf %60, %1257 : vector<8x64xf32>
    %1259 = arith.addf %1255, %1258 : vector<8x64xf32>
    %c3_601 = arith.constant 3 : index
    %c14_602 = arith.constant 14 : index
    %1260 = memref.load %arg4[%c3_601, %c14_602] : memref<16x20xf32, #tpu.memory_space<smem>>
    %1261 = vector.broadcast %1260 : f32 to vector<8x64xf32>
    %1262 = arith.mulf %76, %1261 : vector<8x64xf32>
    %1263 = arith.addf %1259, %1262 : vector<8x64xf32>
    %c4_603 = arith.constant 4 : index
    %c14_604 = arith.constant 14 : index
    %1264 = memref.load %arg4[%c4_603, %c14_604] : memref<16x20xf32, #tpu.memory_space<smem>>
    %1265 = vector.broadcast %1264 : f32 to vector<8x64xf32>
    %1266 = arith.mulf %92, %1265 : vector<8x64xf32>
    %1267 = arith.addf %1263, %1266 : vector<8x64xf32>
    %c5_605 = arith.constant 5 : index
    %c14_606 = arith.constant 14 : index
    %1268 = memref.load %arg4[%c5_605, %c14_606] : memref<16x20xf32, #tpu.memory_space<smem>>
    %1269 = vector.broadcast %1268 : f32 to vector<8x64xf32>
    %1270 = arith.mulf %108, %1269 : vector<8x64xf32>
    %1271 = arith.addf %1267, %1270 : vector<8x64xf32>
    %c6_607 = arith.constant 6 : index
    %c14_608 = arith.constant 14 : index
    %1272 = memref.load %arg4[%c6_607, %c14_608] : memref<16x20xf32, #tpu.memory_space<smem>>
    %1273 = vector.broadcast %1272 : f32 to vector<8x64xf32>
    %1274 = arith.mulf %124, %1273 : vector<8x64xf32>
    %1275 = arith.addf %1271, %1274 : vector<8x64xf32>
    %c7_609 = arith.constant 7 : index
    %c14_610 = arith.constant 14 : index
    %1276 = memref.load %arg4[%c7_609, %c14_610] : memref<16x20xf32, #tpu.memory_space<smem>>
    %1277 = vector.broadcast %1276 : f32 to vector<8x64xf32>
    %1278 = arith.mulf %140, %1277 : vector<8x64xf32>
    %1279 = arith.addf %1275, %1278 : vector<8x64xf32>
    %c8_611 = arith.constant 8 : index
    %c14_612 = arith.constant 14 : index
    %1280 = memref.load %arg4[%c8_611, %c14_612] : memref<16x20xf32, #tpu.memory_space<smem>>
    %1281 = vector.broadcast %1280 : f32 to vector<8x64xf32>
    %1282 = arith.mulf %156, %1281 : vector<8x64xf32>
    %1283 = arith.addf %1279, %1282 : vector<8x64xf32>
    %c9_613 = arith.constant 9 : index
    %c14_614 = arith.constant 14 : index
    %1284 = memref.load %arg4[%c9_613, %c14_614] : memref<16x20xf32, #tpu.memory_space<smem>>
    %1285 = vector.broadcast %1284 : f32 to vector<8x64xf32>
    %1286 = arith.mulf %172, %1285 : vector<8x64xf32>
    %1287 = arith.addf %1283, %1286 : vector<8x64xf32>
    %c10_615 = arith.constant 10 : index
    %c14_616 = arith.constant 14 : index
    %1288 = memref.load %arg4[%c10_615, %c14_616] : memref<16x20xf32, #tpu.memory_space<smem>>
    %1289 = vector.broadcast %1288 : f32 to vector<8x64xf32>
    %1290 = arith.mulf %188, %1289 : vector<8x64xf32>
    %1291 = arith.addf %1287, %1290 : vector<8x64xf32>
    %c11_617 = arith.constant 11 : index
    %c14_618 = arith.constant 14 : index
    %1292 = memref.load %arg4[%c11_617, %c14_618] : memref<16x20xf32, #tpu.memory_space<smem>>
    %1293 = vector.broadcast %1292 : f32 to vector<8x64xf32>
    %1294 = arith.mulf %204, %1293 : vector<8x64xf32>
    %1295 = arith.addf %1291, %1294 : vector<8x64xf32>
    %c12_619 = arith.constant 12 : index
    %c14_620 = arith.constant 14 : index
    %1296 = memref.load %arg4[%c12_619, %c14_620] : memref<16x20xf32, #tpu.memory_space<smem>>
    %1297 = vector.broadcast %1296 : f32 to vector<8x64xf32>
    %1298 = arith.mulf %220, %1297 : vector<8x64xf32>
    %1299 = arith.addf %1295, %1298 : vector<8x64xf32>
    %c13_621 = arith.constant 13 : index
    %c14_622 = arith.constant 14 : index
    %1300 = memref.load %arg4[%c13_621, %c14_622] : memref<16x20xf32, #tpu.memory_space<smem>>
    %1301 = vector.broadcast %1300 : f32 to vector<8x64xf32>
    %1302 = arith.mulf %236, %1301 : vector<8x64xf32>
    %1303 = arith.addf %1299, %1302 : vector<8x64xf32>
    %c14_623 = arith.constant 14 : index
    %c14_624 = arith.constant 14 : index
    %1304 = memref.load %arg4[%c14_623, %c14_624] : memref<16x20xf32, #tpu.memory_space<smem>>
    %1305 = vector.broadcast %1304 : f32 to vector<8x64xf32>
    %1306 = arith.mulf %252, %1305 : vector<8x64xf32>
    %1307 = arith.addf %1303, %1306 : vector<8x64xf32>
    %c15_625 = arith.constant 15 : index
    %c14_626 = arith.constant 14 : index
    %1308 = memref.load %arg4[%c15_625, %c14_626] : memref<16x20xf32, #tpu.memory_space<smem>>
    %1309 = vector.broadcast %1308 : f32 to vector<8x64xf32>
    %1310 = arith.mulf %268, %1309 : vector<8x64xf32>
    %1311 = arith.addf %1307, %1310 : vector<8x64xf32>
    %c14_627 = arith.constant 14 : index
    %1312 = memref.load %arg5[%c14_627] : memref<20xf32, #tpu.memory_space<smem>>
    %1313 = vector.broadcast %1312 : f32 to vector<8x64xf32>
    %1314 = arith.addf %1311, %1313 : vector<8x64xf32>
    %cst_628 = arith.constant 0.000000e+00 : f32
    %1315 = vector.broadcast %cst_628 : f32 to vector<8x64xf32>
    %1316 = arith.maximumf %1314, %1315 : vector<8x64xf32>
    %1317 = arith.index_cast %3 : i32 to index
    %c896 = arith.constant 896 : index
    %1318 = vector.load %arg9[%1317, %c896] : memref<8x1280xf32, #tpu.memory_space<vmem>>, vector<8x64xf32>
    tpu.vector_store %arg9[%1317, %c896], %1316 {strides = array<i32>} : memref<8x1280xf32, #tpu.memory_space<vmem>>, vector<8x64xf32>,
    %c0_629 = arith.constant 0 : index
    %c15_630 = arith.constant 15 : index
    %1319 = memref.load %arg4[%c0_629, %c15_630] : memref<16x20xf32, #tpu.memory_space<smem>>
    %1320 = vector.broadcast %1319 : f32 to vector<8x64xf32>
    %1321 = arith.mulf %28, %1320 : vector<8x64xf32>
    %c1_631 = arith.constant 1 : index
    %c15_632 = arith.constant 15 : index
    %1322 = memref.load %arg4[%c1_631, %c15_632] : memref<16x20xf32, #tpu.memory_space<smem>>
    %1323 = vector.broadcast %1322 : f32 to vector<8x64xf32>
    %1324 = arith.mulf %44, %1323 : vector<8x64xf32>
    %1325 = arith.addf %1321, %1324 : vector<8x64xf32>
    %c2_633 = arith.constant 2 : index
    %c15_634 = arith.constant 15 : index
    %1326 = memref.load %arg4[%c2_633, %c15_634] : memref<16x20xf32, #tpu.memory_space<smem>>
    %1327 = vector.broadcast %1326 : f32 to vector<8x64xf32>
    %1328 = arith.mulf %60, %1327 : vector<8x64xf32>
    %1329 = arith.addf %1325, %1328 : vector<8x64xf32>
    %c3_635 = arith.constant 3 : index
    %c15_636 = arith.constant 15 : index
    %1330 = memref.load %arg4[%c3_635, %c15_636] : memref<16x20xf32, #tpu.memory_space<smem>>
    %1331 = vector.broadcast %1330 : f32 to vector<8x64xf32>
    %1332 = arith.mulf %76, %1331 : vector<8x64xf32>
    %1333 = arith.addf %1329, %1332 : vector<8x64xf32>
    %c4_637 = arith.constant 4 : index
    %c15_638 = arith.constant 15 : index
    %1334 = memref.load %arg4[%c4_637, %c15_638] : memref<16x20xf32, #tpu.memory_space<smem>>
    %1335 = vector.broadcast %1334 : f32 to vector<8x64xf32>
    %1336 = arith.mulf %92, %1335 : vector<8x64xf32>
    %1337 = arith.addf %1333, %1336 : vector<8x64xf32>
    %c5_639 = arith.constant 5 : index
    %c15_640 = arith.constant 15 : index
    %1338 = memref.load %arg4[%c5_639, %c15_640] : memref<16x20xf32, #tpu.memory_space<smem>>
    %1339 = vector.broadcast %1338 : f32 to vector<8x64xf32>
    %1340 = arith.mulf %108, %1339 : vector<8x64xf32>
    %1341 = arith.addf %1337, %1340 : vector<8x64xf32>
    %c6_641 = arith.constant 6 : index
    %c15_642 = arith.constant 15 : index
    %1342 = memref.load %arg4[%c6_641, %c15_642] : memref<16x20xf32, #tpu.memory_space<smem>>
    %1343 = vector.broadcast %1342 : f32 to vector<8x64xf32>
    %1344 = arith.mulf %124, %1343 : vector<8x64xf32>
    %1345 = arith.addf %1341, %1344 : vector<8x64xf32>
    %c7_643 = arith.constant 7 : index
    %c15_644 = arith.constant 15 : index
    %1346 = memref.load %arg4[%c7_643, %c15_644] : memref<16x20xf32, #tpu.memory_space<smem>>
    %1347 = vector.broadcast %1346 : f32 to vector<8x64xf32>
    %1348 = arith.mulf %140, %1347 : vector<8x64xf32>
    %1349 = arith.addf %1345, %1348 : vector<8x64xf32>
    %c8_645 = arith.constant 8 : index
    %c15_646 = arith.constant 15 : index
    %1350 = memref.load %arg4[%c8_645, %c15_646] : memref<16x20xf32, #tpu.memory_space<smem>>
    %1351 = vector.broadcast %1350 : f32 to vector<8x64xf32>
    %1352 = arith.mulf %156, %1351 : vector<8x64xf32>
    %1353 = arith.addf %1349, %1352 : vector<8x64xf32>
    %c9_647 = arith.constant 9 : index
    %c15_648 = arith.constant 15 : index
    %1354 = memref.load %arg4[%c9_647, %c15_648] : memref<16x20xf32, #tpu.memory_space<smem>>
    %1355 = vector.broadcast %1354 : f32 to vector<8x64xf32>
    %1356 = arith.mulf %172, %1355 : vector<8x64xf32>
    %1357 = arith.addf %1353, %1356 : vector<8x64xf32>
    %c10_649 = arith.constant 10 : index
    %c15_650 = arith.constant 15 : index
    %1358 = memref.load %arg4[%c10_649, %c15_650] : memref<16x20xf32, #tpu.memory_space<smem>>
    %1359 = vector.broadcast %1358 : f32 to vector<8x64xf32>
    %1360 = arith.mulf %188, %1359 : vector<8x64xf32>
    %1361 = arith.addf %1357, %1360 : vector<8x64xf32>
    %c11_651 = arith.constant 11 : index
    %c15_652 = arith.constant 15 : index
    %1362 = memref.load %arg4[%c11_651, %c15_652] : memref<16x20xf32, #tpu.memory_space<smem>>
    %1363 = vector.broadcast %1362 : f32 to vector<8x64xf32>
    %1364 = arith.mulf %204, %1363 : vector<8x64xf32>
    %1365 = arith.addf %1361, %1364 : vector<8x64xf32>
    %c12_653 = arith.constant 12 : index
    %c15_654 = arith.constant 15 : index
    %1366 = memref.load %arg4[%c12_653, %c15_654] : memref<16x20xf32, #tpu.memory_space<smem>>
    %1367 = vector.broadcast %1366 : f32 to vector<8x64xf32>
    %1368 = arith.mulf %220, %1367 : vector<8x64xf32>
    %1369 = arith.addf %1365, %1368 : vector<8x64xf32>
    %c13_655 = arith.constant 13 : index
    %c15_656 = arith.constant 15 : index
    %1370 = memref.load %arg4[%c13_655, %c15_656] : memref<16x20xf32, #tpu.memory_space<smem>>
    %1371 = vector.broadcast %1370 : f32 to vector<8x64xf32>
    %1372 = arith.mulf %236, %1371 : vector<8x64xf32>
    %1373 = arith.addf %1369, %1372 : vector<8x64xf32>
    %c14_657 = arith.constant 14 : index
    %c15_658 = arith.constant 15 : index
    %1374 = memref.load %arg4[%c14_657, %c15_658] : memref<16x20xf32, #tpu.memory_space<smem>>
    %1375 = vector.broadcast %1374 : f32 to vector<8x64xf32>
    %1376 = arith.mulf %252, %1375 : vector<8x64xf32>
    %1377 = arith.addf %1373, %1376 : vector<8x64xf32>
    %c15_659 = arith.constant 15 : index
    %c15_660 = arith.constant 15 : index
    %1378 = memref.load %arg4[%c15_659, %c15_660] : memref<16x20xf32, #tpu.memory_space<smem>>
    %1379 = vector.broadcast %1378 : f32 to vector<8x64xf32>
    %1380 = arith.mulf %268, %1379 : vector<8x64xf32>
    %1381 = arith.addf %1377, %1380 : vector<8x64xf32>
    %c15_661 = arith.constant 15 : index
    %1382 = memref.load %arg5[%c15_661] : memref<20xf32, #tpu.memory_space<smem>>
    %1383 = vector.broadcast %1382 : f32 to vector<8x64xf32>
    %1384 = arith.addf %1381, %1383 : vector<8x64xf32>
    %cst_662 = arith.constant 0.000000e+00 : f32
    %1385 = vector.broadcast %cst_662 : f32 to vector<8x64xf32>
    %1386 = arith.maximumf %1384, %1385 : vector<8x64xf32>
    %1387 = arith.index_cast %3 : i32 to index
    %c960 = arith.constant 960 : index
    %1388 = vector.load %arg9[%1387, %c960] : memref<8x1280xf32, #tpu.memory_space<vmem>>, vector<8x64xf32>
    tpu.vector_store %arg9[%1387, %c960], %1386 {strides = array<i32>} : memref<8x1280xf32, #tpu.memory_space<vmem>>, vector<8x64xf32>,
    %c0_663 = arith.constant 0 : index
    %c16 = arith.constant 16 : index
    %1389 = memref.load %arg4[%c0_663, %c16] : memref<16x20xf32, #tpu.memory_space<smem>>
    %1390 = vector.broadcast %1389 : f32 to vector<8x64xf32>
    %1391 = arith.mulf %28, %1390 : vector<8x64xf32>
    %c1_664 = arith.constant 1 : index
    %c16_665 = arith.constant 16 : index
    %1392 = memref.load %arg4[%c1_664, %c16_665] : memref<16x20xf32, #tpu.memory_space<smem>>
    %1393 = vector.broadcast %1392 : f32 to vector<8x64xf32>
    %1394 = arith.mulf %44, %1393 : vector<8x64xf32>
    %1395 = arith.addf %1391, %1394 : vector<8x64xf32>
    %c2_666 = arith.constant 2 : index
    %c16_667 = arith.constant 16 : index
    %1396 = memref.load %arg4[%c2_666, %c16_667] : memref<16x20xf32, #tpu.memory_space<smem>>
    %1397 = vector.broadcast %1396 : f32 to vector<8x64xf32>
    %1398 = arith.mulf %60, %1397 : vector<8x64xf32>
    %1399 = arith.addf %1395, %1398 : vector<8x64xf32>
    %c3_668 = arith.constant 3 : index
    %c16_669 = arith.constant 16 : index
    %1400 = memref.load %arg4[%c3_668, %c16_669] : memref<16x20xf32, #tpu.memory_space<smem>>
    %1401 = vector.broadcast %1400 : f32 to vector<8x64xf32>
    %1402 = arith.mulf %76, %1401 : vector<8x64xf32>
    %1403 = arith.addf %1399, %1402 : vector<8x64xf32>
    %c4_670 = arith.constant 4 : index
    %c16_671 = arith.constant 16 : index
    %1404 = memref.load %arg4[%c4_670, %c16_671] : memref<16x20xf32, #tpu.memory_space<smem>>
    %1405 = vector.broadcast %1404 : f32 to vector<8x64xf32>
    %1406 = arith.mulf %92, %1405 : vector<8x64xf32>
    %1407 = arith.addf %1403, %1406 : vector<8x64xf32>
    %c5_672 = arith.constant 5 : index
    %c16_673 = arith.constant 16 : index
    %1408 = memref.load %arg4[%c5_672, %c16_673] : memref<16x20xf32, #tpu.memory_space<smem>>
    %1409 = vector.broadcast %1408 : f32 to vector<8x64xf32>
    %1410 = arith.mulf %108, %1409 : vector<8x64xf32>
    %1411 = arith.addf %1407, %1410 : vector<8x64xf32>
    %c6_674 = arith.constant 6 : index
    %c16_675 = arith.constant 16 : index
    %1412 = memref.load %arg4[%c6_674, %c16_675] : memref<16x20xf32, #tpu.memory_space<smem>>
    %1413 = vector.broadcast %1412 : f32 to vector<8x64xf32>
    %1414 = arith.mulf %124, %1413 : vector<8x64xf32>
    %1415 = arith.addf %1411, %1414 : vector<8x64xf32>
    %c7_676 = arith.constant 7 : index
    %c16_677 = arith.constant 16 : index
    %1416 = memref.load %arg4[%c7_676, %c16_677] : memref<16x20xf32, #tpu.memory_space<smem>>
    %1417 = vector.broadcast %1416 : f32 to vector<8x64xf32>
    %1418 = arith.mulf %140, %1417 : vector<8x64xf32>
    %1419 = arith.addf %1415, %1418 : vector<8x64xf32>
    %c8_678 = arith.constant 8 : index
    %c16_679 = arith.constant 16 : index
    %1420 = memref.load %arg4[%c8_678, %c16_679] : memref<16x20xf32, #tpu.memory_space<smem>>
    %1421 = vector.broadcast %1420 : f32 to vector<8x64xf32>
    %1422 = arith.mulf %156, %1421 : vector<8x64xf32>
    %1423 = arith.addf %1419, %1422 : vector<8x64xf32>
    %c9_680 = arith.constant 9 : index
    %c16_681 = arith.constant 16 : index
    %1424 = memref.load %arg4[%c9_680, %c16_681] : memref<16x20xf32, #tpu.memory_space<smem>>
    %1425 = vector.broadcast %1424 : f32 to vector<8x64xf32>
    %1426 = arith.mulf %172, %1425 : vector<8x64xf32>
    %1427 = arith.addf %1423, %1426 : vector<8x64xf32>
    %c10_682 = arith.constant 10 : index
    %c16_683 = arith.constant 16 : index
    %1428 = memref.load %arg4[%c10_682, %c16_683] : memref<16x20xf32, #tpu.memory_space<smem>>
    %1429 = vector.broadcast %1428 : f32 to vector<8x64xf32>
    %1430 = arith.mulf %188, %1429 : vector<8x64xf32>
    %1431 = arith.addf %1427, %1430 : vector<8x64xf32>
    %c11_684 = arith.constant 11 : index
    %c16_685 = arith.constant 16 : index
    %1432 = memref.load %arg4[%c11_684, %c16_685] : memref<16x20xf32, #tpu.memory_space<smem>>
    %1433 = vector.broadcast %1432 : f32 to vector<8x64xf32>
    %1434 = arith.mulf %204, %1433 : vector<8x64xf32>
    %1435 = arith.addf %1431, %1434 : vector<8x64xf32>
    %c12_686 = arith.constant 12 : index
    %c16_687 = arith.constant 16 : index
    %1436 = memref.load %arg4[%c12_686, %c16_687] : memref<16x20xf32, #tpu.memory_space<smem>>
    %1437 = vector.broadcast %1436 : f32 to vector<8x64xf32>
    %1438 = arith.mulf %220, %1437 : vector<8x64xf32>
    %1439 = arith.addf %1435, %1438 : vector<8x64xf32>
    %c13_688 = arith.constant 13 : index
    %c16_689 = arith.constant 16 : index
    %1440 = memref.load %arg4[%c13_688, %c16_689] : memref<16x20xf32, #tpu.memory_space<smem>>
    %1441 = vector.broadcast %1440 : f32 to vector<8x64xf32>
    %1442 = arith.mulf %236, %1441 : vector<8x64xf32>
    %1443 = arith.addf %1439, %1442 : vector<8x64xf32>
    %c14_690 = arith.constant 14 : index
    %c16_691 = arith.constant 16 : index
    %1444 = memref.load %arg4[%c14_690, %c16_691] : memref<16x20xf32, #tpu.memory_space<smem>>
    %1445 = vector.broadcast %1444 : f32 to vector<8x64xf32>
    %1446 = arith.mulf %252, %1445 : vector<8x64xf32>
    %1447 = arith.addf %1443, %1446 : vector<8x64xf32>
    %c15_692 = arith.constant 15 : index
    %c16_693 = arith.constant 16 : index
    %1448 = memref.load %arg4[%c15_692, %c16_693] : memref<16x20xf32, #tpu.memory_space<smem>>
    %1449 = vector.broadcast %1448 : f32 to vector<8x64xf32>
    %1450 = arith.mulf %268, %1449 : vector<8x64xf32>
    %1451 = arith.addf %1447, %1450 : vector<8x64xf32>
    %c16_694 = arith.constant 16 : index
    %1452 = memref.load %arg5[%c16_694] : memref<20xf32, #tpu.memory_space<smem>>
    %1453 = vector.broadcast %1452 : f32 to vector<8x64xf32>
    %1454 = arith.addf %1451, %1453 : vector<8x64xf32>
    %cst_695 = arith.constant 0.000000e+00 : f32
    %1455 = vector.broadcast %cst_695 : f32 to vector<8x64xf32>
    %1456 = arith.maximumf %1454, %1455 : vector<8x64xf32>
    %1457 = arith.index_cast %3 : i32 to index
    %c1024 = arith.constant 1024 : index
    %1458 = vector.load %arg9[%1457, %c1024] : memref<8x1280xf32, #tpu.memory_space<vmem>>, vector<8x64xf32>
    tpu.vector_store %arg9[%1457, %c1024], %1456 {strides = array<i32>} : memref<8x1280xf32, #tpu.memory_space<vmem>>, vector<8x64xf32>,
    %c0_696 = arith.constant 0 : index
    %c17 = arith.constant 17 : index
    %1459 = memref.load %arg4[%c0_696, %c17] : memref<16x20xf32, #tpu.memory_space<smem>>
    %1460 = vector.broadcast %1459 : f32 to vector<8x64xf32>
    %1461 = arith.mulf %28, %1460 : vector<8x64xf32>
    %c1_697 = arith.constant 1 : index
    %c17_698 = arith.constant 17 : index
    %1462 = memref.load %arg4[%c1_697, %c17_698] : memref<16x20xf32, #tpu.memory_space<smem>>
    %1463 = vector.broadcast %1462 : f32 to vector<8x64xf32>
    %1464 = arith.mulf %44, %1463 : vector<8x64xf32>
    %1465 = arith.addf %1461, %1464 : vector<8x64xf32>
    %c2_699 = arith.constant 2 : index
    %c17_700 = arith.constant 17 : index
    %1466 = memref.load %arg4[%c2_699, %c17_700] : memref<16x20xf32, #tpu.memory_space<smem>>
    %1467 = vector.broadcast %1466 : f32 to vector<8x64xf32>
    %1468 = arith.mulf %60, %1467 : vector<8x64xf32>
    %1469 = arith.addf %1465, %1468 : vector<8x64xf32>
    %c3_701 = arith.constant 3 : index
    %c17_702 = arith.constant 17 : index
    %1470 = memref.load %arg4[%c3_701, %c17_702] : memref<16x20xf32, #tpu.memory_space<smem>>
    %1471 = vector.broadcast %1470 : f32 to vector<8x64xf32>
    %1472 = arith.mulf %76, %1471 : vector<8x64xf32>
    %1473 = arith.addf %1469, %1472 : vector<8x64xf32>
    %c4_703 = arith.constant 4 : index
    %c17_704 = arith.constant 17 : index
    %1474 = memref.load %arg4[%c4_703, %c17_704] : memref<16x20xf32, #tpu.memory_space<smem>>
    %1475 = vector.broadcast %1474 : f32 to vector<8x64xf32>
    %1476 = arith.mulf %92, %1475 : vector<8x64xf32>
    %1477 = arith.addf %1473, %1476 : vector<8x64xf32>
    %c5_705 = arith.constant 5 : index
    %c17_706 = arith.constant 17 : index
    %1478 = memref.load %arg4[%c5_705, %c17_706] : memref<16x20xf32, #tpu.memory_space<smem>>
    %1479 = vector.broadcast %1478 : f32 to vector<8x64xf32>
    %1480 = arith.mulf %108, %1479 : vector<8x64xf32>
    %1481 = arith.addf %1477, %1480 : vector<8x64xf32>
    %c6_707 = arith.constant 6 : index
    %c17_708 = arith.constant 17 : index
    %1482 = memref.load %arg4[%c6_707, %c17_708] : memref<16x20xf32, #tpu.memory_space<smem>>
    %1483 = vector.broadcast %1482 : f32 to vector<8x64xf32>
    %1484 = arith.mulf %124, %1483 : vector<8x64xf32>
    %1485 = arith.addf %1481, %1484 : vector<8x64xf32>
    %c7_709 = arith.constant 7 : index
    %c17_710 = arith.constant 17 : index
    %1486 = memref.load %arg4[%c7_709, %c17_710] : memref<16x20xf32, #tpu.memory_space<smem>>
    %1487 = vector.broadcast %1486 : f32 to vector<8x64xf32>
    %1488 = arith.mulf %140, %1487 : vector<8x64xf32>
    %1489 = arith.addf %1485, %1488 : vector<8x64xf32>
    %c8_711 = arith.constant 8 : index
    %c17_712 = arith.constant 17 : index
    %1490 = memref.load %arg4[%c8_711, %c17_712] : memref<16x20xf32, #tpu.memory_space<smem>>
    %1491 = vector.broadcast %1490 : f32 to vector<8x64xf32>
    %1492 = arith.mulf %156, %1491 : vector<8x64xf32>
    %1493 = arith.addf %1489, %1492 : vector<8x64xf32>
    %c9_713 = arith.constant 9 : index
    %c17_714 = arith.constant 17 : index
    %1494 = memref.load %arg4[%c9_713, %c17_714] : memref<16x20xf32, #tpu.memory_space<smem>>
    %1495 = vector.broadcast %1494 : f32 to vector<8x64xf32>
    %1496 = arith.mulf %172, %1495 : vector<8x64xf32>
    %1497 = arith.addf %1493, %1496 : vector<8x64xf32>
    %c10_715 = arith.constant 10 : index
    %c17_716 = arith.constant 17 : index
    %1498 = memref.load %arg4[%c10_715, %c17_716] : memref<16x20xf32, #tpu.memory_space<smem>>
    %1499 = vector.broadcast %1498 : f32 to vector<8x64xf32>
    %1500 = arith.mulf %188, %1499 : vector<8x64xf32>
    %1501 = arith.addf %1497, %1500 : vector<8x64xf32>
    %c11_717 = arith.constant 11 : index
    %c17_718 = arith.constant 17 : index
    %1502 = memref.load %arg4[%c11_717, %c17_718] : memref<16x20xf32, #tpu.memory_space<smem>>
    %1503 = vector.broadcast %1502 : f32 to vector<8x64xf32>
    %1504 = arith.mulf %204, %1503 : vector<8x64xf32>
    %1505 = arith.addf %1501, %1504 : vector<8x64xf32>
    %c12_719 = arith.constant 12 : index
    %c17_720 = arith.constant 17 : index
    %1506 = memref.load %arg4[%c12_719, %c17_720] : memref<16x20xf32, #tpu.memory_space<smem>>
    %1507 = vector.broadcast %1506 : f32 to vector<8x64xf32>
    %1508 = arith.mulf %220, %1507 : vector<8x64xf32>
    %1509 = arith.addf %1505, %1508 : vector<8x64xf32>
    %c13_721 = arith.constant 13 : index
    %c17_722 = arith.constant 17 : index
    %1510 = memref.load %arg4[%c13_721, %c17_722] : memref<16x20xf32, #tpu.memory_space<smem>>
    %1511 = vector.broadcast %1510 : f32 to vector<8x64xf32>
    %1512 = arith.mulf %236, %1511 : vector<8x64xf32>
    %1513 = arith.addf %1509, %1512 : vector<8x64xf32>
    %c14_723 = arith.constant 14 : index
    %c17_724 = arith.constant 17 : index
    %1514 = memref.load %arg4[%c14_723, %c17_724] : memref<16x20xf32, #tpu.memory_space<smem>>
    %1515 = vector.broadcast %1514 : f32 to vector<8x64xf32>
    %1516 = arith.mulf %252, %1515 : vector<8x64xf32>
    %1517 = arith.addf %1513, %1516 : vector<8x64xf32>
    %c15_725 = arith.constant 15 : index
    %c17_726 = arith.constant 17 : index
    %1518 = memref.load %arg4[%c15_725, %c17_726] : memref<16x20xf32, #tpu.memory_space<smem>>
    %1519 = vector.broadcast %1518 : f32 to vector<8x64xf32>
    %1520 = arith.mulf %268, %1519 : vector<8x64xf32>
    %1521 = arith.addf %1517, %1520 : vector<8x64xf32>
    %c17_727 = arith.constant 17 : index
    %1522 = memref.load %arg5[%c17_727] : memref<20xf32, #tpu.memory_space<smem>>
    %1523 = vector.broadcast %1522 : f32 to vector<8x64xf32>
    %1524 = arith.addf %1521, %1523 : vector<8x64xf32>
    %cst_728 = arith.constant 0.000000e+00 : f32
    %1525 = vector.broadcast %cst_728 : f32 to vector<8x64xf32>
    %1526 = arith.maximumf %1524, %1525 : vector<8x64xf32>
    %1527 = arith.index_cast %3 : i32 to index
    %c1088 = arith.constant 1088 : index
    %1528 = vector.load %arg9[%1527, %c1088] : memref<8x1280xf32, #tpu.memory_space<vmem>>, vector<8x64xf32>
    tpu.vector_store %arg9[%1527, %c1088], %1526 {strides = array<i32>} : memref<8x1280xf32, #tpu.memory_space<vmem>>, vector<8x64xf32>,
    %c0_729 = arith.constant 0 : index
    %c18 = arith.constant 18 : index
    %1529 = memref.load %arg4[%c0_729, %c18] : memref<16x20xf32, #tpu.memory_space<smem>>
    %1530 = vector.broadcast %1529 : f32 to vector<8x64xf32>
    %1531 = arith.mulf %28, %1530 : vector<8x64xf32>
    %c1_730 = arith.constant 1 : index
    %c18_731 = arith.constant 18 : index
    %1532 = memref.load %arg4[%c1_730, %c18_731] : memref<16x20xf32, #tpu.memory_space<smem>>
    %1533 = vector.broadcast %1532 : f32 to vector<8x64xf32>
    %1534 = arith.mulf %44, %1533 : vector<8x64xf32>
    %1535 = arith.addf %1531, %1534 : vector<8x64xf32>
    %c2_732 = arith.constant 2 : index
    %c18_733 = arith.constant 18 : index
    %1536 = memref.load %arg4[%c2_732, %c18_733] : memref<16x20xf32, #tpu.memory_space<smem>>
    %1537 = vector.broadcast %1536 : f32 to vector<8x64xf32>
    %1538 = arith.mulf %60, %1537 : vector<8x64xf32>
    %1539 = arith.addf %1535, %1538 : vector<8x64xf32>
    %c3_734 = arith.constant 3 : index
    %c18_735 = arith.constant 18 : index
    %1540 = memref.load %arg4[%c3_734, %c18_735] : memref<16x20xf32, #tpu.memory_space<smem>>
    %1541 = vector.broadcast %1540 : f32 to vector<8x64xf32>
    %1542 = arith.mulf %76, %1541 : vector<8x64xf32>
    %1543 = arith.addf %1539, %1542 : vector<8x64xf32>
    %c4_736 = arith.constant 4 : index
    %c18_737 = arith.constant 18 : index
    %1544 = memref.load %arg4[%c4_736, %c18_737] : memref<16x20xf32, #tpu.memory_space<smem>>
    %1545 = vector.broadcast %1544 : f32 to vector<8x64xf32>
    %1546 = arith.mulf %92, %1545 : vector<8x64xf32>
    %1547 = arith.addf %1543, %1546 : vector<8x64xf32>
    %c5_738 = arith.constant 5 : index
    %c18_739 = arith.constant 18 : index
    %1548 = memref.load %arg4[%c5_738, %c18_739] : memref<16x20xf32, #tpu.memory_space<smem>>
    %1549 = vector.broadcast %1548 : f32 to vector<8x64xf32>
    %1550 = arith.mulf %108, %1549 : vector<8x64xf32>
    %1551 = arith.addf %1547, %1550 : vector<8x64xf32>
    %c6_740 = arith.constant 6 : index
    %c18_741 = arith.constant 18 : index
    %1552 = memref.load %arg4[%c6_740, %c18_741] : memref<16x20xf32, #tpu.memory_space<smem>>
    %1553 = vector.broadcast %1552 : f32 to vector<8x64xf32>
    %1554 = arith.mulf %124, %1553 : vector<8x64xf32>
    %1555 = arith.addf %1551, %1554 : vector<8x64xf32>
    %c7_742 = arith.constant 7 : index
    %c18_743 = arith.constant 18 : index
    %1556 = memref.load %arg4[%c7_742, %c18_743] : memref<16x20xf32, #tpu.memory_space<smem>>
    %1557 = vector.broadcast %1556 : f32 to vector<8x64xf32>
    %1558 = arith.mulf %140, %1557 : vector<8x64xf32>
    %1559 = arith.addf %1555, %1558 : vector<8x64xf32>
    %c8_744 = arith.constant 8 : index
    %c18_745 = arith.constant 18 : index
    %1560 = memref.load %arg4[%c8_744, %c18_745] : memref<16x20xf32, #tpu.memory_space<smem>>
    %1561 = vector.broadcast %1560 : f32 to vector<8x64xf32>
    %1562 = arith.mulf %156, %1561 : vector<8x64xf32>
    %1563 = arith.addf %1559, %1562 : vector<8x64xf32>
    %c9_746 = arith.constant 9 : index
    %c18_747 = arith.constant 18 : index
    %1564 = memref.load %arg4[%c9_746, %c18_747] : memref<16x20xf32, #tpu.memory_space<smem>>
    %1565 = vector.broadcast %1564 : f32 to vector<8x64xf32>
    %1566 = arith.mulf %172, %1565 : vector<8x64xf32>
    %1567 = arith.addf %1563, %1566 : vector<8x64xf32>
    %c10_748 = arith.constant 10 : index
    %c18_749 = arith.constant 18 : index
    %1568 = memref.load %arg4[%c10_748, %c18_749] : memref<16x20xf32, #tpu.memory_space<smem>>
    %1569 = vector.broadcast %1568 : f32 to vector<8x64xf32>
    %1570 = arith.mulf %188, %1569 : vector<8x64xf32>
    %1571 = arith.addf %1567, %1570 : vector<8x64xf32>
    %c11_750 = arith.constant 11 : index
    %c18_751 = arith.constant 18 : index
    %1572 = memref.load %arg4[%c11_750, %c18_751] : memref<16x20xf32, #tpu.memory_space<smem>>
    %1573 = vector.broadcast %1572 : f32 to vector<8x64xf32>
    %1574 = arith.mulf %204, %1573 : vector<8x64xf32>
    %1575 = arith.addf %1571, %1574 : vector<8x64xf32>
    %c12_752 = arith.constant 12 : index
    %c18_753 = arith.constant 18 : index
    %1576 = memref.load %arg4[%c12_752, %c18_753] : memref<16x20xf32, #tpu.memory_space<smem>>
    %1577 = vector.broadcast %1576 : f32 to vector<8x64xf32>
    %1578 = arith.mulf %220, %1577 : vector<8x64xf32>
    %1579 = arith.addf %1575, %1578 : vector<8x64xf32>
    %c13_754 = arith.constant 13 : index
    %c18_755 = arith.constant 18 : index
    %1580 = memref.load %arg4[%c13_754, %c18_755] : memref<16x20xf32, #tpu.memory_space<smem>>
    %1581 = vector.broadcast %1580 : f32 to vector<8x64xf32>
    %1582 = arith.mulf %236, %1581 : vector<8x64xf32>
    %1583 = arith.addf %1579, %1582 : vector<8x64xf32>
    %c14_756 = arith.constant 14 : index
    %c18_757 = arith.constant 18 : index
    %1584 = memref.load %arg4[%c14_756, %c18_757] : memref<16x20xf32, #tpu.memory_space<smem>>
    %1585 = vector.broadcast %1584 : f32 to vector<8x64xf32>
    %1586 = arith.mulf %252, %1585 : vector<8x64xf32>
    %1587 = arith.addf %1583, %1586 : vector<8x64xf32>
    %c15_758 = arith.constant 15 : index
    %c18_759 = arith.constant 18 : index
    %1588 = memref.load %arg4[%c15_758, %c18_759] : memref<16x20xf32, #tpu.memory_space<smem>>
    %1589 = vector.broadcast %1588 : f32 to vector<8x64xf32>
    %1590 = arith.mulf %268, %1589 : vector<8x64xf32>
    %1591 = arith.addf %1587, %1590 : vector<8x64xf32>
    %c18_760 = arith.constant 18 : index
    %1592 = memref.load %arg5[%c18_760] : memref<20xf32, #tpu.memory_space<smem>>
    %1593 = vector.broadcast %1592 : f32 to vector<8x64xf32>
    %1594 = arith.addf %1591, %1593 : vector<8x64xf32>
    %cst_761 = arith.constant 0.000000e+00 : f32
    %1595 = vector.broadcast %cst_761 : f32 to vector<8x64xf32>
    %1596 = arith.maximumf %1594, %1595 : vector<8x64xf32>
    %1597 = arith.index_cast %3 : i32 to index
    %c1152 = arith.constant 1152 : index
    %1598 = vector.load %arg9[%1597, %c1152] : memref<8x1280xf32, #tpu.memory_space<vmem>>, vector<8x64xf32>
    tpu.vector_store %arg9[%1597, %c1152], %1596 {strides = array<i32>} : memref<8x1280xf32, #tpu.memory_space<vmem>>, vector<8x64xf32>,
    %c0_762 = arith.constant 0 : index
    %c19 = arith.constant 19 : index
    %1599 = memref.load %arg4[%c0_762, %c19] : memref<16x20xf32, #tpu.memory_space<smem>>
    %1600 = vector.broadcast %1599 : f32 to vector<8x64xf32>
    %1601 = arith.mulf %28, %1600 : vector<8x64xf32>
    %c1_763 = arith.constant 1 : index
    %c19_764 = arith.constant 19 : index
    %1602 = memref.load %arg4[%c1_763, %c19_764] : memref<16x20xf32, #tpu.memory_space<smem>>
    %1603 = vector.broadcast %1602 : f32 to vector<8x64xf32>
    %1604 = arith.mulf %44, %1603 : vector<8x64xf32>
    %1605 = arith.addf %1601, %1604 : vector<8x64xf32>
    %c2_765 = arith.constant 2 : index
    %c19_766 = arith.constant 19 : index
    %1606 = memref.load %arg4[%c2_765, %c19_766] : memref<16x20xf32, #tpu.memory_space<smem>>
    %1607 = vector.broadcast %1606 : f32 to vector<8x64xf32>
    %1608 = arith.mulf %60, %1607 : vector<8x64xf32>
    %1609 = arith.addf %1605, %1608 : vector<8x64xf32>
    %c3_767 = arith.constant 3 : index
    %c19_768 = arith.constant 19 : index
    %1610 = memref.load %arg4[%c3_767, %c19_768] : memref<16x20xf32, #tpu.memory_space<smem>>
    %1611 = vector.broadcast %1610 : f32 to vector<8x64xf32>
    %1612 = arith.mulf %76, %1611 : vector<8x64xf32>
    %1613 = arith.addf %1609, %1612 : vector<8x64xf32>
    %c4_769 = arith.constant 4 : index
    %c19_770 = arith.constant 19 : index
    %1614 = memref.load %arg4[%c4_769, %c19_770] : memref<16x20xf32, #tpu.memory_space<smem>>
    %1615 = vector.broadcast %1614 : f32 to vector<8x64xf32>
    %1616 = arith.mulf %92, %1615 : vector<8x64xf32>
    %1617 = arith.addf %1613, %1616 : vector<8x64xf32>
    %c5_771 = arith.constant 5 : index
    %c19_772 = arith.constant 19 : index
    %1618 = memref.load %arg4[%c5_771, %c19_772] : memref<16x20xf32, #tpu.memory_space<smem>>
    %1619 = vector.broadcast %1618 : f32 to vector<8x64xf32>
    %1620 = arith.mulf %108, %1619 : vector<8x64xf32>
    %1621 = arith.addf %1617, %1620 : vector<8x64xf32>
    %c6_773 = arith.constant 6 : index
    %c19_774 = arith.constant 19 : index
    %1622 = memref.load %arg4[%c6_773, %c19_774] : memref<16x20xf32, #tpu.memory_space<smem>>
    %1623 = vector.broadcast %1622 : f32 to vector<8x64xf32>
    %1624 = arith.mulf %124, %1623 : vector<8x64xf32>
    %1625 = arith.addf %1621, %1624 : vector<8x64xf32>
    %c7_775 = arith.constant 7 : index
    %c19_776 = arith.constant 19 : index
    %1626 = memref.load %arg4[%c7_775, %c19_776] : memref<16x20xf32, #tpu.memory_space<smem>>
    %1627 = vector.broadcast %1626 : f32 to vector<8x64xf32>
    %1628 = arith.mulf %140, %1627 : vector<8x64xf32>
    %1629 = arith.addf %1625, %1628 : vector<8x64xf32>
    %c8_777 = arith.constant 8 : index
    %c19_778 = arith.constant 19 : index
    %1630 = memref.load %arg4[%c8_777, %c19_778] : memref<16x20xf32, #tpu.memory_space<smem>>
    %1631 = vector.broadcast %1630 : f32 to vector<8x64xf32>
    %1632 = arith.mulf %156, %1631 : vector<8x64xf32>
    %1633 = arith.addf %1629, %1632 : vector<8x64xf32>
    %c9_779 = arith.constant 9 : index
    %c19_780 = arith.constant 19 : index
    %1634 = memref.load %arg4[%c9_779, %c19_780] : memref<16x20xf32, #tpu.memory_space<smem>>
    %1635 = vector.broadcast %1634 : f32 to vector<8x64xf32>
    %1636 = arith.mulf %172, %1635 : vector<8x64xf32>
    %1637 = arith.addf %1633, %1636 : vector<8x64xf32>
    %c10_781 = arith.constant 10 : index
    %c19_782 = arith.constant 19 : index
    %1638 = memref.load %arg4[%c10_781, %c19_782] : memref<16x20xf32, #tpu.memory_space<smem>>
    %1639 = vector.broadcast %1638 : f32 to vector<8x64xf32>
    %1640 = arith.mulf %188, %1639 : vector<8x64xf32>
    %1641 = arith.addf %1637, %1640 : vector<8x64xf32>
    %c11_783 = arith.constant 11 : index
    %c19_784 = arith.constant 19 : index
    %1642 = memref.load %arg4[%c11_783, %c19_784] : memref<16x20xf32, #tpu.memory_space<smem>>
    %1643 = vector.broadcast %1642 : f32 to vector<8x64xf32>
    %1644 = arith.mulf %204, %1643 : vector<8x64xf32>
    %1645 = arith.addf %1641, %1644 : vector<8x64xf32>
    %c12_785 = arith.constant 12 : index
    %c19_786 = arith.constant 19 : index
    %1646 = memref.load %arg4[%c12_785, %c19_786] : memref<16x20xf32, #tpu.memory_space<smem>>
    %1647 = vector.broadcast %1646 : f32 to vector<8x64xf32>
    %1648 = arith.mulf %220, %1647 : vector<8x64xf32>
    %1649 = arith.addf %1645, %1648 : vector<8x64xf32>
    %c13_787 = arith.constant 13 : index
    %c19_788 = arith.constant 19 : index
    %1650 = memref.load %arg4[%c13_787, %c19_788] : memref<16x20xf32, #tpu.memory_space<smem>>
    %1651 = vector.broadcast %1650 : f32 to vector<8x64xf32>
    %1652 = arith.mulf %236, %1651 : vector<8x64xf32>
    %1653 = arith.addf %1649, %1652 : vector<8x64xf32>
    %c14_789 = arith.constant 14 : index
    %c19_790 = arith.constant 19 : index
    %1654 = memref.load %arg4[%c14_789, %c19_790] : memref<16x20xf32, #tpu.memory_space<smem>>
    %1655 = vector.broadcast %1654 : f32 to vector<8x64xf32>
    %1656 = arith.mulf %252, %1655 : vector<8x64xf32>
    %1657 = arith.addf %1653, %1656 : vector<8x64xf32>
    %c15_791 = arith.constant 15 : index
    %c19_792 = arith.constant 19 : index
    %1658 = memref.load %arg4[%c15_791, %c19_792] : memref<16x20xf32, #tpu.memory_space<smem>>
    %1659 = vector.broadcast %1658 : f32 to vector<8x64xf32>
    %1660 = arith.mulf %268, %1659 : vector<8x64xf32>
    %1661 = arith.addf %1657, %1660 : vector<8x64xf32>
    %c19_793 = arith.constant 19 : index
    %1662 = memref.load %arg5[%c19_793] : memref<20xf32, #tpu.memory_space<smem>>
    %1663 = vector.broadcast %1662 : f32 to vector<8x64xf32>
    %1664 = arith.addf %1661, %1663 : vector<8x64xf32>
    %cst_794 = arith.constant 0.000000e+00 : f32
    %1665 = vector.broadcast %cst_794 : f32 to vector<8x64xf32>
    %1666 = arith.maximumf %1664, %1665 : vector<8x64xf32>
    %1667 = arith.index_cast %3 : i32 to index
    %c1216 = arith.constant 1216 : index
    %1668 = vector.load %arg9[%1667, %c1216] : memref<8x1280xf32, #tpu.memory_space<vmem>>, vector<8x64xf32>
    tpu.vector_store %arg9[%1667, %c1216], %1666 {strides = array<i32>} : memref<8x1280xf32, #tpu.memory_space<vmem>>, vector<8x64xf32>,
    %c1_i32_795 = arith.constant 1 : i32
    %c0_796 = arith.constant 0 : index
    %c0_797 = arith.constant 0 : index
    %1669 = vector.load %arg9[%c0_796, %c0_797] : memref<8x1280xf32, #tpu.memory_space<vmem>>, vector<8x1280xf32>
    %c0_798 = arith.constant 0 : index
    %c0_799 = arith.constant 0 : index
    %1670 = vector.load %arg6[%c0_798, %c0_799] : memref<1280x128xf32, #tpu.memory_space<vmem>>, vector<1280x128xf32>
    %cst_800 = arith.constant dense<0.000000e+00> : vector<8x128xf32>
    %1671 = tpu.matmul %1669, %1670, %cst_800 {dimension_numbers = #tpu.dot_dimension_numbers<[1], [0], [0], [1], [0, 0, 1, 1], [], []>} : vector<8x1280xf32>, vector<1280x128xf32>, vector<8x128xf32> -> vector<8x128xf32>
    %c0_801 = arith.constant 0 : index
    %c0_802 = arith.constant 0 : index
    %1672 = vector.load %arg7[%c0_801, %c0_802] : memref<1x128xf32, #tpu.memory_space<vmem>>, vector<1x128xf32>
    %1673 = vector.broadcast %1672 : vector<1x128xf32> to vector<8x128xf32>
    %1674 = arith.addf %1671, %1673 : vector<8x128xf32>
    %cst_803 = arith.constant 0.000000e+00 : f32
    %1675 = vector.broadcast %cst_803 : f32 to vector<8x128xf32>
    %1676 = arith.maximumf %1674, %1675 : vector<8x128xf32>
    %1677 = vector.extract_strided_slice %1676 {offsets = [0, 0], sizes = [8, 124], strides = [1, 1]} : vector<8x128xf32> to vector<8x124xf32>
    %c0_804 = arith.constant 0 : index
    %c0_805 = arith.constant 0 : index
    %1678 = vector.load %arg8[%c0_804, %c0_805] : memref<8x124xf32, #tpu.memory_space<vmem>>, vector<8x124xf32>
    tpu.vector_store %arg8[%c0_804, %c0_805], %1677 {strides = array<i32>} : memref<8x124xf32, #tpu.memory_space<vmem>>, vector<8x124xf32>,
    return
  }
  func.func @transform_0(%arg0: i32) -> (i32, i32, i32) {
    %c0_i32 = arith.constant 0 : i32
    %c0_i32_0 = arith.constant 0 : i32
    %c0_i32_1 = arith.constant 0 : i32
    return %c0_i32, %arg0, %c0_i32_0 : i32, i32, i32
  }
  func.func @transform_1(%arg0: i32) -> (i32, i32) {
    %c0_i32 = arith.constant 0 : i32
    %c0_i32_0 = arith.constant 0 : i32
    %c0_i32_1 = arith.constant 0 : i32
    return %c0_i32, %c0_i32_0 : i32, i32
  }
  func.func @transform_2(%arg0: i32) -> i32 {
    %c0_i32 = arith.constant 0 : i32
    %c0_i32_0 = arith.constant 0 : i32
    return %c0_i32 : i32
  }
  func.func @transform_3(%arg0: i32) -> (i32, i32) {
    %c0_i32 = arith.constant 0 : i32
    %c0_i32_0 = arith.constant 0 : i32
    %c0_i32_1 = arith.constant 0 : i32
    return %c0_i32, %c0_i32_0 : i32, i32
  }
  func.func @transform_4(%arg0: i32) -> i32 {
    %c0_i32 = arith.constant 0 : i32
    %c0_i32_0 = arith.constant 0 : i32
    return %c0_i32 : i32
  }
  func.func @transform_5(%arg0: i32) -> (i32, i32) {
    %c0_i32 = arith.constant 0 : i32
    %c0_i32_0 = arith.constant 0 : i32
    %c0_i32_1 = arith.constant 0 : i32
    return %c0_i32, %c0_i32_0 : i32, i32
  }
  func.func @transform_6(%arg0: i32) -> (i32, i32) {
    %c0_i32 = arith.constant 0 : i32
    %c0_i32_0 = arith.constant 0 : i32
    %c0_i32_1 = arith.constant 0 : i32
    return %c0_i32, %c0_i32_0 : i32, i32
  }
  func.func @transform_7(%arg0: i32) -> (i32, i32) {
    %c0_i32 = arith.constant 0 : i32
    %c0_i32_0 = arith.constant 0 : i32
    return %arg0, %c0_i32 : i32, i32
  }
}

</mosaic_0001>

<bundles_post_ra>
// kernel: agent2_forward.1
= control target key start
LH: loop header
LB: loop body
LE: loop exit
PB: predicated region body
PF: predicated region fallthrough
CT: control target
= control target key end

     0   :  { %s5350_s0 = inlined_call_operand.vmem [shape: f32[3,16,64], index: 0, kind: input, shape index: {}]   ;;  %s5351_s1 = inlined_call_operand.vmem [shape: f32[3,16], index: 1, kind: input, shape index: {}]   ;;  %s5352_s2 = inlined_call_operand.vmem [shape: f32[16], index: 2, kind: input, shape index: {}]   ;;  %s5353_s3 = inlined_call_operand.vmem [shape: f32[16,20], index: 3, kind: input, shape index: {}]   ;;  %s5354_s4 = inlined_call_operand.vmem [shape: f32[20], index: 4, kind: input, shape index: {}]   ;;  %s5355_s5 = inlined_call_operand.hbm [shape: f32[1280,128], index: 5, kind: input, shape index: {}]   ;;  %s5356_s6 = inlined_call_operand.vmem [shape: f32[1,128], index: 6, kind: input, shape index: {}]   ;;  %s5357_s7 = inlined_call_operand.hbm [shape: f32[16,124], index: 7, kind: output, shape index: {}]  }
   0x1   :  { %5374 = sst [smem:[#allocation33_spill]] %s5350_s0 }
   0x2   :  { %5375 = sst [smem:[#allocation34_spill]] %s5351_s1 }
   0x3   :  { %5376 = sst [smem:[#allocation35_spill]] %s5352_s2 }
   0x4   :  { %5377 = sst [smem:[#allocation36_spill]] %s5353_s3 }
   0x5   :  { %5378 = sst [smem:[#allocation37_spill]] %s5354_s4 }
   0x6   :  { %5379 = sst [smem:[#allocation38_spill]] %s5355_s5 }
   0x7   :  { %5380 = sst [smem:[#allocation39_spill]] %s5356_s6 }
   0x8   :  { %5381 = sst [smem:[#allocation40_spill]] %s5357_s7 }
   0x9   :  { %12 = vsyncpa [#allocation7], 0 }
   0xa   :  { %13 = vsyncpa [#allocation9], 0 }
   0xb   :  { %14 = vsyncpa [#allocation12], 0 }
   0xc   :  { %15 = vsyncpa [#allocation5], 0 }
   0xd   :  { %16 = vsyncpa [#allocation6], 0 }
   0xe   :  { %18 = vsyncpa [#allocation6 + $0x1], 0  ;;  %s3611_s24 = smov 0   ;;  %s3613_s25 = smov 0  }
   0xf   :  { %s3615_s26 = smov 0   ;;  %s3617_s27 = smov 0  }
  0x10 LB: > { %5382 = sst [smem:[#allocation20_spill]] %s3548_s24  ;;  %s3632_s28 = sadd.s32 4294967295, %s3560_s27   ;;  %s3560_s27 = sphi %s3617_s27, %s5430_s27   ;;  %s3556_s26 = sphi %s3615_s26, %s5433_s26   ;;  %s3552_s25 = sphi %s3613_s25, %s5432_s25   ;;  %s3548_s24 = sphi %s3611_s24, %s5431_s24  }
  0x11   : > { %5383 = sst [smem:[#allocation21_spill]] %s3552_s25  ;;  %s2705_s29 = sadd.s32 4294967294, %s3560_s27  }
  0x12   : > { %5384 = sst [smem:[#allocation22_spill]] %s3556_s26  ;;  %s3636_s30 = sadd.s32 1, %s3560_s27  }
  0x13   : > { %5385 = sst [smem:[#allocation23_spill]] %s3560_s27  ;;  %s31_s8 = sadd.s32 1, %s3556_s26 }
  0x14   : > { %5386 = sst [smem:[#allocation24_spill]] %s3632_s28  ;;  %s28_s9 = ssub.s32 %s3560_s27, %s3636_s30 }
  0x15   : > { %5387 = sst [smem:[#allocation25_spill]] %s3636_s30  ;;  %p38_p0 = scmp.ne.s32.totalorder %s3556_s26, %s3552_s25 }
  0x16   : > { %p29_p1 = scmp.eq.s32.totalorder %s28_s9, 0  ;;  %p39_p2 = scmp.eq.s32.totalorder %s3560_s27, 0 }
  0x17   : > { %p194_p3 = scmp.eq.s32.totalorder %s3632_s28, 1  ;;  %p199_p4 = scmp.ne.s32.totalorder %s3552_s25, %s3548_s24 }
  0x18   : > { %s3648_s10 = scalar_select %p29_p1, %s3556_s26, %s31_s8  }
  0x19   : > { %p3650_p5 = por %p39_p2, %p38_p0  ;;  %p3654_p6 = por %p194_p3, %p38_p0 }
  0x1a   : > { %5388 = sst [smem:[#allocation26_spill]] %s3648_s10  ;;  %p200_p7 = scmp.eq.s32.totalorder %s2705_s29, 1 }
  0x1b   : > { %s5389_s11 = scalar_select %p3650_p5, 1, 0 }
  0x1c   : > { %s5390_s12 = scalar_select %p3654_p6, 1, 0 }
  0x1d   : > { %p2706_p8 = scmp.ge.s32.totalorder %s3560_s27, 1  ;;  %p207_p9 = scmp.lt.s32.totalorder %s3560_s27, 3 }
  0x1e   : > { %5391 = sst [smem:[#allocation27_spill]] %s5390_s12  ;;  %p3660_p10 = por %p200_p7, %p199_p4 }
  0x1f   : > { %p5358_p11 = scmp.eq.s32.totalorder %s3632_s28, 0  ;;  %p3665_p12 = pnand %p2706_p8, %p207_p9 }
  0x20   : > { %s5392_s13 = scalar_select %p3660_p10, 1, 0 }
  0x21   : > { %s5394_s14 = scalar_select %p3665_p12, 1, 0 }
  0x22   : > { %5393 = sst [smem:[#allocation28_spill]] %s5392_s13  ;;  %p3327_p13 = pneg %p3665_p12 }
  0x23   : > { %s5395_s2 = sld [smem:[#allocation35_spill]] }
  0x24   : > { %s5396_s1 = sld [smem:[#allocation34_spill]]  ;;  %p3679_p0 = pnand %p5358_p11, %p3327_p13 }
  0x25   : > { %s5398_s3 = sld [smem:[#allocation36_spill]] }
  0x26   : > { %p3690_p2 = pneg %p3679_p0 }
  0x29   : > { %s231_s17 = sshll.u32 %s5395_s2, 4  ;;  %s232_s17 = int_to_ptr.vmem [resolvable:$true] %s231_s17 }
  0x2a   : > { %s220_s20 = sshll.u32 %s5396_s1, 4  ;;  %s3398_s8 = scalar_lea.vmem %s232_s17, 16  ;;  %s221_s20 = int_to_ptr.vmem [resolvable:$true] %s220_s20 }
  0x2b   : > { %s241_s29 = sshll.u32 %s5398_s3, 4  ;;  %p3399_p1 = scmp.ne.s32.totalorder %s232_s17, %s3398_s8  ;;  %s3686_s29 = int_to_ptr.vmem [resolvable:$true] %s241_s29 }
  0x2c   : > { %p3406_p7 = scmp.lt.s32.totalorder %s232_s17, %s232_s17  ;;  %p3407_p8 = scmp.lt.s32.totalorder %s3398_s8, %s3398_s8 }
  0x2d   : > { %p3401_p3 = pnand %p3690_p2, %p3399_p1 }
  0x2e   : > { %p3408_p9 = por %p3407_p8, %p3406_p7 }
  0x2f   : > { %p3402_p4 = pneg %p3401_p3 }
  0x31   : > { %p3409_p13 = pnand %p3408_p9, %p3402_p4 }
  0x33   : > { %3412 = shalt.err (!%p3409_p13)
}
  0x34   : > { %s3562_s15 = smov [#allocation8]   ;;  %s3413_s16 = scalar_lea.vmem %s221_s20, 64 }
  0x35   : > { %3333 = dma.vmem_to_smem (!%p3679_p0), %s232_s17, 16, %s3562_s15, [#allocation9]  }
  0x36   : > { %p3414_p11 = scmp.ne.s32.totalorder %s221_s20, %s3413_s16  ;;  %p3421_p12 = scmp.lt.s32.totalorder %s221_s20, %s221_s20 }
  0x37   : > { %p3422_p5 = scmp.lt.s32.totalorder %s3413_s16, %s3413_s16 }
  0x38   : > { %p3416_p10 = pnand %p3414_p11, %p3690_p2 }
  0x39   : > { %p3423_p1 = por %p3422_p5, %p3421_p12 }
  0x3a   : > { %p3417_p6 = pneg %p3416_p10 }
  0x3c   : > { %p3424_p3 = pnand %p3423_p1, %p3417_p6 }
  0x3e   : > { %3427 = shalt.err (!%p3424_p3)
}
  0x3f   : > { %s3563_s18 = smov [#allocation4]   ;;  %s5400_s4 = sld [smem:[#allocation37_spill]] }
  0x40   : > { %3330 = dma.vmem_to_smem (!%p3679_p0), %s221_s20, 64, %s3563_s18, [#allocation7]  }
  0x41   : > { %s3428_s23 = scalar_lea.vmem %s3686_s29, 256  ;;  %p3436_p5 = scmp.lt.s32.totalorder %s3686_s29, %s3686_s29 }
  0x42   : > { %p3429_p11 = scmp.ne.s32.totalorder %s3686_s29, %s3428_s23  ;;  %p3437_p6 = scmp.lt.s32.totalorder %s3428_s23, %s3428_s23 }
  0x44   : > { %p3431_p10 = pnand %p3429_p11, %p3690_p2  ;;  %p3438_p12 = por %p3437_p6, %p3436_p5 }
  0x45   : > { %s255_s22 = sshll.u32 %s5400_s4, 4  ;;  %s256_s22 = int_to_ptr.vmem [resolvable:$true] %s255_s22 }
  0x46   : > { %p3432_p4 = pneg %p3431_p10 }
  0x48   : > { %p3439_p7 = pnand %p3438_p12, %p3432_p4 }
  0x4a   : > { %3442 = shalt.err (!%p3439_p7)
}
  0x4b   : > { %s3564_s8 = smov [#allocation10]   ;;  %s3565_s20 = smov 128  }
  0x4c   : > { %s3566_s15 = smov 8   ;;  %s3443_s16 = scalar_lea.vmem %s256_s22, 16 }
  0x4d   : > { %3336 = dma.vmem_to_smem (!%p3679_p0), %s3686_s29, 256, %s3564_s8, [#allocation9], %s3565_s20, %s3565_s20, %s3566_s15  }
  0x4e   : > { %p3444_p8 = scmp.ne.s32.totalorder %s256_s22, %s3443_s16  ;;  %p3451_p1 = scmp.lt.s32.totalorder %s256_s22, %s256_s22 }
  0x4f   : > { %p3452_p3 = scmp.lt.s32.totalorder %s3443_s16, %s3443_s16 }
  0x50   : > { %p3446_p9 = pnand %p3444_p8, %p3690_p2 }
  0x51   : > { %p3453_p11 = por %p3452_p3, %p3451_p1 }
  0x52   : > { %p3447_p13 = pneg %p3446_p9 }
  0x54   : > { %p3454_p10 = pnand %p3453_p11, %p3447_p13 }
  0x56   : > { %3457 = shalt.err (!%p3454_p10)
}
  0x57   : > { %s3567_s18 = smov [#allocation11]   ;;  %s3568_s19 = smov [#allocation13]  }
  0x58   : > { %3339 = dma.vmem_to_smem (!%p3679_p0), %s256_s22, 16, %s3567_s18, [#allocation12]  }
  0x59   : > { %s265_s17 = sshll.u32 %s3568_s19, 4  ;;  %s266_s17 = int_to_ptr.vmem [resolvable:$true] %s265_s17 }
  0x5a   : > { %s3469_s29 = scalar_lea.vmem %s266_s17, 20480  ;;  %p3477_p12 = scmp.lt.s32.totalorder %s266_s17, %s266_s17 }
  0x5b   : > { %p3470_p4 = scmp.ne.s32.totalorder %s266_s17, %s3469_s29  ;;  %p3478_p7 = scmp.lt.s32.totalorder %s3469_s29, %s3469_s29 }
  0x5d   : > { %p3472_p5 = pnand %p3470_p4, %p3690_p2  ;;  %p3479_p8 = por %p3478_p7, %p3477_p12 }
  0x5f   : > { %p3473_p6 = pneg %p3472_p5 }
  0x61   : > { %p3480_p9 = pnand %p3479_p8, %p3473_p6 }
  0x63   : > { %3483 = shalt.err (!%p3480_p9)
}
  0x64   : > { %s5401_s5 = sld [smem:[#allocation38_spill]]  ;;  %p2712_p13 = scmp.ge.s32.totalorder %s3560_s27, 2 }
  0x65   : > { %p5402_p2 = scmp.ne.s32.totalorder (!%p2712_p13), %s5389_s11, 0 }
  0x66   : > { %278 = sbr.rel (%p2712_p13) target bundleno = 119 (0x77), region = 40 }
  0x6a   : > { %3342 = dma.hbm_to_vmem [thread:$0]  (!%p3679_p0), %s5401_s5, 20480, %s266_s17, [#allocation5], %s3565_s20, %s3565_s20, %s3566_s15  }
  0x6b   : > { %281 = sbr.rel (!%p5402_p2) target bundleno = 119 (0x77), region = 44  ;;  %s283_s9 = sand.u32 (%p5402_p2), 1, %s3556_s26  }
  0x6c   : > { %s2713_s8 = sshll.u32 (%p5402_p2), %s3560_s27, 3  ;;  %s3303_s21 = smul.u32 (%p5402_p2), 24, %s283_s9 }
  0x6d   : > { %s5403_s0 = sld [smem:[#allocation33_spill]] (%p5402_p2) }
  0x6e   : > { %s285_s20 = scalar_lea.vmem (%p5402_p2), [#allocation3], %s3303_s21 }
  0x73   : > { %s287_s19 = scalar_lea.vmem %s5403_s0, %s2713_s8 }
  0x74   : > { %v320_v0 = vld [vmem:[%s287_s19] sm:$0xff]  ;;  %v322_v1 = vld [vmem:[%s287_s19 + $0x10] sm:$0xff] }
  0x75   : > { %v324_v2 = vld [vmem:[%s287_s19 + $0x20] sm:$0xff]  ;;  %321 = vst [vmem:[%s285_s20] sm:$0xff] %v320_v0  ;;  %323 = vst [vmem:[%s285_s20 + $0x8] sm:$0xff] %v322_v1 }
  0x76   : > { %325 = vst [vmem:[%s285_s20 + $0x10] sm:$0xff] %v324_v2 }
  0x77 PF: > { %p5404_p0 = scmp.ne.s32.totalorder %s5394_s14, 0 }
  0x79   : > { %334 = sbr.rel (%p5404_p0) target bundleno = 802 (0x322), region = 82 }
  0x7e   : > { %s3744_s11 = sand.u32 1, %s3552_s25   ;;  %p5406_p1 = scmp.eq.s32.totalorder %s3632_s28, 0 }
  0x7f   : > { %5405 = sst [smem:[#allocation29_spill]] %s3744_s11  ;;  %s3304_s15 = smul.u32 24, %s3744_s11 }
  0x81   : > { %s3747_s17 = scalar_lea.vmem [#allocation3], %s3304_s15 }
  0x82   : > { %3527 = dma.done.wait (%p5406_p1), [#allocation7], 64   ;;  %p5407_p3 = pmov %p5406_p1 }
  0x83   : > { %p5408_p11 = pmov %p5406_p1 }
  0x84   : > { %3529 = vsyncadd (%p5407_p3), [#allocation7], 4294967232 }
  0x85   : > { %3531 = dma.done.wait (%p5408_p11), [#allocation9], 272   ;;  %p5409_p10 = pmov %p5406_p1 }
  0x86   : > { %p5410_p4 = pmov %p5406_p1 }
  0x87   : > { %3533 = vsyncadd (%p5409_p10), [#allocation9], 4294967024 }
  0x88   : > { %3535 = dma.done.wait (%p5410_p4), [#allocation12], 16   ;;  %p5411_p5 = pmov %p5406_p1 }
  0x89   : > { %p5412_p6 = pmov %p5406_p1 }
  0x8a   : > { %3537 = vsyncadd (%p5411_p5), [#allocation12], 4294967280 }
  0x8b   : > { %3539 = dma.done.wait (%p5412_p6), [#allocation5], 20480   ;;  %p5413_p12 = pmov %p5406_p1 }
  0x8d   : > { %3541 = vsyncadd (%p5413_p12), [#allocation5], 4294946816 }
  0x8e   : > { %363 = sfence }
  0x8f   : > { %s3765_s14 = sld [smem:[#allocation4]]  ;;  %v3814_v3 = vld [vmem:[%s3747_s17] sm:$0xff]  ;;  %v3817_v4 = vld [vmem:[%s3747_s17 + $0x8] sm:$0xff]  ;;  %v3832_v9 = vld [vmem:[%s3747_s17 + $0x10] sm:$0xff]  ;;  %vm706_vm0 = vcmask 523264   ;;  %vm779_vm1 = vcmask 1048064  }
  0x90   : > { %s3767_s29 = sld [smem:[#allocation4 + $0x80]]  ;;  %vm2569_vm2 = vcmask 1014784  }
  0x91   : > { %s3769_s23 = sld [smem:[#allocation4 + $0x100]] }
  0x92   : > { %s3771_s22 = sld [smem:[#allocation8]] }
  0x93   : > { %s3773_s9 = sld [smem:[#allocation4 + $0x1]] }
  0x94   : > { %s3775_s8 = sld [smem:[#allocation4 + $0x81]] }
  0x95   : > { %s3777_s21 = sld [smem:[#allocation4 + $0x101]]  ;;  %v397_v5 = vstv %s3765_s14 }
  0x96   : > { %s3779_s16 = sld [smem:[#allocation8 + $0x1]]  ;;  %v400_v6 = vstv %s3767_s29  ;;  %v398_v7 = vmul.f32 %v397_v5, %v3814_v3 }
  0x97   : > { %s3781_s18 = sld [smem:[#allocation4 + $0x2]]  ;;  %v401_v8 = vmul.f32 %v3817_v4, %v400_v6  ;;  %v404_v10 = vstv %s3769_s23 }
  0x98   : > { %s3783_s19 = sld [smem:[#allocation4 + $0x82]]  ;;  %v405_v14 = vmul.f32 %v3832_v9, %v404_v10  ;;  %v408_v19 = vstv %s3771_s22 }
  0x99   : > { %s3785_s20 = sld [smem:[#allocation4 + $0x102]]  ;;  %v412_v11 = vstv %s3773_s9  ;;  %v402_v13 = vadd.f32 %v401_v8, %v398_v7 }
  0x9a   : > { %s3787_s15 = sld [smem:[#allocation8 + $0x2]]  ;;  %v415_v12 = vstv %s3775_s8  ;;  %v413_v15 = vmul.f32 %v412_v11, %v3814_v3 }
  0x9b   : > { %s3789_s0 = sld [smem:[#allocation4 + $0x3]]  ;;  %v416_v16 = vmul.f32 %v3817_v4, %v415_v12  ;;  %v419_v17 = vstv %s3777_s21  ;;  %v406_v18 = vadd.f32 %v405_v14, %v402_v13 }
  0x9c   : > { %s3791_s1 = sld [smem:[#allocation4 + $0x83]]  ;;  %v420_v21 = vmul.f32 %v3832_v9, %v419_v17  ;;  %v423_v28 = vstv %s3779_s16 }
  0x9d   : > { %s3793_s2 = sld [smem:[#allocation4 + $0x103]]  ;;  %v417_v20 = vadd.f32 %v416_v16, %v413_v15  ;;  %v427_v22 = vstv %s3781_s18  ;;  %v409_v24 = vadd.f32 %v408_v19, %v406_v18 }
  0x9e   : > { %s3795_s3 = sld [smem:[#allocation8 + $0x3]]  ;;  %v430_v23 = vstv %s3783_s19  ;;  %v428_v30 = vmul.f32 %v427_v22, %v3814_v3 }
  0x9f   : > { %s3797_s4 = sld [smem:[#allocation4 + $0x4]]  ;;  %v421_v27 = vadd.f32 %v420_v21, %v417_v20  ;;  %v434_v29 = vstv %s3785_s20  ;;  %v431_v31 = vmul.f32 %v3817_v4, %v430_v23  ;;  %v3885_v36 = vmax.f32 %v409_v24, 0.0 }
  0xa0   : > { %s3799_s5 = sld [smem:[#allocation4 + $0x84]]  ;;  %v435_v37 = vmul.f32 %v3832_v9, %v434_v29  ;;  %v438_v40 = vstv %s3787_s15 }
  0xa1   : > { %s3801_s10 = sld [smem:[#allocation4 + $0x104]]  ;;  %v442_v25 = vstv %s3789_s0  ;;  %v424_v39 = vadd.f32 %v423_v28, %v421_v27  ;;  %v432_v43 = vadd.f32 %v431_v31, %v428_v30 }
  0xa2   : > { %s3803_s26 = sld [smem:[#allocation8 + $0x4]]  ;;  %v445_v26 = vstv %s3791_s1  ;;  %v443_v34 = vmul.f32 %v442_v25, %v3814_v3 }
  0xa3   : > { %s3805_s25 = sld [smem:[#allocation4 + $0x5]]  ;;  %v446_v35 = vmul.f32 %v3817_v4, %v445_v26  ;;  %v449_v38 = vstv %s3793_s2  ;;  %v436_v5 = vadd.f32 %v435_v37, %v432_v43  ;;  %v3946_v22 = vmax.f32 %v424_v39, 0.0 }
  0xa4   : > { %s3807_s30 = sld [smem:[#allocation4 + $0x85]]  ;;  %v450_v48 = vmul.f32 %v3832_v9, %v449_v38  ;;  %v453_v14 = vstv %s3795_s3 }
  0xa5   : > { %s3809_s27 = sld [smem:[#allocation4 + $0x105]]  ;;  %v457_v32 = vstv %s3797_s4  ;;  %v447_v47 = vadd.f32 %v446_v35, %v443_v34  ;;  %v439_v26 = vadd.f32 %v438_v40, %v436_v5 }
  0xa6   : > { %s3811_s13 = sld [smem:[#allocation8 + $0x5]]  ;;  %v460_v33 = vstv %s3799_s5  ;;  %v458_v41 = vmul.f32 %v457_v32, %v3814_v3 }
  0xa7   : > { %s3821_s24 = sld [smem:[#allocation4 + $0x6]]  ;;  %v461_v42 = vmul.f32 %v3817_v4, %v460_v33  ;;  %v464_v44 = vstv %s3801_s10  ;;  %v451_v6 = vadd.f32 %v450_v48, %v447_v47  ;;  %v3969_v43 = vmax.f32 %v439_v26, 0.0 }
  0xa8   : > { %s3823_s7 = sld [smem:[#allocation4 + $0x86]]  ;;  %v465_v56 = vmul.f32 %v3832_v9, %v464_v44  ;;  %v468_v23 = vstv %s3803_s26 }
  0xa9   : > { %s3825_s12 = sld [smem:[#allocation4 + $0x106]]  ;;  %v472_v45 = vstv %s3805_s25  ;;  %v462_v55 = vadd.f32 %v461_v42, %v458_v41  ;;  %v454_v27 = vadd.f32 %v453_v14, %v451_v6 }
  0xaa   : > { %s3829_s28 = sld [smem:[#allocation8 + $0x6]]  ;;  %v475_v46 = vstv %s3807_s30  ;;  %v473_v57 = vmul.f32 %v472_v45, %v3814_v3 }
  0xab   : > { %s3835_s6 = sld [smem:[#allocation4 + $0x7]]  ;;  %v476_v58 = vmul.f32 %v3817_v4, %v475_v46  ;;  %v479_v59 = vstv %s3809_s27  ;;  %v466_v15 = vadd.f32 %v465_v56, %v462_v55  ;;  %v3984_v55 = vmax.f32 %v454_v27, 0.0 }
  0xac   : > { %5414 = sst [smem:[#allocation30_spill]] %s3811_s13  ;;  %v480_v11 = vmul.f32 %v3832_v9, %v479_v59 }
  0xad   : > { %s3839_s14 = sld [smem:[#allocation4 + $0x87]]  ;;  %v487_v49 = vstv %s3821_s24  ;;  %v477_v10 = vadd.f32 %v476_v58, %v473_v57  ;;  %v469_v34 = vadd.f32 %v468_v23, %v466_v15 }
  0xae   : > { %s3841_s29 = sld [smem:[#allocation4 + $0x107]]  ;;  %v490_v50 = vstv %s3823_s7  ;;  %v488_v60 = vmul.f32 %v487_v49, %v3814_v3 }
  0xaf   : > { %s3844_s11 = sld [smem:[#allocation8 + $0x7]]  ;;  %v491_v61 = vmul.f32 %v3817_v4, %v490_v50  ;;  %v494_v62 = vstv %s3825_s12  ;;  %v481_v28 = vadd.f32 %v480_v11, %v477_v10  ;;  %v3986_v56 = vmax.f32 %v469_v34, 0.0 }
  0xb0   : > { %5415 = sst [smem:[#allocation31_spill]] %s3829_s28  ;;  %v495_v17 = vmul.f32 %v3832_v9, %v494_v62 }
  0xb1   : > { %s3848_s17 = sld [smem:[#allocation4 + $0x8]]  ;;  %v502_v51 = vstv %s3835_s6  ;;  %v492_v16 = vadd.f32 %v491_v61, %v488_v60 }
  0xb2   : > { %s3851_s23 = sld [smem:[#allocation4 + $0x88]]  ;;  %v503_v63 = vmul.f32 %v502_v51, %v3814_v3 }
  0xb3   : > { %s3853_s9 = sld [smem:[#allocation4 + $0x108]]  ;;  %v505_v52 = vstv %s3839_s14  ;;  %v496_v31 = vadd.f32 %v495_v17, %v492_v16 }
  0xb4   : > { %s3855_s8 = sld [smem:[#allocation8 + $0x8]]  ;;  %v506_v0 = vmul.f32 %v3817_v4, %v505_v52  ;;  %v509_v7 = vstv %s3841_s29 }
  0xb5   : > { %5416 = sst [smem:[#allocation32_spill]] %s3844_s11  ;;  %v510_v19 = vmul.f32 %v3832_v9, %v509_v7 }
  0xb6   : > { %s3859_s11 = sld [smem:[#allocation4 + $0x9]]  ;;  %v507_v18 = vadd.f32 %v506_v0, %v503_v63 }
  0xb7   : > { %s3861_s28 = sld [smem:[#allocation4 + $0x89]]  ;;  %v517_v53 = vstv %s3848_s17 }
  0xb8   : > { %s3865_s21 = sld [smem:[#allocation4 + $0x109]]  ;;  %v520_v54 = vstv %s3851_s23  ;;  %v518_v1 = vmul.f32 %v517_v53, %v3814_v3  ;;  %v511_v37 = vadd.f32 %v510_v19, %v507_v18 }
  0xb9   : > { %s3869_s13 = sld [smem:[#allocation8 + $0x9]]  ;;  %v521_v2 = vmul.f32 %v3817_v4, %v520_v54  ;;  %v524_v8 = vstv %s3853_s9 }
  0xba   : > { %s3873_s22 = sld [smem:[#allocation4 + $0xa]]  ;;  %v525_v21 = vmul.f32 %v3832_v9, %v524_v8  ;;  %v528_v40 = vstv %s3855_s8 }
  0xbb   : > { %s3879_s18 = sld [smem:[#allocation4 + $0x8a]]  ;;  %v522_v20 = vadd.f32 %v521_v2, %v518_v1 }
  0xbc   : > { %s3883_s0 = sld [smem:[#allocation4 + $0x10a]]  ;;  %v532_v12 = vstv %s3859_s11 }
  0xbd   : > { %s3889_s1 = sld [smem:[#allocation8 + $0xa]]  ;;  %v535_v13 = vstv %s3861_s28  ;;  %v533_v24 = vmul.f32 %v532_v12, %v3814_v3  ;;  %v526_v38 = vadd.f32 %v525_v21, %v522_v20 }
  0xbe   : > { %s3894_s4 = sld [smem:[#allocation4 + $0xb]]  ;;  %v536_v25 = vmul.f32 %v3817_v4, %v535_v13  ;;  %v539_v29 = vstv %s3865_s21 }
  0xbf   : > { %s3899_s5 = sld [smem:[#allocation4 + $0x8b]]  ;;  %v540_v42 = vmul.f32 %v3832_v9, %v539_v29  ;;  %v529_v52 = vadd.f32 %v528_v40, %v526_v38  ;;  %v543_v58 = vstv %s3869_s13 }
  0xc0   : > { %s3904_s2 = sld [smem:[#allocation4 + $0x10b]]  ;;  %v547_v32 = vstv %s3873_s22  ;;  %v537_v41 = vadd.f32 %v536_v25, %v533_v24 }
  0xc1   : > { %s3910_s16 = sld [smem:[#allocation8 + $0xb]]  ;;  %v550_v33 = vstv %s3879_s18  ;;  %v548_v45 = vmul.f32 %v547_v32, %v3814_v3  ;;  %v4007_v7 = vmax.f32 %v529_v52, 0.0 }
  0xc2   : > { %s3915_s24 = sld [smem:[#allocation4 + $0xc]]  ;;  %v551_v46 = vmul.f32 %v3817_v4, %v550_v33  ;;  %v554_v48 = vstv %s3883_s0  ;;  %v541_v57 = vadd.f32 %v540_v42, %v537_v41 }
  0xc3   : > { %s3921_s6 = sld [smem:[#allocation4 + $0x8c]]  ;;  %v555_v60 = vmul.f32 %v3832_v9, %v554_v48  ;;  %v558_v11 = vstv %s3889_s1 }
  0xc4   : > { %s3927_s7 = sld [smem:[#allocation4 + $0x10c]]  ;;  %v562_v49 = vstv %s3894_s4  ;;  %v552_v59 = vadd.f32 %v551_v46, %v548_v45  ;;  %v4012_v10 = vadd.f32 %v543_v58, %v541_v57 }
  0xc5   : > { %s3931_s25 = sld [smem:[#allocation8 + $0xc]]  ;;  %v565_v50 = vstv %s3899_s5  ;;  %v563_v61 = vmul.f32 %v562_v49, %v3814_v3 }
  0xc6   : > { %s3936_s27 = sld [smem:[#allocation4 + $0xd]]  ;;  %v566_v62 = vmul.f32 %v3817_v4, %v565_v50  ;;  %v569_v0 = vstv %s3904_s2  ;;  %v556_v14 = vadd.f32 %v555_v60, %v552_v59 }
  0xc7   : > { %s3940_s30 = sld [smem:[#allocation4 + $0x8d]]  ;;  %v570_v16 = vmul.f32 %v3832_v9, %v569_v0  ;;  %v573_v17 = vstv %s3910_s16 }
  0xc8   : > { %s5417_s10 = sld [smem:[#allocation30_spill]]  ;;  %v577_v53 = vstv %s3915_s24  ;;  %v567_v15 = vadd.f32 %v566_v62, %v563_v61 }
  0xc9   : > { %s3944_s28 = sld [smem:[#allocation4 + $0x10d]]  ;;  %v580_v54 = vstv %s3921_s6  ;;  %v578_v1 = vmul.f32 %v577_v53, %v3814_v3 }
  0xca   : > { %s5418_s3 = sld [smem:[#allocation31_spill]]  ;;  %v581_v2 = vmul.f32 %v3817_v4, %v580_v54  ;;  %v584_v8 = vstv %s3927_s7  ;;  %v571_v45 = vadd.f32 %v570_v16, %v567_v15  ;;  %v4083_v15 = vmax.f32 %v4012_v10, 0.0 }
  0xcb   : > { %s3951_s12 = sld [smem:[#allocation8 + $0xd]]  ;;  %v585_v19 = vmul.f32 %v3832_v9, %v584_v8  ;;  %v588_v49 = vstv %s3931_s25 }
  0xcc   : > { %s5419_s11 = sld [smem:[#allocation32_spill]]  ;;  %v592_v12 = vstv %s3936_s27  ;;  %v582_v18 = vadd.f32 %v581_v2, %v578_v1  ;;  %v574_v2 = vadd.f32 %v573_v17, %v571_v45 }
  0xcd   : > { %s3954_s19 = sld [smem:[#allocation4 + $0xe]]  ;;  %v595_v13 = vstv %s3940_s30  ;;  %v593_v23 = vmul.f32 %v592_v12, %v3814_v3 }
  0xce   : > { %v483_v30 = vstv %s5417_s10  ;;  %s3959_s20 = sld [smem:[#allocation4 + $0x8e]]  ;;  %v596_v24 = vmul.f32 %v3817_v4, %v595_v13  ;;  %v586_v53 = vadd.f32 %v585_v19, %v582_v18 }
  0xcf   : > { %s3962_s26 = sld [smem:[#allocation4 + $0x10e]]  ;;  %v484_v44 = vadd.f32 %v483_v30, %v481_v28  ;;  %v599_v20 = vstv %s3944_s28 }
  0xd0   : > { %v498_v35 = vstv %s5418_s3  ;;  %s3967_s15 = sld [smem:[#allocation8 + $0xe]]  ;;  %v597_v40 = vadd.f32 %v596_v24, %v593_v23  ;;  %v4097_v23 = vmax.f32 %v574_v2, 0.0 }
  0xd1   : > { %s3973_s14 = sld [smem:[#allocation4 + $0xf]]  ;;  %v499_v47 = vadd.f32 %v498_v35, %v496_v31  ;;  %v3996_v63 = vmax.f32 %v484_v44, 0.0  ;;  %v600_v31 = vmul.f32 %v3832_v9, %v599_v20 }
  0xd2   : > { %v513_v39 = vstv %s5419_s11  ;;  %s3978_s29 = sld [smem:[#allocation4 + $0x8f]] }
  0xd3   : > { %v514_v51 = vadd.f32 %v513_v39, %v511_v37  ;;  %s3982_s17 = sld [smem:[#allocation4 + $0x10f]]  ;;  %v4003_v5 = vmax.f32 %v499_v47, 0.0  ;;  %v607_v27 = vstv %s3954_s19  ;;  %v601_v59 = vadd.f32 %v600_v31, %v597_v40 }
  0xd4   : > { %s3989_s23 = sld [smem:[#allocation10 + $0x3]]  ;;  %v610_v28 = vstv %s3959_s20  ;;  %v608_v41 = vmul.f32 %v607_v27, %v3814_v3 }
  0xd5   : > { %s3994_s9 = sld [smem:[#allocation10 + $0x83]]  ;;  %v4005_v6 = vmax.f32 %v514_v51, 0.0  ;;  %v611_v42 = vmul.f32 %v3817_v4, %v610_v28  ;;  %v614_v46 = vstv %s3962_s26 }
  0xd6   : > { %s4001_s13 = sld [smem:[#allocation10 + $0x103]]  ;;  %v615_v61 = vmul.f32 %v3832_v9, %v614_v46  ;;  %v618_v20 = vstv %s3967_s15 }
  0xd7   : > { %s4010_s8 = sld [smem:[#allocation10 + $0x183]]  ;;  %v622_v32 = vstv %s3973_s14  ;;  %v612_v60 = vadd.f32 %v611_v42, %v608_v41 }
  0xd8   : > { %s4017_s21 = sld [smem:[#allocation10 + $0x203]]  ;;  %v625_v35 = vstv %s3978_s29  ;;  %v623_v50 = vmul.f32 %v622_v32, %v3814_v3  ;;  %v559_v3 = vadd.f32 %v558_v11, %v556_v14  ;;  %v589_v11 = vadd.f32 %v588_v49, %v586_v53 }
  0xd9   : > { %s4021_s22 = sld [smem:[#allocation10 + $0x283]]  ;;  %v626_v51 = vmul.f32 %v3817_v4, %v625_v35  ;;  %v629_v54 = vstv %s3982_s17  ;;  %v603_v4 = vstv %s3951_s12  ;;  %v616_v19 = vadd.f32 %v615_v61, %v612_v60 }
  0xda   : > { %v850_v21 = vstv %s3989_s23  ;;  %s4026_s18 = sld [smem:[#allocation10 + $0x303]]  ;;  %v630_v12 = vmul.f32 %v3832_v9, %v629_v54  ;;  %v604_v18 = vadd.f32 %v603_v4, %v601_v59  ;;  %v4091_v9 = vmax.f32 %v559_v3, 0.0 }
  0xdb   : > { %v851_v25 = vmul.f32 %v850_v21, %v3885_v36  ;;  %v853_v26 = vstv %s3994_s9  ;;  %s4032_s0 = sld [smem:[#allocation10 + $0x383]]  ;;  %v627_v8 = vadd.f32 %v626_v51, %v623_v50  ;;  %v619_v31 = vadd.f32 %v618_v20, %v616_v19 }
  0xdc   : > { %s4036_s1 = sld [smem:[#allocation8 + $0xf]]  ;;  %v854_v29 = vmul.f32 %v853_v26, %v3946_v22  ;;  %v857_v30 = vstv %s4001_s13  ;;  %v4102_v26 = vmax.f32 %v589_v11, 0.0 }
  0xdd   : > { %v858_v33 = vmul.f32 %v857_v30, %v3969_v43  ;;  %v861_v34 = vstv %s4010_s8  ;;  %s4044_s4 = sld [smem:[#allocation10 + $0x403]]  ;;  %v631_v24 = vadd.f32 %v630_v12, %v627_v8  ;;  %v4108_v30 = vmax.f32 %v604_v18, 0.0 }
  0xde   : > { %v855_v37 = vadd.f32 %v854_v29, %v851_v25  ;;  %v862_v38 = vmul.f32 %v861_v34, %v3984_v55  ;;  %v865_v39 = vstv %s4017_s21  ;;  %s4049_s5 = sld [smem:[#allocation10 + $0x483]] }
  0xdf   : > { %v869_v44 = vstv %s4021_s22  ;;  %s4054_s2 = sld [smem:[#allocation10 + $0x503]]  ;;  %v866_v48 = vmul.f32 %v865_v39, %v3986_v56 }
  0xe0   : > { %v859_v47 = vadd.f32 %v858_v33, %v855_v37  ;;  %s4058_s16 = sld [smem:[#allocation10 + $0x583]]  ;;  %v873_v52 = vstv %s4026_s18  ;;  %v870_v58 = vmul.f32 %v869_v44, %v3996_v63 }
  0xe1   : > { %s4064_s24 = sld [smem:[#allocation10 + $0x603]]  ;;  %v877_v62 = vstv %s4032_s0  ;;  %v874_v1 = vmul.f32 %v873_v52, %v4003_v5  ;;  %v4134_v52 = vmax.f32 %v619_v31, 0.0 }
  0xe2   : > { %v863_v57 = vadd.f32 %v862_v38, %v859_v47  ;;  %s4068_s6 = sld [smem:[#allocation10 + $0x683]]  ;;  %v878_v16 = vmul.f32 %v877_v62, %v4005_v6  ;;  %v633_v27 = vstv %s4036_s1 }
  0xe3   : > { %s4072_s7 = sld [smem:[#allocation10 + $0x703]]  ;;  %v881_v13 = vstv %s4044_s4  ;;  %v634_v39 = vadd.f32 %v633_v27, %v631_v24 }
  0xe4   : > { %v867_v0 = vadd.f32 %v866_v48, %v863_v57  ;;  %s4076_s25 = sld [smem:[#allocation10 + $0x783]]  ;;  %v885_v17 = vstv %s4049_s5  ;;  %v882_v21 = vmul.f32 %v881_v13, %v4007_v7 }
  0xe5   : > { %s4080_s27 = sld [smem:[#allocation10 + $0x7]]  ;;  %v889_v25 = vstv %s4054_s2  ;;  %v886_v29 = vmul.f32 %v885_v17, %v4083_v15  ;;  %v4144_v61 = vmax.f32 %v634_v39, 0.0 }
  0xe6   : > { %v871_v14 = vadd.f32 %v870_v58, %v867_v0  ;;  %s4086_s30 = sld [smem:[#allocation10 + $0x87]]  ;;  %v893_v32 = vstv %s4058_s16  ;;  %v890_v35 = vmul.f32 %v889_v25, %v4091_v9 }
  0xe7   : > { %s4089_s10 = sld [smem:[#allocation10 + $0x107]]  ;;  %v897_v40 = vstv %s4064_s24  ;;  %v894_v45 = vmul.f32 %v893_v32, %v4097_v23  ;;  %s3569_s24 = smov 64  }
  0xe8   : > { %v875_v10 = vadd.f32 %v874_v1, %v871_v14  ;;  %s4095_s28 = sld [smem:[#allocation10 + $0x187]]  ;;  %v901_v48 = vstv %s4068_s6  ;;  %v898_v54 = vmul.f32 %v897_v40, %v4102_v26 }
  0xe9   : > { %s4100_s3 = sld [smem:[#allocation10 + $0x207]]  ;;  %v905_v58 = vstv %s4072_s7  ;;  %v902_v3 = vmul.f32 %v901_v48, %v4108_v30 }
  0xea   : > { %v879_v28 = vadd.f32 %v878_v16, %v875_v10  ;;  %s4106_s12 = sld [smem:[#allocation10 + $0x287]]  ;;  %v909_v0 = vstv %s4076_s25  ;;  %v906_v12 = vmul.f32 %v905_v58, %v4134_v52 }
  0xeb   : > { %v1130_v33 = vstv %s4080_s27  ;;  %s4112_s11 = sld [smem:[#allocation10 + $0x307]]  ;;  %v910_v18 = vmul.f32 %v909_v0, %v4144_v61 }
  0xec   : > { %v883_v34 = vadd.f32 %v882_v21, %v879_v28  ;;  %v1131_v37 = vmul.f32 %v1130_v33, %v3885_v36  ;;  %v1133_v38 = vstv %s4086_s30  ;;  %s4117_s19 = sld [smem:[#allocation10 + $0x387]] }
  0xed   : > { %s4120_s20 = sld [smem:[#allocation11 + $0x3]]  ;;  %v1134_v41 = vmul.f32 %v1133_v38, %v3946_v22  ;;  %v1137_v42 = vstv %s4089_s10 }
  0xee   : > { %v887_v44 = vadd.f32 %v886_v29, %v883_v34  ;;  %v1138_v46 = vmul.f32 %v1137_v42, %v3969_v43  ;;  %v1141_v47 = vstv %s4095_s28  ;;  %s4127_s26 = sld [smem:[#allocation10 + $0x407]] }
  0xef   : > { %v1135_v49 = vadd.f32 %v1134_v41, %v1131_v37  ;;  %v1142_v50 = vmul.f32 %v1141_v47, %v3984_v55  ;;  %v1145_v51 = vstv %s4100_s3  ;;  %s4132_s15 = sld [smem:[#allocation10 + $0x487]] }
  0xf0   : > { %v891_v53 = vadd.f32 %v890_v35, %v887_v44  ;;  %v1149_v57 = vstv %s4106_s12  ;;  %s4138_s14 = sld [smem:[#allocation10 + $0x507]]  ;;  %v1146_v60 = vmul.f32 %v1145_v51, %v3986_v56 }
  0xf1   : > { %v1139_v59 = vadd.f32 %v1138_v46, %v1135_v49  ;;  %s4142_s29 = sld [smem:[#allocation10 + $0x587]]  ;;  %v1153_v4 = vstv %s4112_s11  ;;  %v1150_v2 = vmul.f32 %v1149_v57, %v3996_v63 }
  0xf2   : > { %v895_v62 = vadd.f32 %v894_v45, %v891_v53  ;;  %s4148_s17 = sld [smem:[#allocation10 + $0x607]]  ;;  %v1157_v13 = vstv %s4117_s19  ;;  %v1154_v14 = vmul.f32 %v1153_v4, %v4003_v5 }
  0xf3   : > { %v1143_v1 = vadd.f32 %v1142_v50, %v1139_v59  ;;  %s4152_s23 = sld [smem:[#allocation10 + $0x687]]  ;;  %v1158_v20 = vmul.f32 %v1157_v13, %v4005_v6  ;;  %v913_v24 = vstv %s4120_s20 }
  0xf4   : > { %v899_v8 = vadd.f32 %v898_v54, %v895_v62  ;;  %s4156_s9 = sld [smem:[#allocation10 + $0x707]]  ;;  %v1161_v19 = vstv %s4127_s26 }
  0xf5   : > { %v1147_v11 = vadd.f32 %v1146_v60, %v1143_v1  ;;  %s4159_s13 = sld [smem:[#allocation10 + $0x787]]  ;;  %v1165_v21 = vstv %s4132_s15  ;;  %v1162_v27 = vmul.f32 %v1161_v19, %v4007_v7 }
  0xf6   : > { %v903_v16 = vadd.f32 %v902_v3, %v899_v8  ;;  %s2800_s8 = sld [smem:[#allocation10 + $0x1]]  ;;  %v1169_v29 = vstv %s4138_s14  ;;  %v1166_v32 = vmul.f32 %v1165_v21, %v4083_v15 }
  0xf7   : > { %v1151_v17 = vadd.f32 %v1150_v2, %v1147_v11  ;;  %s2801_s21 = sld [smem:[#allocation10 + $0x81]]  ;;  %v1173_v34 = vstv %s4142_s29  ;;  %v1170_v38 = vmul.f32 %v1169_v29, %v4091_v9 }
  0xf8   : > { %v907_v10 = vadd.f32 %v906_v12, %v903_v16  ;;  %s2802_s22 = sld [smem:[#allocation10 + $0x101]]  ;;  %v1177_v42 = vstv %s4148_s17  ;;  %v1174_v47 = vmul.f32 %v1173_v34, %v4097_v23 }
  0xf9   : > { %v1155_v25 = vadd.f32 %v1154_v14, %v1151_v17  ;;  %s2803_s18 = sld [smem:[#allocation10 + $0x181]]  ;;  %v1181_v50 = vstv %s4152_s23  ;;  %v1178_v58 = vmul.f32 %v1177_v42, %v4102_v26 }
  0xfa   : > { %v911_v28 = vadd.f32 %v910_v18, %v907_v10  ;;  %s4168_s0 = sld [smem:[#allocation10 + $0x201]]  ;;  %v1185_v60 = vstv %s4156_s9  ;;  %v1182_v0 = vmul.f32 %v1181_v50, %v4108_v30 }
  0xfb   : > { %v1159_v31 = vadd.f32 %v1158_v20, %v1155_v25  ;;  %s4171_s1 = sld [smem:[#allocation10 + $0x281]]  ;;  %v1189_v2 = vstv %s4159_s13  ;;  %v1186_v11 = vmul.f32 %v1185_v60, %v4134_v52 }
  0xfc   : > { %v914_v33 = vadd.f32 %v913_v24, %v911_v28  ;;  %v709_v35 = vstv %s2800_s8  ;;  %s4174_s4 = sld [smem:[#allocation10 + $0x301]]  ;;  %v1190_v17 = vmul.f32 %v1189_v2, %v4144_v61 }
  0xfd   : > { %v1163_v37 = vadd.f32 %v1162_v27, %v1159_v31  ;;  %v710_v39 = vmul.f32 %v709_v35, %v3885_v36  ;;  %v712_v40 = vstv %s2801_s21  ;;  %s4178_s5 = sld [smem:[#allocation10 + $0x381]] }
  0xfe   : > { %v915_v41 = vmax.f32 %v914_v33, 0.0  ;;  %s4181_s2 = sld [smem:[#allocation11 + $0x7]]  ;;  %v713_v44 = vmul.f32 %v712_v40, %v3946_v22  ;;  %v716_v45 = vstv %s2802_s22 }
  0xff   : > { %v1167_v46 = vadd.f32 %v1166_v32, %v1163_v37  ;;  %v717_v48 = vmul.f32 %v716_v45, %v3969_v43  ;;  %v720_v49 = vstv %s2803_s18  ;;  %s4186_s16 = sld [smem:[#allocation10 + $0x401]] }
 0x100   : > { %917 = vrot.lane.b32.xlu0 %v915_v41, %s3569_s24  ;;  %v714_v51 = vadd.f32 %v713_v44, %v710_v39  ;;  %v721_v53 = vmul.f32 %v720_v49, %v3984_v55  ;;  %v724_v54 = vstv %s4168_s0  ;;  %s4192_s6 = sld [smem:[#allocation10 + $0x481]] }
 0x101   : > { %v1171_v57 = vadd.f32 %v1170_v38, %v1167_v46  ;;  %v728_v59 = vstv %s4171_s1  ;;  %s4196_s7 = sld [smem:[#allocation10 + $0x501]]  ;;  %v725_v3 = vmul.f32 %v724_v54, %v3986_v56 }
 0x102   : > { %v718_v62 = vadd.f32 %v717_v48, %v714_v51  ;;  %s4200_s25 = sld [smem:[#allocation10 + $0x581]]  ;;  %v732_v1 = vstv %s4174_s4  ;;  %v729_v12 = vmul.f32 %v728_v59, %v3996_v63 }
 0x103   : > { %v1175_v4 = vadd.f32 %v1174_v47, %v1171_v57  ;;  %s4204_s27 = sld [smem:[#allocation10 + $0x601]]  ;;  %v736_v14 = vstv %s4178_s5  ;;  %v733_v18 = vmul.f32 %v732_v1, %v4003_v5 }
 0x104   : > { %v722_v8 = vadd.f32 %v721_v53, %v718_v62  ;;  %s4208_s30 = sld [smem:[#allocation10 + $0x681]]  ;;  %v737_v21 = vmul.f32 %v736_v14, %v4005_v6  ;;  %v1193_v27 = vstv %s4181_s2 }
 0x105   : > { %v1179_v13 = vadd.f32 %v1178_v58, %v1175_v4  ;;  %s4212_s10 = sld [smem:[#allocation10 + $0x701]]  ;;  %v740_v20 = vstv %s4186_s16 }
 0x106   : > { %v726_v16 = vadd.f32 %v725_v3, %v722_v8  ;;  %s4215_s28 = sld [smem:[#allocation10 + $0x781]]  ;;  %v744_v25 = vstv %s4192_s6  ;;  %v741_v29 = vmul.f32 %v740_v20, %v4007_v7 }
 0x107   : > { %v1183_v19 = vadd.f32 %v1182_v0, %v1179_v13  ;;  %s2868_s3 = sld [smem:[#allocation10 + $0x5]]  ;;  %v748_v32 = vstv %s4196_s7  ;;  %v745_v34 = vmul.f32 %v744_v25, %v4083_v15 }
 0x108   : > { %v730_v10 = vadd.f32 %v729_v12, %v726_v16  ;;  %s2869_s12 = sld [smem:[#allocation10 + $0x85]]  ;;  %v752_v37 = vstv %s4200_s25  ;;  %v749_v40 = vmul.f32 %v748_v32, %v4091_v9 }
 0x109   : > { %v1187_v24 = vadd.f32 %v1186_v11, %v1183_v19  ;;  %s2870_s11 = sld [smem:[#allocation10 + $0x105]]  ;;  %v756_v45 = vstv %s4204_s27  ;;  %v753_v49 = vmul.f32 %v752_v37, %v4097_v23 }
 0x10a   : > { %v734_v28 = vadd.f32 %v733_v18, %v730_v10  ;;  %s2871_s19 = sld [smem:[#allocation10 + $0x185]]  ;;  %v760_v53 = vstv %s4208_s30  ;;  %v757_v60 = vmul.f32 %v756_v45, %v4102_v26  ;;  %v2064_v45 = vld [vmem:[#allocation13 + $0x68] sm:$0xff] }
 0x10b   : > { %v1191_v31 = vadd.f32 %v1190_v17, %v1187_v24  ;;  %s4224_s20 = sld [smem:[#allocation10 + $0x205]]  ;;  %v764_v3 = vstv %s4212_s10  ;;  %v761_v2 = vmul.f32 %v760_v53, %v4108_v30 }
 0x10c   : > { %v738_v33 = vadd.f32 %v737_v21, %v734_v28  ;;  %s4227_s26 = sld [smem:[#allocation10 + $0x285]]  ;;  %v768_v12 = vstv %s4215_s28  ;;  %v765_v16 = vmul.f32 %v764_v3, %v4134_v52  ;;  %v2066_v28 = vld [vmem:[#allocation13 + $0x78] sm:$0xff] }
 0x10d   : > { %v1194_v35 = vadd.f32 %v1193_v27, %v1191_v31  ;;  %v990_v38 = vstv %s2868_s3  ;;  %s4230_s15 = sld [smem:[#allocation10 + $0x305]]  ;;  %v769_v10 = vmul.f32 %v768_v12, %v4144_v61  ;;  %v2082_v27 = vld [vmem:[#allocation13 + $0xf8] sm:$0xff] }
 0x10e   : > { %v742_v39 = vadd.f32 %v741_v29, %v738_v33  ;;  %v991_v41 = vmul.f32 %v990_v38, %v3885_v36  ;;  %v993_v42 = vstv %s2869_s12  ;;  %s4234_s14 = sld [smem:[#allocation10 + $0x385]]  ;;  %v2081_v29 = vld [vmem:[#allocation13 + $0xf0] sm:$0xff]  ;;  %3128 = vmatprep.subr.mxu0 %v2082_v27  ;;  %v2114_v33 = vld [vmem:[#allocation13 + $0x1f8] sm:$0xff] }
 0x10f   : > { %v1195_v44 = vmax.f32 %v1194_v35, 0.0  ;;  %s4237_s29 = sld [smem:[#allocation11 + $0x1]]  ;;  %v994_v46 = vmul.f32 %v993_v42, %v3946_v22  ;;  %v997_v47 = vstv %s2870_s11  ;;  %v2098_v35 = vld [vmem:[#allocation13 + $0x178] sm:$0xff]  ;;  %3129 = vmatpush3.msra.mxu0 %v2066_v28  ;;  %3163 = vmatprep.subr.mxu1 %v2114_v33  ;;  %v2061_v27 = vld [vmem:[#allocation13 + $0x50] sm:$0xff]  ;;  %v2076_v33 = vld [vmem:[#allocation13 + $0xc8] sm:$0xff] }
 0x110   : > { %v746_v48 = vadd.f32 %v745_v34, %v742_v39  ;;  %v998_v50 = vmul.f32 %v997_v47, %v3969_v43  ;;  %v1001_v51 = vstv %s2871_s19  ;;  %s4242_s17 = sld [smem:[#allocation10 + $0x405]]  ;;  %v2065_v34 = vld [vmem:[#allocation13 + $0x70] sm:$0xff]  ;;  %3130 = vmatprep.subr.mxu0 %v2081_v29  ;;  %3164 = vmatpush3.msra.mxu1 %v2098_v35  ;;  %v2112_v47 = vld [vmem:[#allocation13 + $0x1e8] sm:$0xff]  ;;  %v2094_v28 = vld [vmem:[#allocation13 + $0x158] sm:$0xff] }
 0x111   : > { %1197 = vrot.lane.b32.xlu1 %v1195_v44, %s3569_s24  ;;  %v995_v54 = vadd.f32 %v994_v46, %v991_v41  ;;  %v1002_v57 = vmul.f32 %v1001_v51, %v3984_v55  ;;  %v1005_v58 = vstv %s4224_s20  ;;  %s4248_s23 = sld [smem:[#allocation10 + $0x485]]  ;;  %v2113_v41 = vld [vmem:[#allocation13 + $0x1f0] sm:$0xff]  ;;  %3131 = vmatpush3.msra.mxu0 %v2065_v34  ;;  %v2096_v51 = vld [vmem:[#allocation13 + $0x168] sm:$0xff] }
 0x112   : > { %v750_v59 = vadd.f32 %v749_v40, %v746_v48  ;;  %v1009_v62 = vstv %s4227_s26  ;;  %s4252_s9 = sld [smem:[#allocation10 + $0x505]]  ;;  %v1006_v0 = vmul.f32 %v1005_v58, %v3986_v56  ;;  %v2080_v40 = vld [vmem:[#allocation13 + $0xe8] sm:$0xff]  ;;  %v2097_v46 = vld [vmem:[#allocation13 + $0x170] sm:$0xff]  ;;  %3165 = vmatprep.subr.mxu1 %v2113_v41  ;;  %v2063_v58 = vld [vmem:[#allocation13 + $0x60] sm:$0xff] }
 0x113   : > { %v999_v4 = vadd.f32 %v998_v50, %v995_v54  ;;  %s4256_s13 = sld [smem:[#allocation10 + $0x585]]  ;;  %v1013_v8 = vstv %s4230_s15  ;;  %v1010_v11 = vmul.f32 %v1009_v62, %v3996_v63  ;;  %v2079_v50 = vld [vmem:[#allocation13 + $0xe0] sm:$0xff]  ;;  %3132 = vmatprep.subr.mxu0 %v2080_v40  ;;  %3166 = vmatpush3.msra.mxu1 %v2097_v46  ;;  %v2109_v34 = vld [vmem:[#allocation13 + $0x1d0] sm:$0xff]  ;;  %v2108_v46 = vld [vmem:[#allocation13 + $0x1c8] sm:$0xff] }
 0x114   : > { %v754_v1 = vadd.f32 %v753_v49, %v750_v59  ;;  %s4260_s8 = sld [smem:[#allocation10 + $0x605]]  ;;  %v1017_v18 = vstv %s4234_s14  ;;  %v1014_v17 = vmul.f32 %v1013_v8, %v4003_v5  ;;  %v2111_v59 = vld [vmem:[#allocation13 + $0x1e0] sm:$0xff]  ;;  %3133 = vmatpush3.msra.mxu0 %v2064_v45  ;;  %3167 = vmatprep.subr.mxu1 %v2112_v47  ;;  %v2093_v40 = vld [vmem:[#allocation13 + $0x150] sm:$0xff] }
 0x115   : > { %v1003_v13 = vadd.f32 %v1002_v57, %v999_v4  ;;  %s4264_s21 = sld [smem:[#allocation10 + $0x685]]  ;;  %v1018_v25 = vmul.f32 %v1017_v18, %v4005_v6  ;;  %v772_v37 = vstv %s4237_s29  ;;  %3134 = vmatprep.subr.mxu0 %v2079_v50  ;;  %3168 = vmatpush3.msra.mxu1 %v2096_v51  ;;  %v2075_v45 = vld [vmem:[#allocation13 + $0xc0] sm:$0xff]  ;;  %v2092_v51 = vld [vmem:[#allocation13 + $0x148] sm:$0xff] }
 0x116   : > { %v758_v14 = vadd.f32 %v757_v60, %v754_v1  ;;  %s4268_s22 = sld [smem:[#allocation10 + $0x705]]  ;;  %v1021_v21 = vstv %s4242_s17  ;;  %3135 = vmatpush3.msra.mxu0 %v2063_v58  ;;  %3169 = vmatprep.subr.mxu1 %v2111_v59  ;;  %v2059_v50 = vld [vmem:[#allocation13 + $0x40] sm:$0xff]  ;;  %v2074_v58 = vld [vmem:[#allocation13 + $0xb8] sm:$0xff] }
 0x117   : > { %v1007_v19 = vadd.f32 %v1006_v0, %v1003_v13  ;;  %s4271_s18 = sld [smem:[#allocation10 + $0x785]]  ;;  %v1025_v32 = vstv %s4248_s23  ;;  %v1022_v39 = vmul.f32 %v1021_v21, %v4007_v7  ;;  %v2078_v0 = vld [vmem:[#allocation13 + $0xd8] sm:$0xff]  ;;  %v2107_v59 = vld [vmem:[#allocation13 + $0x1c0] sm:$0xff] }
 0x118   : > { %v762_v20 = vadd.f32 %v761_v2, %v758_v14  ;;  %s4275_s0 = sld [smem:[#allocation10 + $0xb]]  ;;  %v1029_v44 = vstv %s4252_s9  ;;  %v1026_v49 = vmul.f32 %v1025_v32, %v4083_v15  ;;  %v2062_v13 = vld [vmem:[#allocation13 + $0x58] sm:$0xff]  ;;  %3136 = vmatprep.subr.mxu0 %v2078_v0 }
 0x119   : > { %v1011_v24 = vadd.f32 %v1010_v11, %v1007_v19  ;;  %s4278_s1 = sld [smem:[#allocation10 + $0x8b]]  ;;  %v1033_v54 = vstv %s4256_s13  ;;  %v1030_v62 = vmul.f32 %v1029_v44, %v4091_v9  ;;  %v2095_v11 = vld [vmem:[#allocation13 + $0x160] sm:$0xff]  ;;  %3137 = vmatpush3.msra.mxu0 %v2062_v13 }
 0x11a   : > { %v766_v31 = vadd.f32 %v765_v16, %v762_v20  ;;  %s4281_s4 = sld [smem:[#allocation10 + $0x10b]]  ;;  %v1037_v2 = vstv %s4260_s8  ;;  %v1034_v16 = vmul.f32 %v1033_v54, %v4097_v23  ;;  %v2110_v20 = vld [vmem:[#allocation13 + $0x1d8] sm:$0xff]  ;;  %3170 = vmatpush3.msra.mxu1 %v2095_v11 }
 0x11b   : > { %v1015_v38 = vadd.f32 %v1014_v17, %v1011_v24  ;;  %s4285_s5 = sld [smem:[#allocation10 + $0x18b]]  ;;  %v2077_v17 = vld [vmem:[#allocation13 + $0xd0] sm:$0xff]  ;;  %3171 = vmatprep.subr.mxu1 %v2110_v20 }
 0x11c   : > { %v770_v42 = vadd.f32 %v769_v10, %v766_v31  ;;  %s4288_s2 = sld [smem:[#allocation10 + $0x20b]]  ;;  %v1041_v10 = vstv %s4264_s21  ;;  %v1038_v31 = vmul.f32 %v1037_v2, %v4102_v26  ;;  %v1045_v35 = vstv %s4268_s22  ;;  %3138 = vmatprep.subr.mxu0 %v2077_v17  ;;  %3172 = vmatpush3.msra.mxu1 %v2094_v28  ;;  %v2072_v17 = vld [vmem:[#allocation13 + $0xa8] sm:$0xff]  ;;  %v2105_v20 = vld [vmem:[#allocation13 + $0x1b0] sm:$0xff] }
 0x11d   : > { %v1019_v48 = vadd.f32 %v1018_v25, %v1015_v38  ;;  %s4291_s16 = sld [smem:[#allocation10 + $0x28b]]  ;;  %3139 = vmatpush3.msra.mxu0 %v2061_v27  ;;  %v1049_v47 = vstv %s4271_s18  ;;  %3173 = vmatprep.subr.mxu1 %v2109_v34  ;;  %v1046_v54 = vmul.f32 %v1045_v35, %v4134_v52  ;;  %v2089_v27 = vld [vmem:[#allocation13 + $0x130] sm:$0xff] }
 0x11e   : > { %v773_v53 = vadd.f32 %v772_v37, %v770_v42  ;;  %v1410_v57 = vstv %s4275_s0  ;;  %s4295_s6 = sld [smem:[#allocation10 + $0x30b]]  ;;  %v1042_v42 = vmul.f32 %v1041_v10, %v4108_v30  ;;  %3140 = vmatprep.subr.mxu0 %v2076_v33  ;;  %3174 = vmatpush3.msra.mxu1 %v2093_v40 }
 0x11f   : > { %v1023_v60 = vadd.f32 %v1022_v39, %v1019_v48  ;;  %v1411_v3 = vmul.f32 %v1410_v57, %v3885_v36  ;;  %v1413_v4 = vstv %s4278_s1  ;;  %s4300_s7 = sld [smem:[#allocation10 + $0x38b]]  ;;  %v2060_v39 = vld [vmem:[#allocation13 + $0x48] sm:$0xff]  ;;  %3175 = vmatprep.subr.mxu1 %v2108_v46 }
 0x120   : > { %v774_v1 = vmax.f32 %v773_v53, 0.0  ;;  %s4303_s25 = sld [smem:[#allocation11 + $0x5]]  ;;  %v1414_v8 = vmul.f32 %v1413_v4, %v3946_v22  ;;  %v1417_v12 = vstv %s4281_s4  ;;  %3141 = vmatpush3.msra.mxu0 %v2060_v39  ;;  %v2091_v4 = vld [vmem:[#allocation13 + $0x140] sm:$0xff]  ;;  %3176 = vmatpush3.msra.mxu1 %v2092_v51 }
 0x121   : > { %v1027_v14 = vadd.f32 %v1026_v49, %v1023_v60  ;;  %v1418_v18 = vmul.f32 %v1417_v12, %v3969_v43  ;;  %v1421_v19 = vstv %s4285_s5  ;;  %s4310_s27 = sld [smem:[#allocation10 + $0x40b]]  ;;  %3142 = vmatprep.subr.mxu0 %v2075_v45  ;;  %v2106_v12 = vld [vmem:[#allocation13 + $0x1b8] sm:$0xff]  ;;  %3177 = vmatprep.subr.mxu1 %v2107_v59 }
 0x122   : > { %776 = vrot.lane.b32.xlu0 %v774_v1, %s3569_s24  ;;  %v1415_v21 = vadd.f32 %v1414_v8, %v1411_v3  ;;  %v1422_v24 = vmul.f32 %v1421_v19, %v3984_v55  ;;  %v1425_v25 = vstv %s4288_s2  ;;  %s4316_s30 = sld [smem:[#allocation10 + $0x48b]]  ;;  %v2058_v3 = vld [vmem:[#allocation13 + $0x38] sm:$0xff]  ;;  %v1050_v1 = vmul.f32 %v1049_v47, %v4144_v61  ;;  %3143 = vmatpush3.msra.mxu0 %v2059_v50  ;;  %v2073_v8 = vld [vmem:[#allocation13 + $0xb0] sm:$0xff] }
 0x123   : > { %v1031_v29 = vadd.f32 %v1030_v62, %v1027_v14  ;;  %v1429_v32 = vstv %s4291_s16  ;;  %s4320_s10 = sld [smem:[#allocation10 + $0x50b]]  ;;  %v1426_v38 = vmul.f32 %v1425_v25, %v3986_v56  ;;  %3144 = vmatprep.subr.mxu0 %v2074_v58  ;;  %v2057_v14 = vld [vmem:[#allocation13 + $0x30] sm:$0xff]  ;;  %3178 = vmatpush3.msra.mxu1 %v2091_v4  ;;  %v2056_v25 = vld [vmem:[#allocation13 + $0x28] sm:$0xff] }
 0x124   : > { %v1419_v37 = vadd.f32 %v1418_v18, %v1415_v21  ;;  %s4324_s28 = sld [smem:[#allocation10 + $0x58b]]  ;;  %v1433_v44 = vstv %s4295_s6  ;;  %v1430_v49 = vmul.f32 %v1429_v32, %v3996_v63  ;;  %3145 = vmatpush3.msra.mxu0 %v2058_v3  ;;  %3179 = vmatprep.subr.mxu1 %v2106_v12  ;;  %v2104_v32 = vld [vmem:[#allocation13 + $0x1a8] sm:$0xff] }
 0x125   : > { %v1035_v41 = vadd.f32 %v1034_v16, %v1031_v29  ;;  %s4328_s3 = sld [smem:[#allocation10 + $0x60b]]  ;;  %v1437_v57 = vstv %s4300_s7  ;;  %v1434_v62 = vmul.f32 %v1433_v44, %v4003_v5  ;;  %v2090_v16 = vld [vmem:[#allocation13 + $0x138] sm:$0xff]  ;;  %3146 = vmatprep.subr.mxu0 %v2073_v8 }
 0x126   : > { %v1423_v48 = vadd.f32 %v1422_v24, %v1419_v37  ;;  %s4332_s12 = sld [smem:[#allocation10 + $0x68b]]  ;;  %v1438_v11 = vmul.f32 %v1437_v57, %v4005_v6  ;;  %v1053_v10 = vstv %s4303_s25  ;;  %3147 = vmatpush3.msra.mxu0 %v2057_v14  ;;  %3180 = vmatpush3.msra.mxu1 %v2090_v16 }
 0x127   : > { %v1039_v53 = vadd.f32 %v1038_v31, %v1035_v41  ;;  %s4336_s11 = sld [smem:[#allocation10 + $0x70b]]  ;;  %v1441_v2 = vstv %s4310_s27  ;;  %v2071_v31 = vld [vmem:[#allocation13 + $0xa0] sm:$0xff]  ;;  %3148 = vmatprep.subr.mxu0 %v2072_v17  ;;  %3181 = vmatprep.subr.mxu1 %v2105_v20 }
 0x128   : > { %v1427_v60 = vadd.f32 %v1426_v38, %v1423_v48  ;;  %s4339_s19 = sld [smem:[#allocation10 + $0x78b]]  ;;  %v1445_v19 = vstv %s4316_s30  ;;  %v1442_v24 = vmul.f32 %v1441_v2, %v4007_v7  ;;  %3149 = vmatpush3.msra.mxu0 %v2056_v25  ;;  %3182 = vmatpush3.msra.mxu1 %v2089_v27 }
 0x129   : > { %v1043_v0 = vadd.f32 %v1042_v42, %v1039_v53  ;;  %s4343_s20 = sld [smem:[#allocation10 + $0x9]]  ;;  %v1449_v29 = vstv %s4320_s10  ;;  %v1446_v34 = vmul.f32 %v1445_v19, %v4083_v15  ;;  %3150 = vmatprep.subr.mxu0 %v2071_v31  ;;  %3183 = vmatprep.subr.mxu1 %v2104_v32  ;;  %v2088_v31 = vld [vmem:[#allocation13 + $0x128] sm:$0xff]  ;;  %v2070_v32 = vld [vmem:[#allocation13 + $0x98] sm:$0xff] }
 0x12a   : > { %v1431_v13 = vadd.f32 %v1430_v49, %v1427_v60  ;;  %s4346_s26 = sld [smem:[#allocation10 + $0x89]]  ;;  %v1453_v37 = vstv %s4324_s28  ;;  %v1450_v40 = vmul.f32 %v1449_v29, %v4091_v9  ;;  %v2055_v29 = vld [vmem:[#allocation13 + $0x20] sm:$0xff]  ;;  %3184 = vmatpush3.msra.mxu1 %v2088_v31 }
 0x12b   : > { %v1047_v18 = vadd.f32 %v1046_v54, %v1043_v0  ;;  %s4349_s15 = sld [smem:[#allocation10 + $0x109]]  ;;  %v1457_v45 = vstv %s4328_s3  ;;  %v1454_v49 = vmul.f32 %v1453_v37, %v4097_v23  ;;  %3151 = vmatpush3.msra.mxu0 %v2055_v29  ;;  %v2103_v37 = vld [vmem:[#allocation13 + $0x1a0] sm:$0xff] }
 0x12c   : > { %v1435_v21 = vadd.f32 %v1434_v62, %v1431_v13  ;;  %s4353_s14 = sld [smem:[#allocation10 + $0x189]]  ;;  %v1461_v53 = vstv %s4332_s12  ;;  %v1458_v60 = vmul.f32 %v1457_v45, %v4102_v26  ;;  %3152 = vmatprep.subr.mxu0 %v2070_v32  ;;  %3185 = vmatprep.subr.mxu1 %v2103_v37 }
 0x12d   : > { %v1051_v28 = vadd.f32 %v1050_v1, %v1047_v18  ;;  %s4356_s29 = sld [smem:[#allocation10 + $0x209]]  ;;  %v1465_v3 = vstv %s4336_s11  ;;  %v1462_v2 = vmul.f32 %v1461_v53, %v4108_v30 }
 0x12e   : > { %v1439_v33 = vadd.f32 %v1438_v11, %v1435_v21  ;;  %s4359_s17 = sld [smem:[#allocation10 + $0x289]]  ;;  %v1469_v12 = vstv %s4339_s19  ;;  %v1466_v16 = vmul.f32 %v1465_v3, %v4134_v52 }
 0x12f   : > { %v1054_v35 = vadd.f32 %v1053_v10, %v1051_v28  ;;  %v1270_v38 = vstv %s4343_s20  ;;  %s4363_s23 = sld [smem:[#allocation10 + $0x309]]  ;;  %v1470_v10 = vmul.f32 %v1469_v12, %v4144_v61 }
 0x130   : > { %v1443_v39 = vadd.f32 %v1442_v24, %v1439_v33  ;;  %v1271_v41 = vmul.f32 %v1270_v38, %v3885_v36  ;;  %v1273_v42 = vstv %s4346_s26  ;;  %s4368_s9 = sld [smem:[#allocation10 + $0x389]] }
 0x131   : > { %v1055_v44 = vmax.f32 %v1054_v35, 0.0  ;;  %s4371_s13 = sld [smem:[#allocation11 + $0xb]]  ;;  %v1274_v46 = vmul.f32 %v1273_v42, %v3946_v22  ;;  %v1277_v47 = vstv %s4349_s15 }
 0x132   : > { %v1447_v48 = vadd.f32 %v1446_v34, %v1443_v39  ;;  %v1278_v50 = vmul.f32 %v1277_v47, %v3969_v43  ;;  %v1281_v51 = vstv %s4353_s14  ;;  %s4378_s8 = sld [smem:[#allocation10 + $0x409]] }
 0x133   : > { %1057 = vrot.lane.b32.xlu1 %v1055_v44, %s3569_s24  ;;  %v1275_v54 = vadd.f32 %v1274_v46, %v1271_v41  ;;  %v1282_v57 = vmul.f32 %v1281_v51, %v3984_v55  ;;  %v1285_v58 = vstv %s4356_s29  ;;  %s4384_s21 = sld [smem:[#allocation10 + $0x489]] }
 0x134   : > { %v1451_v59 = vadd.f32 %v1450_v40, %v1447_v48  ;;  %v1289_v62 = vstv %s4359_s17  ;;  %s4388_s22 = sld [smem:[#allocation10 + $0x509]]  ;;  %v1286_v0 = vmul.f32 %v1285_v58, %v3986_v56 }
 0x135   : > { %v1279_v4 = vadd.f32 %v1278_v50, %v1275_v54  ;;  %s4392_s18 = sld [smem:[#allocation10 + $0x589]]  ;;  %v1293_v8 = vstv %s4363_s23  ;;  %v1290_v11 = vmul.f32 %v1289_v62, %v3996_v63 }
 0x136   : > { %v1455_v1 = vadd.f32 %v1454_v49, %v1451_v59  ;;  %s4396_s0 = sld [smem:[#allocation10 + $0x609]]  ;;  %v1297_v18 = vstv %s4368_s9  ;;  %v1294_v17 = vmul.f32 %v1293_v8, %v4003_v5 }
 0x137   : > { %v1283_v13 = vadd.f32 %v1282_v57, %v1279_v4  ;;  %s4400_s1 = sld [smem:[#allocation10 + $0x689]]  ;;  %v1298_v25 = vmul.f32 %v1297_v18, %v4005_v6  ;;  %v1473_v33 = vstv %s4371_s13 }
 0x138   : > { %v1459_v14 = vadd.f32 %v1458_v60, %v1455_v1  ;;  %s4404_s4 = sld [smem:[#allocation10 + $0x709]]  ;;  %v1301_v21 = vstv %s4378_s8 }
 0x139   : > { %v1287_v19 = vadd.f32 %v1286_v0, %v1283_v13  ;;  %s4407_s5 = sld [smem:[#allocation10 + $0x789]]  ;;  %v1305_v28 = vstv %s4384_s21  ;;  %v1302_v35 = vmul.f32 %v1301_v21, %v4007_v7 }
 0x13a   : > { %v1463_v20 = vadd.f32 %v1462_v2, %v1459_v14  ;;  %s4411_s2 = sld [smem:[#allocation10 + $0xf]]  ;;  %v1309_v39 = vstv %s4388_s22  ;;  %v1306_v41 = vmul.f32 %v1305_v28, %v4083_v15 }
 0x13b   : > { %v1291_v24 = vadd.f32 %v1290_v11, %v1287_v19  ;;  %s4414_s16 = sld [smem:[#allocation10 + $0x8f]]  ;;  %v1313_v44 = vstv %s4392_s18  ;;  %v1310_v47 = vmul.f32 %v1309_v39, %v4091_v9  ;;  %v2069_v39 = vld [vmem:[#allocation13 + $0x90] sm:$0xff] }
 0x13c   : > { %v1467_v27 = vadd.f32 %v1466_v16, %v1463_v20  ;;  %s4417_s6 = sld [smem:[#allocation10 + $0x10f]]  ;;  %v1317_v51 = vstv %s4396_s0  ;;  %v1314_v58 = vmul.f32 %v1313_v44, %v4097_v23 }
 0x13d   : > { %v1295_v34 = vadd.f32 %v1294_v17, %v1291_v24  ;;  %s4421_s7 = sld [smem:[#allocation10 + $0x18f]]  ;;  %v1321_v62 = vstv %s4400_s1  ;;  %v1318_v2 = vmul.f32 %v1317_v51, %v4102_v26 }
 0x13e   : > { %v1471_v38 = vadd.f32 %v1470_v10, %v1467_v27  ;;  %s4424_s25 = sld [smem:[#allocation10 + $0x20f]]  ;;  %v1325_v12 = vstv %s4404_s4  ;;  %v1322_v16 = vmul.f32 %v1321_v62, %v4108_v30 }
 0x13f   : > { %v1299_v40 = vadd.f32 %v1298_v25, %v1295_v34  ;;  %s4427_s27 = sld [smem:[#allocation10 + $0x28f]]  ;;  %v1329_v19 = vstv %s4407_s5  ;;  %v1326_v21 = vmul.f32 %v1325_v12, %v4134_v52  ;;  %v2054_v34 = vld [vmem:[#allocation13 + $0x18] sm:$0xff] }
 0x140   : > { %v1474_v42 = vadd.f32 %v1473_v33, %v1471_v38  ;;  %v1690_v45 = vstv %s4411_s2  ;;  %s4431_s30 = sld [smem:[#allocation10 + $0x30f]]  ;;  %v1330_v29 = vmul.f32 %v1329_v19, %v4144_v61  ;;  %3153 = vmatpush3.msra.mxu0 %v2054_v34 }
 0x141   : > { %v1303_v46 = vadd.f32 %v1302_v35, %v1299_v40  ;;  %v1691_v48 = vmul.f32 %v1690_v45, %v3885_v36  ;;  %v1693_v49 = vstv %s4414_s16  ;;  %s4436_s10 = sld [smem:[#allocation10 + $0x38f]]  ;;  %v2087_v35 = vld [vmem:[#allocation13 + $0x120] sm:$0xff]  ;;  %v2102_v40 = vld [vmem:[#allocation13 + $0x198] sm:$0xff]  ;;  %3154 = vmatprep.subr.mxu0 %v2069_v39 }
 0x142   : > { %v1475_v50 = vmax.f32 %v1474_v42, 0.0  ;;  %s4439_s28 = sld [smem:[#allocation11 + $0x9]]  ;;  %v1694_v53 = vmul.f32 %v1693_v49, %v3946_v22  ;;  %v1697_v54 = vstv %s4417_s6  ;;  %3186 = vmatpush3.msra.mxu1 %v2087_v35 }
 0x143   : > { %v1307_v57 = vadd.f32 %v1306_v41, %v1303_v46  ;;  %v1698_v59 = vmul.f32 %v1697_v54, %v3969_v43  ;;  %v1701_v60 = vstv %s4421_s7  ;;  %s4446_s3 = sld [smem:[#allocation10 + $0x40f]]  ;;  %3187 = vmatprep.subr.mxu1 %v2102_v40 }
 0x144   : > { %1477 = vrot.lane.b32.xlu0 %v1475_v50, %s3569_s24  ;;  %v1695_v3 = vadd.f32 %v1694_v53, %v1691_v48  ;;  %v1702_v4 = vmul.f32 %v1701_v60, %v3984_v55  ;;  %v1705_v0 = vstv %s4424_s25  ;;  %s4452_s12 = sld [smem:[#allocation10 + $0x48f]] }
 0x145   : > { %v1311_v1 = vadd.f32 %v1310_v47, %v1307_v57  ;;  %v1709_v8 = vstv %s4427_s27  ;;  %s4456_s11 = sld [smem:[#allocation10 + $0x50f]]  ;;  %v1706_v11 = vmul.f32 %v1705_v0, %v3986_v56 }
 0x146   : > { %v1699_v13 = vadd.f32 %v1698_v59, %v1695_v3  ;;  %s4460_s19 = sld [smem:[#allocation10 + $0x58f]]  ;;  %v1713_v18 = vstv %s4431_s30  ;;  %v1710_v20 = vmul.f32 %v1709_v8, %v3996_v63 }
 0x147   : > { %v1315_v14 = vadd.f32 %v1314_v58, %v1311_v1  ;;  %s4464_s20 = sld [smem:[#allocation10 + $0x60f]]  ;;  %v1717_v24 = vstv %s4436_s10  ;;  %v1714_v27 = vmul.f32 %v1713_v18, %v4003_v5 }
 0x148   : > { %v1703_v17 = vadd.f32 %v1702_v4, %v1699_v13  ;;  %s4468_s26 = sld [smem:[#allocation10 + $0x68f]]  ;;  %v1718_v33 = vmul.f32 %v1717_v24, %v4005_v6  ;;  %v1333_v41 = vstv %s4439_s28 }
 0x149   : > { %v1319_v10 = vadd.f32 %v1318_v2, %v1315_v14  ;;  %s4472_s15 = sld [smem:[#allocation10 + $0x70f]]  ;;  %v1721_v31 = vstv %s4446_s3 }
 0x14a   : > { %v1707_v25 = vadd.f32 %v1706_v11, %v1703_v17  ;;  %s4475_s14 = sld [smem:[#allocation10 + $0x78f]]  ;;  %v1725_v38 = vstv %s4452_s12  ;;  %v1722_v44 = vmul.f32 %v1721_v31, %v4007_v7 }
 0x14b   : > { %v1323_v28 = vadd.f32 %v1322_v16, %v1319_v10  ;;  %s4479_s29 = sld [smem:[#allocation10 + $0xd]]  ;;  %v1729_v46 = vstv %s4456_s11  ;;  %v1726_v48 = vmul.f32 %v1725_v38, %v4083_v15 }
 0x14c   : > { %v1711_v32 = vadd.f32 %v1710_v20, %v1707_v25  ;;  %s4482_s17 = sld [smem:[#allocation10 + $0x8d]]  ;;  %v1733_v50 = vstv %s4460_s19  ;;  %v1730_v54 = vmul.f32 %v1729_v46, %v4091_v9  ;;  %v2068_v46 = vld [vmem:[#allocation13 + $0x88] sm:$0xff] }
 0x14d   : > { %v1327_v37 = vadd.f32 %v1326_v21, %v1323_v28  ;;  %s4485_s23 = sld [smem:[#allocation10 + $0x10d]]  ;;  %v1737_v60 = vstv %s4464_s20  ;;  %v1734_v0 = vmul.f32 %v1733_v50, %v4097_v23 }
 0x14e   : > { %v1715_v42 = vadd.f32 %v1714_v27, %v1711_v32  ;;  %s4489_s9 = sld [smem:[#allocation10 + $0x18d]]  ;;  %v1741_v8 = vstv %s4468_s26  ;;  %v1738_v16 = vmul.f32 %v1737_v60, %v4102_v26  ;;  %v2051_v60 = vld [vmem:[#allocation13] sm:$0xff] }
 0x14f   : > { %v1331_v45 = vadd.f32 %v1330_v29, %v1327_v37  ;;  %s4492_s13 = sld [smem:[#allocation10 + $0x20d]]  ;;  %v1745_v19 = vstv %s4472_s15  ;;  %v1742_v21 = vmul.f32 %v1741_v8, %v4108_v30 }
 0x150   : > { %v1719_v47 = vadd.f32 %v1718_v33, %v1715_v42  ;;  %s4495_s8 = sld [smem:[#allocation10 + $0x28d]]  ;;  %v1749_v25 = vstv %s4475_s14  ;;  %v1746_v31 = vmul.f32 %v1745_v19, %v4134_v52  ;;  %v2086_v42 = vld [vmem:[#allocation13 + $0x118] sm:$0xff] }
 0x151   : > { %v1334_v49 = vadd.f32 %v1333_v41, %v1331_v45  ;;  %v1550_v51 = vstv %s4479_s29  ;;  %s4499_s21 = sld [smem:[#allocation10 + $0x30d]]  ;;  %v1750_v37 = vmul.f32 %v1749_v25, %v4144_v61  ;;  %v2053_v41 = vld [vmem:[#allocation13 + $0x10] sm:$0xff]  ;;  %3188 = vmatpush3.msra.mxu1 %v2086_v42 }
 0x152   : > { %v1723_v53 = vadd.f32 %v1722_v44, %v1719_v47  ;;  %v1551_v57 = vmul.f32 %v1550_v51, %v3885_v36  ;;  %v1553_v58 = vstv %s4482_s17  ;;  %s4504_s22 = sld [smem:[#allocation10 + $0x38d]]  ;;  %3155 = vmatpush3.msra.mxu0 %v2053_v41  ;;  %v2101_v47 = vld [vmem:[#allocation13 + $0x190] sm:$0xff] }
 0x153   : > { %v1335_v59 = vmax.f32 %v1334_v49, 0.0  ;;  %s4507_s18 = sld [smem:[#allocation11 + $0xf]]  ;;  %v1554_v62 = vmul.f32 %v1553_v58, %v3946_v22  ;;  %v1557_v3 = vstv %s4485_s23  ;;  %3156 = vmatprep.subr.mxu0 %v2068_v46  ;;  %3189 = vmatprep.subr.mxu1 %v2101_v47 }
 0x154   : > { %v1727_v4 = vadd.f32 %v1726_v48, %v1723_v53  ;;  %v1558_v1 = vmul.f32 %v1557_v3, %v3969_v43  ;;  %v1561_v2 = vstv %s4489_s9  ;;  %s4514_s0 = sld [smem:[#allocation10 + $0x40d]]  ;;  %v2052_v48 = vld [vmem:[#allocation13 + $0x8] sm:$0xff]  ;;  %v2085_v53 = vld [vmem:[#allocation13 + $0x110] sm:$0xff]  ;;  %v2099_v3 = vld [vmem:[#allocation13 + $0x180] sm:$0xff] }
 0x155   : > { %1337 = vrot.lane.b32.xlu1 %v1335_v59, %s3569_s24  ;;  %v1555_v12 = vadd.f32 %v1554_v62, %v1551_v57  ;;  %v1562_v13 = vmul.f32 %v1561_v2, %v3984_v55  ;;  %v1565_v11 = vstv %s4492_s13  ;;  %s4520_s1 = sld [smem:[#allocation10 + $0x48d]]  ;;  %v2100_v57 = vld [vmem:[#allocation13 + $0x188] sm:$0xff]  ;;  %3157 = vmatpush3.msra.mxu0 %v2052_v48  ;;  %v2083_v2 = vld [vmem:[#allocation13 + $0x100] sm:$0xff] }
 0x156   : > { %v1731_v14 = vadd.f32 %v1730_v54, %v1727_v4  ;;  %v1569_v18 = vstv %s4495_s8  ;;  %s4524_s4 = sld [smem:[#allocation10 + $0x50d]]  ;;  %v1566_v20 = vmul.f32 %v1565_v11, %v3986_v56  ;;  %v2067_v54 = vld [vmem:[#allocation13 + $0x80] sm:$0xff]  ;;  %3190 = vmatpush3.msra.mxu1 %v2085_v53  ;;  %v2084_v62 = vld [vmem:[#allocation13 + $0x108] sm:$0xff]  ;;  %v2178_v11 = vld [vmem:[#allocation13 + $0x3f8] sm:$0xff] }
 0x157   : > { %v1559_v17 = vadd.f32 %v1558_v1, %v1555_v12  ;;  %s4528_s5 = sld [smem:[#allocation10 + $0x58d]]  ;;  %v1573_v24 = vstv %s4499_s21  ;;  %v1570_v28 = vmul.f32 %v1569_v18, %v3996_v63  ;;  %3158 = vmatprep.subr.mxu0 %v2067_v54  ;;  %3191 = vmatprep.subr.mxu1 %v2100_v57  ;;  %v2146_v1 = vld [vmem:[#allocation13 + $0x2f8] sm:$0xff] }
 0x158   : > { %v1735_v10 = vadd.f32 %v1734_v0, %v1731_v14  ;;  %s4532_s2 = sld [smem:[#allocation10 + $0x60d]]  ;;  %v1577_v32 = vstv %s4504_s22  ;;  %v1574_v34 = vmul.f32 %v1573_v24, %v4003_v5  ;;  %3159 = vmatpush3.msra.mxu0 %v2051_v60  ;;  %3192 = vmatpush3.msra.mxu1 %v2084_v62 }
 0x159   : > { %v1563_v27 = vadd.f32 %v1562_v13, %v1559_v17  ;;  %s4536_s16 = sld [smem:[#allocation10 + $0x68d]]  ;;  %v1578_v40 = vmul.f32 %v1577_v32, %v4005_v6  ;;  %v1753_v49 = vstv %s4507_s18  ;;  %3193 = vmatprep.subr.mxu1 %v2099_v3  ;;  %3198 = vmatprep.subr.mxu0 %v2146_v1 }
 0x15a   : > { %v1739_v29 = vadd.f32 %v1738_v16, %v1735_v10  ;;  %s4540_s6 = sld [smem:[#allocation10 + $0x70d]]  ;;  %v1581_v38 = vstv %s4514_s0  ;;  %3194 = vmatpush3.msra.mxu1 %v2083_v2 }
 0x15b   : > { %v1567_v33 = vadd.f32 %v1566_v20, %v1563_v27  ;;  %s4543_s7 = sld [smem:[#allocation10 + $0x78d]]  ;;  %v1585_v45 = vstv %s4520_s1  ;;  %v1582_v51 = vmul.f32 %v1581_v38, %v4007_v7  ;;  %3233 = vmatprep.subr.mxu1 %v2178_v11 }
 0x15c   : > { %v1743_v35 = vadd.f32 %v1742_v21, %v1739_v29  ;;  %s4547_s25 = sld [smem:[#allocation10 + $0x13]]  ;;  %v1589_v59 = vstv %s4524_s4  ;;  %v1586_v0 = vmul.f32 %v1585_v45, %v4083_v15 }
 0x15d   : > { %v1571_v39 = vadd.f32 %v1570_v28, %v1567_v33  ;;  %s4550_s27 = sld [smem:[#allocation10 + $0x93]]  ;;  %v1593_v12 = vstv %s4528_s5  ;;  %v1590_v16 = vmul.f32 %v1589_v59, %v4091_v9 }
 0x15e   : > { %v1747_v44 = vadd.f32 %v1746_v31, %v1743_v35  ;;  %s4553_s30 = sld [smem:[#allocation10 + $0x113]]  ;;  %v1597_v20 = vstv %s4532_s2  ;;  %v1594_v25 = vmul.f32 %v1593_v12, %v4097_v23 }
 0x15f   : > { %v1575_v50 = vadd.f32 %v1574_v34, %v1571_v39  ;;  %s4557_s10 = sld [smem:[#allocation10 + $0x193]]  ;;  %v1601_v29 = vstv %s4536_s16  ;;  %v1598_v35 = vmul.f32 %v1597_v20, %v4102_v26 }
 0x160   : > { %v1751_v58 = vadd.f32 %v1750_v37, %v1747_v44  ;;  %s4560_s28 = sld [smem:[#allocation10 + $0x213]]  ;;  %v1605_v38 = vstv %s4540_s6  ;;  %v1602_v42 = vmul.f32 %v1601_v29, %v4108_v30 }
 0x161   : > { %v1579_v4 = vadd.f32 %v1578_v40, %v1575_v50  ;;  %s4563_s3 = sld [smem:[#allocation10 + $0x293]]  ;;  %v1609_v45 = vstv %s4543_s7 }
 0x162   : > { %v1754_v8 = vadd.f32 %v1753_v49, %v1751_v58  ;;  %v1970_v13 = vstv %s4547_s25  ;;  %s4567_s12 = sld [smem:[#allocation10 + $0x313]]  ;;  %v1606_v49 = vmul.f32 %v1605_v38, %v4134_v52  ;;  %v1610_v57 = vmul.f32 %v1609_v45, %v4144_v61 }
 0x163   : > { %v1583_v14 = vadd.f32 %v1582_v51, %v1579_v4  ;;  %v1971_v18 = vmul.f32 %v1970_v13, %v3885_v36  ;;  %v1973_v19 = vstv %s4550_s27  ;;  %s4572_s11 = sld [smem:[#allocation10 + $0x393]] }
 0x164   : > { %v1755_v17 = vmax.f32 %v1754_v8, 0.0  ;;  %s4575_s19 = sld [smem:[#allocation11 + $0xd]]  ;;  %v1974_v10 = vmul.f32 %v1973_v19, %v3946_v22  ;;  %v1977_v21 = vstv %s4553_s30 }
 0x165   : > { %v1587_v24 = vadd.f32 %v1586_v0, %v1583_v14  ;;  %v1978_v27 = vmul.f32 %v1977_v21, %v3969_v43  ;;  %v1981_v28 = vstv %s4557_s10  ;;  %s4582_s20 = sld [smem:[#allocation10 + $0x413]] }
 0x166   : > { %1757 = vrot.lane.b32.xlu0 %v1755_v17, %s3569_s24  ;;  %v1975_v31 = vadd.f32 %v1974_v10, %v1971_v18  ;;  %v1982_v32 = vmul.f32 %v1981_v28, %v3984_v55  ;;  %v1985_v33 = vstv %s4560_s28  ;;  %s4588_s26 = sld [smem:[#allocation10 + $0x493]] }
 0x167   : > { %v1591_v34 = vadd.f32 %v1590_v16, %v1587_v24  ;;  %v1989_v37 = vstv %s4563_s3  ;;  %s4592_s15 = sld [smem:[#allocation10 + $0x513]]  ;;  %v1986_v40 = vmul.f32 %v1985_v33, %v3986_v56 }
 0x168   : > { %v1979_v39 = vadd.f32 %v1978_v27, %v1975_v31  ;;  %s4596_s14 = sld [smem:[#allocation10 + $0x593]]  ;;  %v1993_v44 = vstv %s4567_s12  ;;  %v1990_v47 = vmul.f32 %v1989_v37, %v3996_v63 }
 0x169   : > { %v1595_v41 = vadd.f32 %v1594_v25, %v1591_v34  ;;  %s4600_s29 = sld [smem:[#allocation10 + $0x613]]  ;;  %v1997_v50 = vstv %s4572_s11  ;;  %v1994_v53 = vmul.f32 %v1993_v44, %v4003_v5 }
 0x16a   : > { %v1983_v46 = vadd.f32 %v1982_v32, %v1979_v39  ;;  %s4604_s17 = sld [smem:[#allocation10 + $0x693]]  ;;  %v1998_v60 = vmul.f32 %v1997_v50, %v4005_v6  ;;  %v1613_v4 = vstv %s4575_s19 }
 0x16b   : > { %v1599_v48 = vadd.f32 %v1598_v35, %v1595_v41  ;;  %s4608_s23 = sld [smem:[#allocation10 + $0x713]]  ;;  %v2001_v58 = vstv %s4582_s20 }
 0x16c   : > { %v1987_v51 = vadd.f32 %v1986_v40, %v1983_v46  ;;  %s4611_s9 = sld [smem:[#allocation10 + $0x793]]  ;;  %v2005_v3 = vstv %s4588_s26  ;;  %v2002_v1 = vmul.f32 %v2001_v58, %v4007_v7 }
 0x16d   : > { %v1603_v54 = vadd.f32 %v1602_v42, %v1599_v48  ;;  %s3072_s13 = sld [smem:[#allocation10 + $0x11]]  ;;  %v2009_v8 = vstv %s4592_s15  ;;  %v2006_v13 = vmul.f32 %v2005_v3, %v4083_v15 }
 0x16e   : > { %v1991_v59 = vadd.f32 %v1990_v47, %v1987_v51  ;;  %s3073_s8 = sld [smem:[#allocation10 + $0x91]]  ;;  %v2013_v14 = vstv %s4596_s14  ;;  %v2010_v19 = vmul.f32 %v2009_v8, %v4091_v9 }
 0x16f   : > { %v1607_v62 = vadd.f32 %v1606_v49, %v1603_v54  ;;  %s3074_s21 = sld [smem:[#allocation10 + $0x111]]  ;;  %v2017_v21 = vstv %s4600_s29  ;;  %v2014_v28 = vmul.f32 %v2013_v14, %v4097_v23 }
 0x170   : > { %v1995_v0 = vadd.f32 %v1994_v53, %v1991_v59  ;;  %s3075_s22 = sld [smem:[#allocation10 + $0x191]]  ;;  %v2021_v32 = vstv %s4604_s17  ;;  %v2018_v38 = vmul.f32 %v2017_v21, %v4102_v26 }
 0x171   : > { %v1611_v2 = vadd.f32 %v1610_v57, %v1607_v62  ;;  %s4620_s18 = sld [smem:[#allocation10 + $0x211]]  ;;  %v2025_v40 = vstv %s4608_s23  ;;  %v2022_v45 = vmul.f32 %v2021_v32, %v4108_v30 }
 0x172   : > { %v1999_v12 = vadd.f32 %v1998_v60, %v1995_v0  ;;  %s4623_s0 = sld [smem:[#allocation10 + $0x291]]  ;;  %v2029_v47 = vstv %s4611_s9  ;;  %v2026_v51 = vmul.f32 %v2025_v40, %v4134_v52 }
 0x173   : > { %v1614_v11 = vadd.f32 %v1613_v4, %v1611_v2  ;;  %v1830_v16 = vstv %s3072_s13  ;;  %s4626_s1 = sld [smem:[#allocation10 + $0x311]]  ;;  %v2030_v59 = vmul.f32 %v2029_v47, %v4144_v61 }
 0x174   : > { %v2003_v18 = vadd.f32 %v2002_v1, %v1999_v12  ;;  %v1831_v17 = vmul.f32 %v1830_v16, %v3885_v36  ;;  %v1833_v20 = vstv %s3073_s8  ;;  %s4630_s4 = sld [smem:[#allocation10 + $0x391]] }
 0x175   : > { %v1615_v10 = vmax.f32 %v1614_v11, 0.0  ;;  %s4633_s5 = sld [smem:[#allocation11 + $0x13]]  ;;  %v1834_v24 = vmul.f32 %v1833_v20, %v3946_v22  ;;  %v1837_v25 = vstv %s3074_s21 }
 0x176   : > { %v2007_v27 = vadd.f32 %v2006_v13, %v2003_v18  ;;  %v1838_v29 = vmul.f32 %v1837_v25, %v3969_v43  ;;  %v1841_v31 = vstv %s3075_s22  ;;  %s4638_s2 = sld [smem:[#allocation10 + $0x411]] }
 0x177   : > { %1617 = vrot.lane.b32.xlu1 %v1615_v10, %s3569_s24  ;;  %v1835_v33 = vadd.f32 %v1834_v24, %v1831_v17  ;;  %v1842_v34 = vmul.f32 %v1841_v31, %v3984_v55  ;;  %v1845_v35 = vstv %s4620_s18  ;;  %s4644_s16 = sld [smem:[#allocation10 + $0x491]] }
 0x178   : > { %v2011_v37 = vadd.f32 %v2010_v19, %v2007_v27  ;;  %v1849_v39 = vstv %s4623_s0  ;;  %s4648_s6 = sld [smem:[#allocation10 + $0x511]]  ;;  %v1846_v42 = vmul.f32 %v1845_v35, %v3986_v56 }
 0x179   : > { %v1839_v41 = vadd.f32 %v1838_v29, %v1835_v33  ;;  %s4652_s7 = sld [smem:[#allocation10 + $0x591]]  ;;  %v1853_v46 = vstv %s4626_s1  ;;  %v1850_v49 = vmul.f32 %v1849_v39, %v3996_v63 }
 0x17a   : > { %v2015_v44 = vadd.f32 %v2014_v28, %v2011_v37  ;;  %s4656_s25 = sld [smem:[#allocation10 + $0x611]]  ;;  %v1857_v53 = vstv %s4630_s4  ;;  %v1854_v57 = vmul.f32 %v1853_v46, %v4003_v5 }
 0x17b   : > { %v1843_v48 = vadd.f32 %v1842_v34, %v1839_v41  ;;  %s4660_s27 = sld [smem:[#allocation10 + $0x691]]  ;;  %v1858_v3 = vmul.f32 %v1857_v53, %v4005_v6  ;;  %v2033_v1 = vstv %s4633_s5 }
 0x17c   : > { %v2019_v50 = vadd.f32 %v2018_v38, %v2015_v44  ;;  %s4664_s30 = sld [smem:[#allocation10 + $0x711]]  ;;  %v1861_v60 = vstv %s4638_s2 }
 0x17d   : > { %v1847_v54 = vadd.f32 %v1846_v42, %v1843_v48  ;;  %s4667_s10 = sld [smem:[#allocation10 + $0x791]]  ;;  %v1865_v0 = vstv %s4644_s16  ;;  %v1862_v8 = vmul.f32 %v1861_v60, %v4007_v7 }
 0x17e   : > { %v2023_v58 = vadd.f32 %v2022_v45, %v2019_v50  ;;  %s2817_s28 = sld [smem:[#allocation10 + $0x2]]  ;;  %v1869_v13 = vstv %s4648_s6  ;;  %v1866_v14 = vmul.f32 %v1865_v0, %v4083_v15 }
 0x17f   : > { %v1851_v62 = vadd.f32 %v1850_v49, %v1847_v54  ;;  %s2818_s3 = sld [smem:[#allocation10 + $0x82]]  ;;  %v1873_v18 = vstv %s4652_s7  ;;  %v1870_v20 = vmul.f32 %v1869_v13, %v4091_v9 }
 0x180   : > { %v2027_v4 = vadd.f32 %v2026_v51, %v2023_v58  ;;  %s2819_s12 = sld [smem:[#allocation10 + $0x102]]  ;;  %v1877_v25 = vstv %s4656_s25  ;;  %v1874_v31 = vmul.f32 %v1873_v18, %v4097_v23 }
 0x181   : > { %v1855_v2 = vadd.f32 %v1854_v57, %v1851_v62  ;;  %s2820_s11 = sld [smem:[#allocation10 + $0x182]]  ;;  %v1881_v34 = vstv %s4660_s27  ;;  %v1878_v40 = vmul.f32 %v1877_v25, %v4102_v26 }
 0x182   : > { %v2031_v12 = vadd.f32 %v2030_v59, %v2027_v4  ;;  %s4676_s19 = sld [smem:[#allocation10 + $0x202]]  ;;  %v1885_v42 = vstv %s4664_s30  ;;  %v1882_v47 = vmul.f32 %v1881_v34, %v4108_v30 }
 0x183   : > { %v1859_v11 = vadd.f32 %v1858_v3, %v1855_v2  ;;  %s4679_s20 = sld [smem:[#allocation10 + $0x282]]  ;;  %v1889_v49 = vstv %s4667_s10  ;;  %v1886_v54 = vmul.f32 %v1885_v42, %v4134_v52 }
 0x184   : > { %v2034_v16 = vadd.f32 %v2033_v1, %v2031_v12  ;;  %v782_v19 = vstv %s2817_s28  ;;  %s4682_s26 = sld [smem:[#allocation10 + $0x302]]  ;;  %v1890_v62 = vmul.f32 %v1889_v49, %v4144_v61 }
 0x185   : > { %v1863_v17 = vadd.f32 %v1862_v8, %v1859_v11  ;;  %v785_v10 = vstv %s2818_s3  ;;  %s4685_s15 = sld [smem:[#allocation10 + $0x382]]  ;;  %v783_v21 = vmul.f32 %v782_v19, %v3885_v36 }
 0x186   : > { %v2035_v24 = vmax.f32 %v2034_v16, 0.0  ;;  %s4689_s14 = sld [smem:[#allocation11 + $0x11]]  ;;  %v786_v27 = vmul.f32 %v785_v10, %v3946_v22  ;;  %v789_v28 = vstv %s2819_s12 }
 0x187   : > { %v1867_v29 = vadd.f32 %v1866_v14, %v1863_v17  ;;  %v790_v32 = vmul.f32 %v789_v28, %v3969_v43  ;;  %v793_v33 = vstv %s2820_s11  ;;  %s4694_s29 = sld [smem:[#allocation10 + $0x402]] }
 0x188   : > { %2037 = vrot.lane.b32.xlu0 %v2035_v24, %s3569_s24  ;;  %v794_v35 = vmul.f32 %v793_v33, %v3984_v55  ;;  %v797_v37 = vstv %s4676_s19  ;;  %s4700_s17 = sld [smem:[#allocation10 + $0x482]]  ;;  %v787_v38 = vadd.f32 %v786_v27, %v783_v21 }
 0x189   : > { %v1871_v39 = vadd.f32 %v1870_v20, %v1867_v29  ;;  %v801_v41 = vstv %s4679_s20  ;;  %s4704_s23 = sld [smem:[#allocation10 + $0x502]]  ;;  %v798_v44 = vmul.f32 %v797_v37, %v3986_v56 }
 0x18a   : > { %s4708_s9 = sld [smem:[#allocation10 + $0x582]]  ;;  %v791_v45 = vadd.f32 %v790_v32, %v787_v38  ;;  %v805_v48 = vstv %s4682_s26  ;;  %v802_v50 = vmul.f32 %v801_v41, %v3996_v63 }
 0x18b   : > { %v1875_v46 = vadd.f32 %v1874_v31, %v1871_v39  ;;  %s4712_s13 = sld [smem:[#allocation10 + $0x602]]  ;;  %v809_v57 = vstv %s4685_s15  ;;  %v806_v58 = vmul.f32 %v805_v48, %v4003_v5 }
 0x18c   : > { %s4716_s8 = sld [smem:[#allocation10 + $0x682]]  ;;  %v795_v51 = vadd.f32 %v794_v35, %v791_v45  ;;  %v810_v4 = vmul.f32 %v809_v57, %v4005_v6  ;;  %v1893_v8 = vstv %s4689_s14 }
 0x18d   : > { %v1879_v53 = vadd.f32 %v1878_v40, %v1875_v46  ;;  %s4720_s21 = sld [smem:[#allocation10 + $0x702]]  ;;  %v813_v3 = vstv %s4694_s29 }
 0x18e   : > { %s4723_s22 = sld [smem:[#allocation10 + $0x782]]  ;;  %v799_v59 = vadd.f32 %v798_v44, %v795_v51  ;;  %v817_v2 = vstv %s4700_s17  ;;  %v814_v12 = vmul.f32 %v813_v3, %v4007_v7 }
 0x18f   : > { %v1883_v60 = vadd.f32 %v1882_v47, %v1879_v53  ;;  %s2885_s18 = sld [smem:[#allocation10 + $0x6]]  ;;  %v821_v14 = vstv %s4704_s23  ;;  %v818_v16 = vmul.f32 %v817_v2, %v4083_v15 }
 0x190   : > { %v803_v0 = vadd.f32 %v802_v50, %v799_v59  ;;  %s2886_s0 = sld [smem:[#allocation10 + $0x86]]  ;;  %v825_v17 = vstv %s4708_s9  ;;  %v822_v10 = vmul.f32 %v821_v14, %v4091_v9 }
 0x191   : > { %v1887_v1 = vadd.f32 %v1886_v54, %v1883_v60  ;;  %s2887_s1 = sld [smem:[#allocation10 + $0x106]]  ;;  %v829_v28 = vstv %s4712_s13  ;;  %v826_v32 = vmul.f32 %v825_v17, %v4097_v23 }
 0x192   : > { %v807_v13 = vadd.f32 %v806_v58, %v803_v0  ;;  %s2888_s4 = sld [smem:[#allocation10 + $0x186]]  ;;  %v833_v37 = vstv %s4716_s8  ;;  %v830_v41 = vmul.f32 %v829_v28, %v4102_v26 }
 0x193   : > { %v1891_v11 = vadd.f32 %v1890_v62, %v1887_v1  ;;  %s4732_s5 = sld [smem:[#allocation10 + $0x206]]  ;;  %v837_v45 = vstv %s4720_s21  ;;  %v834_v48 = vmul.f32 %v833_v37, %v4108_v30 }
 0x194   : > { %v811_v18 = vadd.f32 %v810_v4, %v807_v13  ;;  %s4735_s2 = sld [smem:[#allocation10 + $0x286]]  ;;  %v841_v51 = vstv %s4723_s22  ;;  %v838_v57 = vmul.f32 %v837_v45, %v4134_v52 }
 0x195   : > { %v1894_v19 = vadd.f32 %v1893_v8, %v1891_v11  ;;  %v1062_v20 = vstv %s2885_s18  ;;  %s4738_s16 = sld [smem:[#allocation10 + $0x306]]  ;;  %v842_v3 = vmul.f32 %v841_v51, %v4144_v61 }
 0x196   : > { %v815_v21 = vadd.f32 %v814_v12, %v811_v18  ;;  %v1065_v24 = vstv %s2886_s0  ;;  %s4741_s6 = sld [smem:[#allocation10 + $0x386]]  ;;  %v1063_v25 = vmul.f32 %v1062_v20, %v3885_v36 }
 0x197   : > { %v1895_v27 = vmax.f32 %v1894_v19, 0.0  ;;  %s4745_s7 = sld [smem:[#allocation11 + $0x2]]  ;;  %v1066_v29 = vmul.f32 %v1065_v24, %v3946_v22  ;;  %v1069_v31 = vstv %s2887_s1 }
 0x198   : > { %v819_v33 = vadd.f32 %v818_v16, %v815_v21  ;;  %v1070_v34 = vmul.f32 %v1069_v31, %v3969_v43  ;;  %v1073_v35 = vstv %s2888_s4  ;;  %s4750_s25 = sld [smem:[#allocation10 + $0x406]] }
 0x199   : > { %1897 = vrot.lane.b32.xlu1 %v1895_v27, %s3569_s24  ;;  %v1074_v38 = vmul.f32 %v1073_v35, %v3984_v55  ;;  %v1077_v39 = vstv %s4732_s5  ;;  %s4756_s27 = sld [smem:[#allocation10 + $0x486]]  ;;  %v1067_v40 = vadd.f32 %v1066_v29, %v1063_v25  ;;  %v918_v29 = vpop.permute.xlu0 %917 }
 0x19a   : > { %v823_v42 = vadd.f32 %v822_v10, %v819_v33  ;;  %v1081_v44 = vstv %s4735_s2  ;;  %s4760_s30 = sld [smem:[#allocation10 + $0x506]]  ;;  %v1078_v46 = vmul.f32 %v1077_v39, %v3986_v56 }
 0x19b   : > { %s4764_s24 = sld [smem:[#allocation10 + $0x586]]  ;;  %v1071_v47 = vadd.f32 %v1070_v34, %v1067_v40  ;;  %v1085_v50 = vstv %s4738_s16  ;;  %v1082_v53 = vmul.f32 %v1081_v44, %v3996_v63 }
 0x19c   : > { %v827_v49 = vadd.f32 %v826_v32, %v823_v42  ;;  %s4768_s10 = sld [smem:[#allocation10 + $0x606]]  ;;  %v1089_v59 = vstv %s4741_s6  ;;  %v1086_v60 = vmul.f32 %v1085_v50, %v4003_v5 }
 0x19d   : > { %s4772_s28 = sld [smem:[#allocation10 + $0x686]]  ;;  %v1075_v54 = vadd.f32 %v1074_v38, %v1071_v47  ;;  %v1090_v1 = vmul.f32 %v1089_v59, %v4005_v6  ;;  %v845_v13 = vstv %s4745_s7 }
 0x19e   : > { %v831_v58 = vadd.f32 %v830_v41, %v827_v49  ;;  %s4776_s3 = sld [smem:[#allocation10 + $0x706]]  ;;  %v1093_v0 = vstv %s4750_s25 }
 0x19f   : > { %s4779_s12 = sld [smem:[#allocation10 + $0x786]]  ;;  %v1079_v62 = vadd.f32 %v1078_v46, %v1075_v54  ;;  %v1097_v12 = vstv %s4756_s27  ;;  %v1094_v11 = vmul.f32 %v1093_v0, %v4007_v7 }
 0x1a0   : > { %v835_v4 = vadd.f32 %v834_v48, %v831_v58  ;;  %s636_s11 = sld [smem:[#allocation10]]  ;;  %v1101_v18 = vstv %s4760_s30  ;;  %v1098_v19 = vmul.f32 %v1097_v12, %v4083_v15 }
 0x1a1   : > { %v1083_v2 = vadd.f32 %v1082_v53, %v1079_v62  ;;  %s2785_s19 = sld [smem:[#allocation10 + $0x80]]  ;;  %v1105_v10 = vstv %s4764_s24  ;;  %v1102_v24 = vmul.f32 %v1101_v18, %v4091_v9 }
 0x1a2   : > { %v839_v8 = vadd.f32 %v838_v57, %v835_v4  ;;  %s2786_s20 = sld [smem:[#allocation10 + $0x100]]  ;;  %v1109_v32 = vstv %s4768_s10  ;;  %v1106_v35 = vmul.f32 %v1105_v10, %v4097_v23 }
 0x1a3   : > { %v1087_v14 = vadd.f32 %v1086_v60, %v1083_v2  ;;  %s4787_s26 = sld [smem:[#allocation10 + $0x180]]  ;;  %v1113_v40 = vstv %s4772_s28  ;;  %v1110_v45 = vmul.f32 %v1109_v32, %v4102_v26 }
 0x1a4   : > { %v843_v16 = vadd.f32 %v842_v3, %v839_v8  ;;  %s4790_s15 = sld [smem:[#allocation10 + $0x200]]  ;;  %v1117_v48 = vstv %s4776_s3  ;;  %v1114_v51 = vmul.f32 %v1113_v40, %v4108_v30 }
 0x1a5   : > { %v1091_v17 = vadd.f32 %v1090_v1, %v1087_v14  ;;  %s4793_s14 = sld [smem:[#allocation10 + $0x280]]  ;;  %v1121_v57 = vstv %s4779_s12  ;;  %v1118_v60 = vmul.f32 %v1117_v48, %v4134_v52 }
 0x1a6   : > { %v846_v20 = vadd.f32 %v845_v13, %v843_v16  ;;  %v637_v21 = vstv %s636_s11  ;;  %s4796_s29 = sld [smem:[#allocation10 + $0x300]]  ;;  %v1122_v1 = vmul.f32 %v1121_v57, %v4144_v61 }
 0x1a7   : > { %v1095_v25 = vadd.f32 %v1094_v11, %v1091_v17  ;;  %v640_v27 = vstv %s2785_s19  ;;  %s4799_s17 = sld [smem:[#allocation10 + $0x380]]  ;;  %v638_v28 = vmul.f32 %v637_v21, %v3885_v36 }
 0x1a8   : > { %v847_v31 = vmax.f32 %v846_v20, 0.0  ;;  %s4803_s23 = sld [smem:[#allocation11 + $0x6]]  ;;  %v641_v33 = vmul.f32 %v640_v27, %v3946_v22  ;;  %v644_v34 = vstv %s2786_s20 }
 0x1a9   : > { %v1099_v37 = vadd.f32 %v1098_v19, %v1095_v25  ;;  %v645_v38 = vmul.f32 %v644_v34, %v3969_v43  ;;  %v648_v39 = vstv %s4787_s26  ;;  %s4809_s9 = sld [smem:[#allocation10 + $0x400]] }
 0x1aa   : > { %848 = vst.msk [vmem:[#allocation2 + $0x8] sm:$0xff] %vm706_vm0, %v847_v31  ;;  %v649_v41 = vmul.f32 %v648_v39, %v3984_v55  ;;  %v652_v42 = vstv %s4790_s15  ;;  %s4815_s13 = sld [smem:[#allocation10 + $0x480]]  ;;  %v642_v44 = vadd.f32 %v641_v33, %v638_v28 }
 0x1ab   : > { %920 = vst.msk [vmem:[#allocation2 + $0x8] sm:$0xff] %vm779_vm1, %v918_v29  ;;  %v1103_v46 = vadd.f32 %v1102_v24, %v1099_v37  ;;  %v656_v47 = vstv %s4793_s14  ;;  %s4820_s8 = sld [smem:[#allocation10 + $0x500]]  ;;  %v653_v49 = vmul.f32 %v652_v42, %v3986_v56 }
 0x1ac   : > { %s4824_s21 = sld [smem:[#allocation10 + $0x580]]  ;;  %v646_v50 = vadd.f32 %v645_v38, %v642_v44  ;;  %v660_v54 = vstv %s4796_s29  ;;  %v657_v58 = vmul.f32 %v656_v47, %v3996_v63  ;;  %v1198_v44 = vpop.permute.xlu1 %1197 }
 0x1ad   : > { %v1107_v53 = vadd.f32 %v1106_v35, %v1103_v46  ;;  %s4828_s22 = sld [smem:[#allocation10 + $0x600]]  ;;  %v664_v3 = vstv %s4799_s17  ;;  %v661_v4 = vmul.f32 %v660_v54, %v4003_v5 }
 0x1ae   : > { %s4832_s18 = sld [smem:[#allocation10 + $0x680]]  ;;  %v650_v59 = vadd.f32 %v649_v41, %v646_v50  ;;  %v665_v12 = vmul.f32 %v664_v3, %v4005_v6  ;;  %v1125_v18 = vstv %s4803_s23 }
 0x1af   : > { %v1111_v62 = vadd.f32 %v1110_v45, %v1107_v53  ;;  %s4836_s0 = sld [smem:[#allocation10 + $0x700]]  ;;  %v668_v8 = vstv %s4809_s9 }
 0x1b0   : > { %s4839_s1 = sld [smem:[#allocation10 + $0x780]]  ;;  %v654_v0 = vadd.f32 %v653_v49, %v650_v59  ;;  %v672_v16 = vstv %s4815_s13  ;;  %v669_v19 = vmul.f32 %v668_v8, %v4007_v7 }
 0x1b1   : > { %v1115_v2 = vadd.f32 %v1114_v51, %v1111_v62  ;;  %s2851_s4 = sld [smem:[#allocation10 + $0x4]]  ;;  %v676_v10 = vstv %s4820_s8  ;;  %v673_v21 = vmul.f32 %v672_v16, %v4083_v15 }
 0x1b2   : > { %v658_v13 = vadd.f32 %v657_v58, %v654_v0  ;;  %s2852_s5 = sld [smem:[#allocation10 + $0x84]]  ;;  %v2042_v11 = vld [vmem:[#allocation2 + $0x8] sm:$0xff]  ;;  %v680_v27 = vstv %s4824_s21  ;;  %v677_v29 = vmul.f32 %v676_v10, %v4091_v9 }
 0x1b3   : > { %v1119_v14 = vadd.f32 %v1118_v60, %v1115_v2  ;;  %s2853_s2 = sld [smem:[#allocation10 + $0x104]]  ;;  %2282 = vmatprep.mubr.f32.mxu0 %v2042_v11  ;;  %v684_v35 = vstv %s4828_s22  ;;  %v681_v39 = vmul.f32 %v680_v27, %v4097_v23 }
 0x1b4   : > { %v662_v17 = vadd.f32 %v661_v4, %v658_v13  ;;  %s2854_s16 = sld [smem:[#allocation10 + $0x184]]  ;;  %v688_v45 = vstv %s4832_s18  ;;  %v685_v49 = vmul.f32 %v684_v35, %v4102_v26 }
 0x1b5   : > { %v1123_v20 = vadd.f32 %v1122_v1, %v1119_v14  ;;  %s4848_s6 = sld [smem:[#allocation10 + $0x204]]  ;;  %v692_v53 = vstv %s4836_s0  ;;  %v689_v58 = vmul.f32 %v688_v45, %v4108_v30 }
 0x1b6   : > { %v666_v24 = vadd.f32 %v665_v12, %v662_v17  ;;  %s4851_s7 = sld [smem:[#allocation10 + $0x284]]  ;;  %v696_v62 = vstv %s4839_s1  ;;  %v693_v0 = vmul.f32 %v692_v53, %v4134_v52 }
 0x1b7   : > { %v1126_v25 = vadd.f32 %v1125_v18, %v1123_v20  ;;  %v922_v28 = vstv %s2851_s4  ;;  %s4854_s25 = sld [smem:[#allocation10 + $0x304]]  ;;  %v697_v13 = vmul.f32 %v696_v62, %v4144_v61 }
 0x1b8   : > { %v670_v31 = vadd.f32 %v669_v19, %v666_v24  ;;  %v925_v32 = vstv %s2852_s5  ;;  %s4857_s27 = sld [smem:[#allocation10 + $0x384]]  ;;  %v923_v33 = vmul.f32 %v922_v28, %v3885_v36 }
 0x1b9   : > { %v1127_v34 = vmax.f32 %v1126_v25, 0.0  ;;  %s4861_s30 = sld [smem:[#allocation11]]  ;;  %v926_v37 = vmul.f32 %v925_v32, %v3946_v22  ;;  %v929_v38 = vstv %s2853_s2 }
 0x1ba   : > { %v674_v40 = vadd.f32 %v673_v21, %v670_v31  ;;  %v930_v41 = vmul.f32 %v929_v38, %v3969_v43  ;;  %v933_v42 = vstv %s2854_s16  ;;  %s4866_s24 = sld [smem:[#allocation10 + $0x404]] }
 0x1bb   : > { %1128 = vst.msk [vmem:[#allocation2 + $0x18] sm:$0xff] %vm706_vm0, %v1127_v34  ;;  %v934_v46 = vmul.f32 %v933_v42, %v3984_v55  ;;  %v937_v47 = vstv %s4848_s6  ;;  %s4872_s10 = sld [smem:[#allocation10 + $0x484]]  ;;  %v927_v48 = vadd.f32 %v926_v37, %v923_v33 }
 0x1bc   : > { %1200 = vst.msk [vmem:[#allocation2 + $0x18] sm:$0xff] %vm779_vm1, %v1198_v44  ;;  %v678_v50 = vadd.f32 %v677_v29, %v674_v40  ;;  %v941_v51 = vstv %s4851_s7  ;;  %s4877_s28 = sld [smem:[#allocation10 + $0x504]]  ;;  %v938_v54 = vmul.f32 %v937_v47, %v3986_v56 }
 0x1bd   : > { %s4881_s3 = sld [smem:[#allocation10 + $0x584]]  ;;  %v931_v57 = vadd.f32 %v930_v41, %v927_v48  ;;  %v945_v60 = vstv %s4854_s25  ;;  %v942_v3 = vmul.f32 %v941_v51, %v3996_v63 }
 0x1be   : > { %v682_v59 = vadd.f32 %v681_v39, %v678_v50  ;;  %s4885_s12 = sld [smem:[#allocation10 + $0x604]]  ;;  %v949_v2 = vstv %s4857_s27  ;;  %v946_v8 = vmul.f32 %v945_v60, %v4003_v5  ;;  %v777_v39 = vpop.permute.xlu0 %776 }
 0x1bf   : > { %s4889_s11 = sld [smem:[#allocation10 + $0x684]]  ;;  %v935_v4 = vadd.f32 %v934_v46, %v931_v57  ;;  %v950_v16 = vmul.f32 %v949_v2, %v4005_v6  ;;  %v700_v10 = vstv %s4861_s30 }
 0x1c0   : > { %v686_v1 = vadd.f32 %v685_v49, %v682_v59  ;;  %s4893_s19 = sld [smem:[#allocation10 + $0x704]]  ;;  %v953_v14 = vstv %s4866_s24 }
 0x1c1   : > { %s4896_s20 = sld [smem:[#allocation10 + $0x784]]  ;;  %v939_v12 = vadd.f32 %v938_v54, %v935_v4  ;;  %v957_v20 = vstv %s4872_s10  ;;  %v954_v21 = vmul.f32 %v953_v14, %v4007_v7 }
 0x1c2   : > { %v690_v11 = vadd.f32 %v689_v58, %v686_v1  ;;  %s2953_s26 = sld [smem:[#allocation10 + $0xa]]  ;;  %v961_v27 = vstv %s4877_s28  ;;  %v958_v28 = vmul.f32 %v957_v20, %v4083_v15 }
 0x1c3   : > { %v943_v18 = vadd.f32 %v942_v3, %v939_v12  ;;  %v2044_v19 = vld [vmem:[#allocation2 + $0x18] sm:$0xff]  ;;  %s2954_s15 = sld [smem:[#allocation10 + $0x8a]]  ;;  %v965_v32 = vstv %s4881_s3  ;;  %v962_v34 = vmul.f32 %v961_v27, %v4091_v9 }
 0x1c4   : > { %v694_v17 = vadd.f32 %v693_v0, %v690_v11  ;;  %2352 = vmatprep.mubr.f32.mxu1 %v2044_v19  ;;  %s2955_s14 = sld [smem:[#allocation10 + $0x10a]]  ;;  %v969_v41 = vstv %s4885_s12  ;;  %v966_v45 = vmul.f32 %v965_v32, %v4097_v23  ;;  %v2144_v32 = vld [vmem:[#allocation13 + $0x2e8] sm:$0xff] }
 0x1c5   : > { %v947_v24 = vadd.f32 %v946_v8, %v943_v18  ;;  %s2956_s29 = sld [smem:[#allocation10 + $0x18a]]  ;;  %v973_v49 = vstv %s4889_s11  ;;  %v970_v54 = vmul.f32 %v969_v41, %v4102_v26 }
 0x1c6   : > { %v698_v25 = vadd.f32 %v697_v13, %v694_v17  ;;  %s4905_s17 = sld [smem:[#allocation10 + $0x20a]]  ;;  %v977_v59 = vstv %s4893_s19  ;;  %v974_v3 = vmul.f32 %v973_v49, %v4108_v30  ;;  %v2130_v17 = vld [vmem:[#allocation13 + $0x278] sm:$0xff] }
 0x1c7   : > { %v951_v29 = vadd.f32 %v950_v16, %v947_v24  ;;  %s4908_s23 = sld [smem:[#allocation10 + $0x28a]]  ;;  %v981_v1 = vstv %s4896_s20  ;;  %v978_v12 = vmul.f32 %v977_v59, %v4134_v52 }
 0x1c8   : > { %v701_v31 = vadd.f32 %v700_v10, %v698_v25  ;;  %v1342_v33 = vstv %s2953_s26  ;;  %s4911_s9 = sld [smem:[#allocation10 + $0x30a]]  ;;  %v982_v18 = vmul.f32 %v981_v1, %v4144_v61 }
 0x1c9   : > { %v955_v35 = vadd.f32 %v954_v21, %v951_v29  ;;  %v1343_v37 = vmul.f32 %v1342_v33, %v3885_v36  ;;  %v1345_v38 = vstv %s2954_s15  ;;  %s4915_s13 = sld [smem:[#allocation10 + $0x38a]]  ;;  %v2145_v21 = vld [vmem:[#allocation13 + $0x2f0] sm:$0xff] }
 0x1ca   : > { %v702_v40 = vmax.f32 %v701_v31, 0.0  ;;  %s4918_s8 = sld [smem:[#allocation11 + $0x4]]  ;;  %v1346_v42 = vmul.f32 %v1345_v38, %v3946_v22  ;;  %v1349_v44 = vstv %s2955_s14 }
 0x1cb   : > { %v959_v46 = vadd.f32 %v958_v28, %v955_v35  ;;  %v1350_v47 = vmul.f32 %v1349_v44, %v3969_v43  ;;  %v1353_v48 = vstv %s2956_s29  ;;  %s4923_s21 = sld [smem:[#allocation10 + $0x40a]]  ;;  %v2129_v28 = vld [vmem:[#allocation13 + $0x270] sm:$0xff]  ;;  %v2127_v44 = vld [vmem:[#allocation13 + $0x260] sm:$0xff] }
 0x1cc   : > { %707 = vst.msk [vmem:[#allocation2] sm:$0xff] %vm706_vm0, %v702_v40  ;;  %v1347_v50 = vadd.f32 %v1346_v42, %v1343_v37  ;;  %v1354_v51 = vmul.f32 %v1353_v48, %v3984_v55  ;;  %v1357_v53 = vstv %s4905_s17  ;;  %s4929_s22 = sld [smem:[#allocation10 + $0x48a]]  ;;  %v2128_v37 = vld [vmem:[#allocation13 + $0x268] sm:$0xff] }
 0x1cd   : > { %780 = vst.msk [vmem:[#allocation2] sm:$0xff] %vm779_vm1, %v777_v39  ;;  %v963_v57 = vadd.f32 %v962_v34, %v959_v46  ;;  %v1361_v58 = vstv %s4908_s23  ;;  %s4934_s18 = sld [smem:[#allocation10 + $0x50a]]  ;;  %v1358_v62 = vmul.f32 %v1357_v53, %v3986_v56  ;;  %v2143_v39 = vld [vmem:[#allocation13 + $0x2e0] sm:$0xff]  ;;  %v1058_v53 = vpop.permute.xlu1 %1057 }
 0x1ce   : > { %v1351_v60 = vadd.f32 %v1350_v47, %v1347_v50  ;;  %s4938_s0 = sld [smem:[#allocation10 + $0x58a]]  ;;  %v1365_v0 = vstv %s4911_s9  ;;  %v1362_v8 = vmul.f32 %v1361_v58, %v3996_v63  ;;  %v2142_v47 = vld [vmem:[#allocation13 + $0x2d8] sm:$0xff] }
 0x1cf   : > { %v967_v4 = vadd.f32 %v966_v45, %v963_v57  ;;  %s4942_s1 = sld [smem:[#allocation10 + $0x60a]]  ;;  %v1369_v11 = vstv %s4915_s13  ;;  %v1366_v16 = vmul.f32 %v1365_v0, %v4003_v5  ;;  %v2126_v57 = vld [vmem:[#allocation13 + $0x258] sm:$0xff] }
 0x1d0   : > { %v1355_v2 = vadd.f32 %v1354_v51, %v1351_v60  ;;  %s4946_s4 = sld [smem:[#allocation10 + $0x68a]]  ;;  %v1370_v25 = vmul.f32 %v1369_v11, %v4005_v6  ;;  %v985_v31 = vstv %s4918_s8 }
 0x1d1   : > { %v971_v13 = vadd.f32 %v970_v54, %v967_v4  ;;  %s4950_s5 = sld [smem:[#allocation10 + $0x70a]]  ;;  %v1373_v20 = vstv %s4923_s21 }
 0x1d2   : > { %v1359_v14 = vadd.f32 %v1358_v62, %v1355_v2  ;;  %s4953_s2 = sld [smem:[#allocation10 + $0x78a]]  ;;  %v1377_v29 = vstv %s4929_s22  ;;  %v1374_v34 = vmul.f32 %v1373_v20, %v4007_v7  ;;  %v2141_v62 = vld [vmem:[#allocation13 + $0x2d0] sm:$0xff] }
 0x1d3   : > { %v975_v19 = vadd.f32 %v974_v3, %v971_v13  ;;  %s4957_s16 = sld [smem:[#allocation10 + $0x8]]  ;;  %v1381_v38 = vstv %s4934_s18  ;;  %v1378_v41 = vmul.f32 %v1377_v29, %v4083_v15  ;;  %v2125_v2 = vld [vmem:[#allocation13 + $0x250] sm:$0xff]  ;;  %v2123_v29 = vld [vmem:[#allocation13 + $0x240] sm:$0xff] }
 0x1d4   : > { %v2041_v10 = vld [vmem:[#allocation2] sm:$0xff]  ;;  %v1363_v24 = vadd.f32 %v1362_v8, %v1359_v14  ;;  %s4960_s6 = sld [smem:[#allocation10 + $0x88]]  ;;  %v1385_v45 = vstv %s4938_s0  ;;  %v1382_v49 = vmul.f32 %v1381_v38, %v4091_v9  ;;  %v2140_v14 = vld [vmem:[#allocation13 + $0x2c8] sm:$0xff] }
 0x1d5   : > { %v979_v27 = vadd.f32 %v978_v12, %v975_v19  ;;  %2283 = vmatmul.mubr.f32.vlgmr.msra.gmra.mxu0 %v2041_v10  ;;  %s4963_s7 = sld [smem:[#allocation10 + $0x108]]  ;;  %v1389_v58 = vstv %s4942_s1  ;;  %v1386_v4 = vmul.f32 %v1385_v45, %v4097_v23 }
 0x1d6   : > { %3199 = vmatpush3.msra.mxu0 %v2130_v17  ;;  %v1367_v33 = vadd.f32 %v1366_v16, %v1363_v24  ;;  %s4967_s25 = sld [smem:[#allocation10 + $0x188]]  ;;  %v1393_v8 = vstv %s4946_s4  ;;  %v2124_v17 = vld [vmem:[#allocation13 + $0x248] sm:$0xff]  ;;  %v2139_v24 = vld [vmem:[#allocation13 + $0x2c0] sm:$0xff] }
 0x1d7   : > { %v983_v35 = vadd.f32 %v982_v18, %v979_v27  ;;  %3200 = vmatprep.subr.mxu0 %v2145_v21  ;;  %s4970_s27 = sld [smem:[#allocation10 + $0x208]]  ;;  %v1390_v18 = vmul.f32 %v1389_v58, %v4102_v26  ;;  %v1397_v20 = vstv %s4950_s5  ;;  %v1394_v27 = vmul.f32 %v1393_v8, %v4108_v30  ;;  %v2136_v58 = vld [vmem:[#allocation13 + $0x2a8] sm:$0xff] }
 0x1d8   : > { %3201 = vmatpush3.msra.mxu0 %v2129_v28  ;;  %v1371_v40 = vadd.f32 %v1370_v25, %v1367_v33  ;;  %s4973_s30 = sld [smem:[#allocation10 + $0x288]] }
 0x1d9   : > { %v986_v42 = vadd.f32 %v985_v31, %v983_v35  ;;  %3202 = vmatprep.subr.mxu0 %v2144_v32  ;;  %v1202_v46 = vstv %s4957_s16  ;;  %s4977_s24 = sld [smem:[#allocation10 + $0x308]]  ;;  %v1401_v31 = vstv %s4953_s2 }
 0x1da   : > { %3203 = vmatpush3.msra.mxu0 %v2128_v37  ;;  %v1375_v48 = vadd.f32 %v1374_v34, %v1371_v40  ;;  %v1203_v50 = vmul.f32 %v1202_v46, %v3885_v36  ;;  %v1205_v51 = vstv %s4960_s6  ;;  %s4982_s10 = sld [smem:[#allocation10 + $0x388]]  ;;  %v2138_v34 = vld [vmem:[#allocation13 + $0x2b8] sm:$0xff]  ;;  %v1398_v37 = vmul.f32 %v1397_v20, %v4134_v52 }
 0x1db   : > { %v987_v54 = vmax.f32 %v986_v42, 0.0  ;;  %3204 = vmatprep.subr.mxu0 %v2143_v39  ;;  %s4985_s28 = sld [smem:[#allocation11 + $0xa]]  ;;  %v1206_v59 = vmul.f32 %v1205_v51, %v3946_v22  ;;  %v1209_v60 = vstv %s4963_s7  ;;  %v2122_v39 = vld [vmem:[#allocation13 + $0x238] sm:$0xff]  ;;  %v1402_v46 = vmul.f32 %v1401_v31, %v4144_v61 }
 0x1dc   : > { %3205 = vmatpush3.msra.mxu0 %v2127_v44  ;;  %v1379_v3 = vadd.f32 %v1378_v41, %v1375_v48  ;;  %v1210_v0 = vmul.f32 %v1209_v60, %v3969_v43  ;;  %v1213_v1 = vstv %s4967_s25  ;;  %s4992_s3 = sld [smem:[#allocation10 + $0x408]]  ;;  %v2162_v42 = vld [vmem:[#allocation13 + $0x378] sm:$0xff]  ;;  %v2137_v44 = vld [vmem:[#allocation13 + $0x2b0] sm:$0xff]  ;;  %v2176_v60 = vld [vmem:[#allocation13 + $0x3e8] sm:$0xff] }
 0x1dd   : > { %988 = vst.msk [vmem:[#allocation2 + $0x10] sm:$0xff] %vm706_vm0, %v987_v54  ;;  %3206 = vmatprep.subr.mxu0 %v2142_v47  ;;  %v1207_v12 = vadd.f32 %v1206_v59, %v1203_v50  ;;  %v1214_v13 = vmul.f32 %v1213_v1, %v3984_v55  ;;  %v1217_v11 = vstv %s4970_s27  ;;  %s4998_s12 = sld [smem:[#allocation10 + $0x488]]  ;;  %v2121_v50 = vld [vmem:[#allocation13 + $0x230] sm:$0xff]  ;;  %v2160_v1 = vld [vmem:[#allocation13 + $0x368] sm:$0xff]  ;;  %v2158_v31 = vld [vmem:[#allocation13 + $0x358] sm:$0xff] }
 0x1de   : > { %1060 = vst.msk [vmem:[#allocation2 + $0x10] sm:$0xff] %vm779_vm1, %v1058_v53  ;;  %3207 = vmatpush3.msra.mxu0 %v2126_v57  ;;  %v1383_v16 = vadd.f32 %v1382_v49, %v1379_v3  ;;  %v1221_v19 = vstv %s4973_s30  ;;  %s5003_s11 = sld [smem:[#allocation10 + $0x508]]  ;;  %v1218_v21 = vmul.f32 %v1217_v11, %v3986_v56  ;;  %v2177_v49 = vld [vmem:[#allocation13 + $0x3f0] sm:$0xff] }
 0x1df   : > { %3208 = vmatprep.subr.mxu0 %v2141_v62  ;;  %v1211_v10 = vadd.f32 %v1210_v0, %v1207_v12  ;;  %s5007_s19 = sld [smem:[#allocation10 + $0x588]]  ;;  %v1225_v28 = vstv %s4977_s24  ;;  %v1222_v33 = vmul.f32 %v1221_v19, %v3996_v63  ;;  %v2161_v54 = vld [vmem:[#allocation13 + $0x370] sm:$0xff]  ;;  %v2120_v0 = vld [vmem:[#allocation13 + $0x228] sm:$0xff]  ;;  %v2135_v12 = vld [vmem:[#allocation13 + $0x2a0] sm:$0xff] }
 0x1e0   : > { %3209 = vmatpush3.msra.mxu0 %v2125_v2  ;;  %v1387_v25 = vadd.f32 %v1386_v4, %v1383_v16  ;;  %s5011_s20 = sld [smem:[#allocation10 + $0x608]]  ;;  %v1229_v38 = vstv %s4982_s10  ;;  %v1226_v41 = vmul.f32 %v1225_v28, %v4003_v5  ;;  %v2119_v16 = vld [vmem:[#allocation13 + $0x220] sm:$0xff] }
 0x1e1   : > { %3210 = vmatprep.subr.mxu0 %v2140_v14  ;;  %v1215_v32 = vadd.f32 %v1214_v13, %v1211_v10  ;;  %s5015_s26 = sld [smem:[#allocation10 + $0x688]]  ;;  %v1230_v53 = vmul.f32 %v1229_v38, %v4005_v6  ;;  %v1405_v62 = vstv %s4985_s28  ;;  %v2175_v13 = vld [vmem:[#allocation13 + $0x3e0] sm:$0xff]  ;;  %v2134_v10 = vld [vmem:[#allocation13 + $0x298] sm:$0xff]  ;;  %v2173_v38 = vld [vmem:[#allocation13 + $0x3d0] sm:$0xff] }
 0x1e2   : > { %3211 = vmatpush3.msra.mxu0 %v2124_v17  ;;  %v1391_v35 = vadd.f32 %v1390_v18, %v1387_v25  ;;  %s5019_s15 = sld [smem:[#allocation10 + $0x708]]  ;;  %v1233_v47 = vstv %s4992_s3  ;;  %v2159_v18 = vld [vmem:[#allocation13 + $0x360] sm:$0xff] }
 0x1e3   : > { %3212 = vmatprep.subr.mxu0 %v2139_v24  ;;  %v1219_v40 = vadd.f32 %v1218_v21, %v1215_v32  ;;  %s5022_s14 = sld [smem:[#allocation10 + $0x788]]  ;;  %v1237_v59 = vstv %s4998_s12  ;;  %v1234_v4 = vmul.f32 %v1233_v47, %v4007_v7  ;;  %v2174_v21 = vld [vmem:[#allocation13 + $0x3d8] sm:$0xff] }
 0x1e4   : > { %3213 = vmatpush3.msra.mxu0 %v2123_v29  ;;  %v1395_v45 = vadd.f32 %v1394_v27, %v1391_v35  ;;  %s5026_s29 = sld [smem:[#allocation10 + $0xe]]  ;;  %v1241_v8 = vstv %s5003_s11  ;;  %v1238_v14 = vmul.f32 %v1237_v59, %v4083_v15  ;;  %v2118_v29 = vld [vmem:[#allocation13 + $0x218] sm:$0xff]  ;;  %v2116_v59 = vld [vmem:[#allocation13 + $0x208] sm:$0xff] }
 0x1e5   : > { %v2043_v48 = vld [vmem:[#allocation2 + $0x10] sm:$0xff]  ;;  %3214 = vmatprep.subr.mxu0 %v2138_v34  ;;  %v1223_v51 = vadd.f32 %v1222_v33, %v1219_v40  ;;  %s5029_s17 = sld [smem:[#allocation10 + $0x8e]]  ;;  %v1245_v17 = vstv %s5007_s19  ;;  %v1242_v25 = vmul.f32 %v1241_v8, %v4091_v9 }
 0x1e6   : > { %2353 = vmatmul.mubr.f32.vlgmr.msra.gmra.mxu1 %v2043_v48  ;;  %3215 = vmatpush3.msra.mxu0 %v2122_v39  ;;  %v1399_v57 = vadd.f32 %v1398_v37, %v1395_v45  ;;  %s5032_s23 = sld [smem:[#allocation10 + $0x10e]]  ;;  %v1249_v33 = vstv %s5011_s20  ;;  %v2133_v37 = vld [vmem:[#allocation13 + $0x290] sm:$0xff]  ;;  %v1246_v40 = vmul.f32 %v1245_v17, %v4097_v23  ;;  %v2170_v17 = vld [vmem:[#allocation13 + $0x3b8] sm:$0xff] }
 0x1e7   : > { %3234 = vmatpush3.msra.mxu1 %v2162_v42  ;;  %3216 = vmatprep.subr.mxu0 %v2137_v44  ;;  %v1227_v3 = vadd.f32 %v1226_v41, %v1223_v51  ;;  %s5036_s9 = sld [smem:[#allocation10 + $0x18e]]  ;;  %v2117_v44 = vld [vmem:[#allocation13 + $0x210] sm:$0xff]  ;;  %v1253_v47 = vstv %s5015_s26  ;;  %v2132_v51 = vld [vmem:[#allocation13 + $0x288] sm:$0xff] }
 0x1e8   : > { %3235 = vmatprep.subr.mxu1 %v2177_v49  ;;  %3217 = vmatpush3.msra.mxu0 %v2121_v50  ;;  %v1403_v2 = vadd.f32 %v1402_v46, %v1399_v57  ;;  %s5039_s13 = sld [smem:[#allocation10 + $0x20e]]  ;;  %v2157_v45 = vld [vmem:[#allocation13 + $0x350] sm:$0xff]  ;;  %v1478_v46 = vpop.permute.xlu0 %1477  ;;  %v1250_v57 = vmul.f32 %v1249_v33, %v4102_v26  ;;  %v1254_v8 = vmul.f32 %v1253_v47, %v4108_v30  ;;  %v2167_v47 = vld [vmem:[#allocation13 + $0x3a0] sm:$0xff] }
 0x1e9   : > { %3236 = vmatpush3.msra.mxu1 %v2161_v54  ;;  %3218 = vmatprep.subr.mxu0 %v2136_v58  ;;  %v1231_v11 = vadd.f32 %v1230_v53, %v1227_v3  ;;  %s5042_s8 = sld [smem:[#allocation10 + $0x28e]]  ;;  %v2172_v53 = vld [vmem:[#allocation13 + $0x3c8] sm:$0xff]  ;;  %v2153_v33 = vld [vmem:[#allocation13 + $0x330] sm:$0xff] }
 0x1ea   : > { %3237 = vmatprep.subr.mxu1 %v2176_v60  ;;  %v1406_v19 = vadd.f32 %v1405_v62, %v1403_v2  ;;  %3219 = vmatpush3.msra.mxu0 %v2120_v0  ;;  %v1622_v20 = vstv %s5026_s29  ;;  %s5046_s21 = sld [smem:[#allocation10 + $0x30e]]  ;;  %v2156_v60 = vld [vmem:[#allocation13 + $0x348] sm:$0xff]  ;;  %v1257_v62 = vstv %s5019_s15  ;;  %v2131_v0 = vld [vmem:[#allocation13 + $0x280] sm:$0xff] }
 0x1eb   : > { %3238 = vmatpush3.msra.mxu1 %v2160_v1  ;;  %v1235_v24 = vadd.f32 %v1234_v4, %v1231_v11  ;;  %3220 = vmatprep.subr.mxu0 %v2135_v12  ;;  %v1623_v27 = vmul.f32 %v1622_v20, %v3885_v36  ;;  %v1625_v28 = vstv %s5029_s17  ;;  %s5051_s22 = sld [smem:[#allocation10 + $0x38e]]  ;;  %v2171_v1 = vld [vmem:[#allocation13 + $0x3c0] sm:$0xff] }
 0x1ec   : > { %3239 = vmatprep.subr.mxu1 %v2175_v13  ;;  %v1407_v32 = vmax.f32 %v1406_v19, 0.0  ;;  %s5054_s18 = sld [smem:[#allocation11 + $0x8]]  ;;  %3221 = vmatpush3.msra.mxu0 %v2119_v16  ;;  %v1626_v34 = vmul.f32 %v1625_v28, %v3946_v22  ;;  %v1629_v35 = vstv %s5032_s23  ;;  %v2115_v13 = vld [vmem:[#allocation13 + $0x200] sm:$0xff]  ;;  %v2210_v19 = vld [vmem:[#allocation13 + $0x4f8] sm:$0xff]  ;;  %v2169_v28 = vld [vmem:[#allocation13 + $0x3b0] sm:$0xff] }
 0x1ed   : > { %3240 = vmatpush3.msra.mxu1 %v2159_v18  ;;  %v1239_v39 = vadd.f32 %v1238_v14, %v1235_v24  ;;  %v1630_v41 = vmul.f32 %v1629_v35, %v3969_v43  ;;  %v1633_v42 = vstv %s5036_s9  ;;  %s5061_s0 = sld [smem:[#allocation10 + $0x40e]]  ;;  %3222 = vmatprep.subr.mxu0 %v2134_v10  ;;  %v2155_v11 = vld [vmem:[#allocation13 + $0x340] sm:$0xff]  ;;  %v1261_v14 = vstv %s5022_s14  ;;  %v2154_v24 = vld [vmem:[#allocation13 + $0x338] sm:$0xff] }
 0x1ee   : > { %3241 = vmatprep.subr.mxu1 %v2174_v21  ;;  %1408 = vst.msk [vmem:[#allocation2 + $0x28] sm:$0xff] %vm706_vm0, %v1407_v32  ;;  %v1627_v48 = vadd.f32 %v1626_v34, %v1623_v27  ;;  %v1634_v49 = vmul.f32 %v1633_v42, %v3984_v55  ;;  %v1637_v50 = vstv %s5039_s13  ;;  %s5067_s1 = sld [smem:[#allocation10 + $0x48e]]  ;;  %3223 = vmatpush3.msra.mxu0 %v2118_v29  ;;  %v2152_v42 = vld [vmem:[#allocation13 + $0x328] sm:$0xff] }
 0x1ef   : > { %3242 = vmatpush3.msra.mxu1 %v2158_v31  ;;  %1480 = vst.msk [vmem:[#allocation2 + $0x28] sm:$0xff] %vm779_vm1, %v1478_v46  ;;  %v1243_v54 = vadd.f32 %v1242_v25, %v1239_v39  ;;  %v1641_v58 = vstv %s5042_s8  ;;  %s5072_s4 = sld [smem:[#allocation10 + $0x50e]]  ;;  %3224 = vmatprep.subr.mxu0 %v2133_v37  ;;  %v1638_v4 = vmul.f32 %v1637_v50, %v3986_v56  ;;  %v2168_v39 = vld [vmem:[#allocation13 + $0x3a8] sm:$0xff] }
 0x1f0   : > { %3243 = vmatprep.subr.mxu1 %v2173_v38  ;;  %v1631_v3 = vadd.f32 %v1630_v41, %v1627_v48  ;;  %s5076_s5 = sld [smem:[#allocation10 + $0x58e]]  ;;  %3225 = vmatpush3.msra.mxu0 %v2117_v44  ;;  %v1645_v12 = vstv %s5046_s21  ;;  %v1642_v18 = vmul.f32 %v1641_v58, %v3996_v63  ;;  %v1258_v10 = vmul.f32 %v1257_v62, %v4134_v52  ;;  %v2166_v58 = vld [vmem:[#allocation13 + $0x398] sm:$0xff] }
 0x1f1   : > { %3244 = vmatpush3.msra.mxu1 %v2157_v45  ;;  %v1247_v2 = vadd.f32 %v1246_v40, %v1243_v54  ;;  %s5080_s2 = sld [smem:[#allocation10 + $0x60e]]  ;;  %3226 = vmatprep.subr.mxu0 %v2132_v51  ;;  %v1649_v21 = vstv %s5051_s22  ;;  %v1646_v27 = vmul.f32 %v1645_v12, %v4003_v5  ;;  %v1262_v31 = vmul.f32 %v1261_v14, %v4144_v61  ;;  %v2151_v51 = vld [vmem:[#allocation13 + $0x320] sm:$0xff]  ;;  %v2165_v12 = vld [vmem:[#allocation13 + $0x390] sm:$0xff] }
 0x1f2   : > { %3245 = vmatprep.subr.mxu1 %v2172_v53  ;;  %v1635_v16 = vadd.f32 %v1634_v49, %v1631_v3  ;;  %s5084_s16 = sld [smem:[#allocation10 + $0x68e]]  ;;  %3227 = vmatpush3.msra.mxu0 %v2116_v59  ;;  %v1650_v35 = vmul.f32 %v1649_v21, %v4005_v6  ;;  %v1265_v41 = vstv %s5054_s18 }
 0x1f3   : > { %3246 = vmatpush3.msra.mxu1 %v2156_v60  ;;  %v1251_v20 = vadd.f32 %v1250_v57, %v1247_v2  ;;  %s5088_s6 = sld [smem:[#allocation10 + $0x70e]]  ;;  %3228 = vmatprep.subr.mxu0 %v2131_v0  ;;  %v1653_v32 = vstv %s5061_s0 }
 0x1f4   : > { %3247 = vmatprep.subr.mxu1 %v2171_v1  ;;  %v1639_v25 = vadd.f32 %v1638_v4, %v1635_v16  ;;  %s5091_s7 = sld [smem:[#allocation10 + $0x78e]]  ;;  %3229 = vmatpush3.msra.mxu0 %v2115_v13  ;;  %v1657_v40 = vstv %s5067_s1  ;;  %v1654_v45 = vmul.f32 %v1653_v32, %v4007_v7  ;;  %v2150_v4 = vld [vmem:[#allocation13 + $0x318] sm:$0xff] }
 0x1f5   : > { %3248 = vmatpush3.msra.mxu1 %v2155_v11  ;;  %v1255_v29 = vadd.f32 %v1254_v8, %v1251_v20  ;;  %s5095_s25 = sld [smem:[#allocation10 + $0xc]]  ;;  %3268 = vmatprep.subr.mxu0 %v2210_v19  ;;  %v1661_v48 = vstv %s5072_s4  ;;  %v1658_v50 = vmul.f32 %v1657_v40, %v4083_v15  ;;  %v1338_v19 = vpop.permute.xlu1 %1337 }
 0x1f6   : > { %3249 = vmatprep.subr.mxu1 %v2170_v17  ;;  %v1643_v34 = vadd.f32 %v1642_v18, %v1639_v25  ;;  %s5098_s27 = sld [smem:[#allocation10 + $0x8c]]  ;;  %v2046_v37 = vld [vmem:[#allocation2 + $0x28] sm:$0xff]  ;;  %v1665_v54 = vstv %s5076_s5  ;;  %v1662_v60 = vmul.f32 %v1661_v48, %v4091_v9  ;;  %v2149_v18 = vld [vmem:[#allocation13 + $0x310] sm:$0xff] }
 0x1f7   : > { %3250 = vmatpush3.msra.mxu1 %v2154_v24  ;;  %v1259_v38 = vadd.f32 %v1258_v10, %v1255_v29  ;;  %s5101_s30 = sld [smem:[#allocation10 + $0x10c]]  ;;  %2422 = vmatprep.mubr.f32.mxu0 %v2046_v37  ;;  %v1669_v1 = vstv %s5080_s2  ;;  %v1666_v11 = vmul.f32 %v1665_v54, %v4097_v23  ;;  %v2164_v24 = vld [vmem:[#allocation13 + $0x388] sm:$0xff] }
 0x1f8   : > { %3251 = vmatprep.subr.mxu1 %v2169_v28  ;;  %v1647_v44 = vadd.f32 %v1646_v27, %v1643_v34  ;;  %s5105_s24 = sld [smem:[#allocation10 + $0x18c]]  ;;  %v1673_v17 = vstv %s5084_s16  ;;  %v1670_v27 = vmul.f32 %v1669_v1, %v4102_v26  ;;  %v2148_v29 = vld [vmem:[#allocation13 + $0x308] sm:$0xff]  ;;  %v2163_v34 = vld [vmem:[#allocation13 + $0x380] sm:$0xff] }
 0x1f9   : > { %v1263_v46 = vadd.f32 %v1262_v31, %v1259_v38  ;;  %3252 = vmatpush3.msra.mxu1 %v2153_v33  ;;  %s5108_s10 = sld [smem:[#allocation10 + $0x20c]]  ;;  %v1677_v31 = vstv %s5088_s6  ;;  %v1674_v37 = vmul.f32 %v1673_v17, %v4108_v30  ;;  %v2191_v17 = vld [vmem:[#allocation13 + $0x460] sm:$0xff] }
 0x1fa   : > { %3253 = vmatprep.subr.mxu1 %v2168_v39  ;;  %v1651_v49 = vadd.f32 %v1650_v35, %v1647_v44  ;;  %s5111_s28 = sld [smem:[#allocation10 + $0x28c]]  ;;  %v2147_v39 = vld [vmem:[#allocation13 + $0x300] sm:$0xff]  ;;  %v1681_v40 = vstv %s5091_s7 }
 0x1fb   : > { %v1266_v53 = vadd.f32 %v1265_v41, %v1263_v46  ;;  %3254 = vmatpush3.msra.mxu1 %v2152_v42  ;;  %v1482_v57 = vstv %s5095_s25  ;;  %s5115_s3 = sld [smem:[#allocation10 + $0x30c]] }
 0x1fc   : > { %3255 = vmatprep.subr.mxu1 %v2167_v47  ;;  %v1655_v59 = vadd.f32 %v1654_v45, %v1651_v49  ;;  %v1483_v62 = vmul.f32 %v1482_v57, %v3885_v36  ;;  %v1485_v3 = vstv %s5098_s27  ;;  %s5120_s12 = sld [smem:[#allocation10 + $0x38c]]  ;;  %v1678_v45 = vmul.f32 %v1677_v31, %v4134_v52 }
 0x1fd   : > { %v1267_v0 = vmax.f32 %v1266_v53, 0.0  ;;  %s5123_s11 = sld [smem:[#allocation11 + $0xe]]  ;;  %v1486_v2 = vmul.f32 %v1485_v3, %v3946_v22  ;;  %v1489_v8 = vstv %s5101_s30  ;;  %3256 = vmatpush3.msra.mxu1 %v2151_v51  ;;  %v2194_v53 = vld [vmem:[#allocation13 + $0x478] sm:$0xff]  ;;  %v2193_v3 = vld [vmem:[#allocation13 + $0x470] sm:$0xff] }
 0x1fe   : > { %v1659_v13 = vadd.f32 %v1658_v50, %v1655_v59  ;;  %v1490_v14 = vmul.f32 %v1489_v8, %v3969_v43  ;;  %v1493_v16 = vstv %s5105_s24  ;;  %s5130_s19 = sld [smem:[#allocation10 + $0x40c]]  ;;  %3257 = vmatprep.subr.mxu1 %v2166_v58  ;;  %v1682_v50 = vmul.f32 %v1681_v40, %v4144_v61  ;;  %v2209_v59 = vld [vmem:[#allocation13 + $0x4f0] sm:$0xff] }
 0x1ff   : > { %1268 = vst.msk [vmem:[#allocation2 + $0x20] sm:$0xff] %vm706_vm0, %v1267_v0  ;;  %v1487_v20 = vadd.f32 %v1486_v2, %v1483_v62  ;;  %v1494_v10 = vmul.f32 %v1493_v16, %v3984_v55  ;;  %v1497_v21 = vstv %s5108_s10  ;;  %s5136_s20 = sld [smem:[#allocation10 + $0x48c]]  ;;  %3258 = vmatpush3.msra.mxu1 %v2150_v4  ;;  %v2208_v2 = vld [vmem:[#allocation13 + $0x4e8] sm:$0xff]  ;;  %v2207_v16 = vld [vmem:[#allocation13 + $0x4e0] sm:$0xff] }
 0x200   : > { %1340 = vst.msk [vmem:[#allocation2 + $0x20] sm:$0xff] %vm779_vm1, %v1338_v19  ;;  %v1663_v25 = vadd.f32 %v1662_v60, %v1659_v13  ;;  %v1501_v28 = vstv %s5111_s28  ;;  %s5141_s26 = sld [smem:[#allocation10 + $0x50c]]  ;;  %3259 = vmatprep.subr.mxu1 %v2165_v12  ;;  %v1498_v33 = vmul.f32 %v1497_v21, %v3986_v56  ;;  %v2192_v13 = vld [vmem:[#allocation13 + $0x468] sm:$0xff] }
 0x201   : > { %v1491_v32 = vadd.f32 %v1490_v14, %v1487_v20  ;;  %s5145_s15 = sld [smem:[#allocation10 + $0x58c]]  ;;  %3260 = vmatpush3.msra.mxu1 %v2149_v18  ;;  %v1505_v38 = vstv %s5115_s3  ;;  %v1502_v42 = vmul.f32 %v1501_v28, %v3996_v63 }
 0x202   : > { %v1667_v35 = vadd.f32 %v1666_v11, %v1663_v25  ;;  %s5149_s14 = sld [smem:[#allocation10 + $0x60c]]  ;;  %3261 = vmatprep.subr.mxu1 %v2164_v24  ;;  %v1509_v46 = vstv %s5120_s12  ;;  %v1506_v48 = vmul.f32 %v1505_v38, %v4003_v5  ;;  %v2206_v24 = vld [vmem:[#allocation13 + $0x4d8] sm:$0xff]  ;;  %v2205_v38 = vld [vmem:[#allocation13 + $0x4d0] sm:$0xff] }
 0x203   : > { %v1495_v41 = vadd.f32 %v1494_v10, %v1491_v32  ;;  %s5153_s29 = sld [smem:[#allocation10 + $0x68c]]  ;;  %3262 = vmatpush3.msra.mxu1 %v2148_v29  ;;  %v1510_v57 = vmul.f32 %v1509_v46, %v4005_v6  ;;  %v1685_v4 = vstv %s5123_s11  ;;  %v1758_v29 = vpop.permute.xlu0 %1757  ;;  %v2190_v32 = vld [vmem:[#allocation13 + $0x458] sm:$0xff] }
 0x204   : > { %v1671_v44 = vadd.f32 %v1670_v27, %v1667_v35  ;;  %s5157_s17 = sld [smem:[#allocation10 + $0x70c]]  ;;  %3263 = vmatprep.subr.mxu1 %v2163_v34  ;;  %v1513_v51 = vstv %s5130_s19 }
 0x205   : > { %v1499_v47 = vadd.f32 %v1498_v33, %v1495_v41  ;;  %s5160_s23 = sld [smem:[#allocation10 + $0x78c]]  ;;  %3264 = vmatpush3.msra.mxu1 %v2147_v39  ;;  %v1517_v62 = vstv %s5136_s20  ;;  %v1514_v1 = vmul.f32 %v1513_v51, %v4007_v7 }
 0x206   : > { %v1675_v49 = vadd.f32 %v1674_v37, %v1671_v44  ;;  %s5164_s9 = sld [smem:[#allocation10 + $0x12]]  ;;  %v1521_v12 = vstv %s5141_s26  ;;  %v1518_v14 = vmul.f32 %v1517_v62, %v4083_v15 }
 0x207   : > { %v1503_v54 = vadd.f32 %v1502_v42, %v1499_v47  ;;  %v2045_v58 = vld [vmem:[#allocation2 + $0x20] sm:$0xff]  ;;  %s5167_s13 = sld [smem:[#allocation10 + $0x92]]  ;;  %v1525_v19 = vstv %s5145_s15  ;;  %v1522_v21 = vmul.f32 %v1521_v12, %v4091_v9  ;;  %v2189_v42 = vld [vmem:[#allocation13 + $0x450] sm:$0xff]  ;;  %v2202_v12 = vld [vmem:[#allocation13 + $0x4b8] sm:$0xff] }
 0x208   : > { %v1679_v60 = vadd.f32 %v1678_v45, %v1675_v49  ;;  %2423 = vmatmul.mubr.f32.vlgmr.msra.gmra.mxu0 %v2045_v58  ;;  %s5170_s8 = sld [smem:[#allocation10 + $0x112]]  ;;  %v1529_v31 = vstv %s5149_s14  ;;  %v1526_v37 = vmul.f32 %v1525_v19, %v4097_v23  ;;  %v2204_v49 = vld [vmem:[#allocation13 + $0x4c8] sm:$0xff] }
 0x209   : > { %v1507_v0 = vadd.f32 %v1506_v48, %v1503_v54  ;;  %3269 = vmatpush3.msra.mxu0 %v2194_v53  ;;  %s5174_s21 = sld [smem:[#allocation10 + $0x192]]  ;;  %v1533_v41 = vstv %s5153_s29  ;;  %v1530_v48 = vmul.f32 %v1529_v31, %v4102_v26  ;;  %v2188_v53 = vld [vmem:[#allocation13 + $0x448] sm:$0xff] }
 0x20a   : > { %v1683_v8 = vadd.f32 %v1682_v50, %v1679_v60  ;;  %3270 = vmatprep.subr.mxu0 %v2209_v59  ;;  %s5177_s22 = sld [smem:[#allocation10 + $0x212]]  ;;  %v1537_v51 = vstv %s5157_s17  ;;  %v1534_v59 = vmul.f32 %v1533_v41, %v4108_v30  ;;  %v2203_v60 = vld [vmem:[#allocation13 + $0x4c0] sm:$0xff] }
 0x20b   : > { %v1511_v11 = vadd.f32 %v1510_v57, %v1507_v0  ;;  %3271 = vmatpush3.msra.mxu0 %v2193_v3  ;;  %s5180_s18 = sld [smem:[#allocation10 + $0x292]]  ;;  %v1541_v3 = vstv %s5160_s23  ;;  %v2183_v41 = vld [vmem:[#allocation13 + $0x420] sm:$0xff] }
 0x20c   : > { %v1686_v18 = vadd.f32 %v1685_v4, %v1683_v8  ;;  %3272 = vmatprep.subr.mxu0 %v2208_v2  ;;  %v1902_v20 = vstv %s5164_s9  ;;  %s5184_s0 = sld [smem:[#allocation10 + $0x312]]  ;;  %v2187_v4 = vld [vmem:[#allocation13 + $0x440] sm:$0xff]  ;;  %v1538_v8 = vmul.f32 %v1537_v51, %v4134_v52  ;;  %v1542_v19 = vmul.f32 %v1541_v3, %v4144_v61  ;;  %v2182_v51 = vld [vmem:[#allocation13 + $0x418] sm:$0xff] }
 0x20d   : > { %v1515_v10 = vadd.f32 %v1514_v1, %v1511_v11  ;;  %3273 = vmatpush3.msra.mxu0 %v2192_v13  ;;  %v1903_v25 = vmul.f32 %v1902_v20, %v3885_v36  ;;  %v1905_v27 = vstv %s5167_s13  ;;  %s5189_s1 = sld [smem:[#allocation10 + $0x392]]  ;;  %v2186_v11 = vld [vmem:[#allocation13 + $0x438] sm:$0xff] }
 0x20e   : > { %v1687_v28 = vmax.f32 %v1686_v18, 0.0  ;;  %s5192_s4 = sld [smem:[#allocation11 + $0xc]]  ;;  %3274 = vmatprep.subr.mxu0 %v2207_v16  ;;  %v1906_v33 = vmul.f32 %v1905_v27, %v3946_v22  ;;  %v1909_v34 = vstv %s5170_s8 }
 0x20f   : > { %v1519_v35 = vadd.f32 %v1518_v14, %v1515_v10  ;;  %3275 = vmatpush3.msra.mxu0 %v2191_v17  ;;  %v1910_v39 = vmul.f32 %v1909_v34, %v3969_v43  ;;  %v1913_v40 = vstv %s5174_s21  ;;  %s5199_s5 = sld [smem:[#allocation10 + $0x412]]  ;;  %v2201_v17 = vld [vmem:[#allocation13 + $0x4b0] sm:$0xff] }
 0x210   : > { %1688 = vst.msk [vmem:[#allocation2 + $0x38] sm:$0xff] %vm706_vm0, %v1687_v28  ;;  %3276 = vmatprep.subr.mxu0 %v2206_v24  ;;  %v1907_v44 = vadd.f32 %v1906_v33, %v1903_v25  ;;  %v1914_v45 = vmul.f32 %v1913_v40, %v3984_v55  ;;  %v1917_v46 = vstv %s5177_s22  ;;  %s5205_s2 = sld [smem:[#allocation10 + $0x492]]  ;;  %v2200_v28 = vld [vmem:[#allocation13 + $0x4a8] sm:$0xff] }
 0x211   : > { %1760 = vst.msk [vmem:[#allocation2 + $0x38] sm:$0xff] %vm779_vm1, %v1758_v29  ;;  %v1523_v47 = vadd.f32 %v1522_v21, %v1519_v35  ;;  %3277 = vmatpush3.msra.mxu0 %v2190_v32  ;;  %v1921_v50 = vstv %s5180_s18  ;;  %s5210_s16 = sld [smem:[#allocation10 + $0x512]]  ;;  %v1918_v57 = vmul.f32 %v1917_v46, %v3986_v56  ;;  %v2185_v21 = vld [vmem:[#allocation13 + $0x430] sm:$0xff]  ;;  %v2184_v32 = vld [vmem:[#allocation13 + $0x428] sm:$0xff]  ;;  %v2198_v46 = vld [vmem:[#allocation13 + $0x498] sm:$0xff] }
 0x212   : > { %3278 = vmatprep.subr.mxu0 %v2205_v38  ;;  %v1911_v54 = vadd.f32 %v1910_v39, %v1907_v44  ;;  %s5214_s6 = sld [smem:[#allocation10 + $0x592]]  ;;  %v1925_v62 = vstv %s5184_s0  ;;  %v1922_v1 = vmul.f32 %v1921_v50, %v3996_v63  ;;  %v2199_v38 = vld [vmem:[#allocation13 + $0x4a0] sm:$0xff] }
 0x213   : > { %v1527_v58 = vadd.f32 %v1526_v37, %v1523_v47  ;;  %3279 = vmatpush3.msra.mxu0 %v2189_v42  ;;  %s5218_s7 = sld [smem:[#allocation10 + $0x612]]  ;;  %v1929_v13 = vstv %s5189_s1  ;;  %v1926_v16 = vmul.f32 %v1925_v62, %v4003_v5 }
 0x214   : > { %3280 = vmatprep.subr.mxu0 %v2204_v49  ;;  %v1915_v0 = vadd.f32 %v1914_v45, %v1911_v54  ;;  %s5222_s25 = sld [smem:[#allocation10 + $0x692]]  ;;  %v1930_v25 = vmul.f32 %v1929_v13, %v4005_v6  ;;  %v1545_v31 = vstv %s5192_s4  ;;  %v1618_v54 = vpop.permute.xlu1 %1617 }
 0x215   : > { %v1531_v2 = vadd.f32 %v1530_v48, %v1527_v58  ;;  %3281 = vmatpush3.msra.mxu0 %v2188_v53  ;;  %s5226_s27 = sld [smem:[#allocation10 + $0x712]]  ;;  %v1933_v20 = vstv %s5199_s5 }
 0x216   : > { %3282 = vmatprep.subr.mxu0 %v2203_v60  ;;  %v1919_v14 = vadd.f32 %v1918_v57, %v1915_v0  ;;  %s5229_s30 = sld [smem:[#allocation10 + $0x792]]  ;;  %v1937_v29 = vstv %s5205_s2  ;;  %v1934_v34 = vmul.f32 %v1933_v20, %v4007_v7  ;;  %v2197_v60 = vld [vmem:[#allocation13 + $0x490] sm:$0xff] }
 0x217   : > { %v1535_v18 = vadd.f32 %v1534_v59, %v1531_v2  ;;  %3283 = vmatpush3.msra.mxu0 %v2187_v4  ;;  %s5233_s24 = sld [smem:[#allocation10 + $0x10]]  ;;  %v1941_v37 = vstv %s5210_s16  ;;  %v1938_v40 = vmul.f32 %v1937_v29, %v4083_v15  ;;  %v2181_v0 = vld [vmem:[#allocation13 + $0x410] sm:$0xff] }
 0x218   : > { %v2048_v10 = vld [vmem:[#allocation2 + $0x38] sm:$0xff]  ;;  %3284 = vmatprep.subr.mxu0 %v2202_v12  ;;  %v1923_v24 = vadd.f32 %v1922_v1, %v1919_v14  ;;  %s5236_s10 = sld [smem:[#allocation10 + $0x90]]  ;;  %v1945_v44 = vstv %s5214_s6  ;;  %v1942_v48 = vmul.f32 %v1941_v37, %v4091_v9  ;;  %v2196_v12 = vld [vmem:[#allocation13 + $0x488] sm:$0xff] }
 0x219   : > { %v1539_v27 = vadd.f32 %v1538_v8, %v1535_v18  ;;  %2492 = vmatprep.mubr.f32.mxu1 %v2048_v10  ;;  %3285 = vmatpush3.msra.mxu0 %v2186_v11  ;;  %s5239_s28 = sld [smem:[#allocation10 + $0x110]]  ;;  %v1949_v57 = vstv %s5218_s7  ;;  %v1946_v3 = vmul.f32 %v1945_v44, %v4097_v23  ;;  %v2180_v14 = vld [vmem:[#allocation13 + $0x408] sm:$0xff] }
 0x21a   : > { %3286 = vmatprep.subr.mxu0 %v2201_v17  ;;  %v1927_v33 = vadd.f32 %v1926_v16, %v1923_v24  ;;  %s5243_s3 = sld [smem:[#allocation10 + $0x190]]  ;;  %v1953_v1 = vstv %s5222_s25 }
 0x21b   : > { %v1543_v35 = vadd.f32 %v1542_v19, %v1539_v27  ;;  %3287 = vmatpush3.msra.mxu0 %v2185_v21  ;;  %s5246_s12 = sld [smem:[#allocation10 + $0x210]]  ;;  %v1957_v16 = vstv %s5226_s27  ;;  %v2195_v19 = vld [vmem:[#allocation13 + $0x480] sm:$0xff]  ;;  %v1954_v20 = vmul.f32 %v1953_v1, %v4108_v30 }
 0x21c   : > { %3288 = vmatprep.subr.mxu0 %v2200_v28  ;;  %v1931_v39 = vadd.f32 %v1930_v25, %v1927_v33  ;;  %s5249_s11 = sld [smem:[#allocation10 + $0x290]]  ;;  %v2179_v21 = vld [vmem:[#allocation13 + $0x400] sm:$0xff]  ;;  %v1961_v24 = vstv %s5229_s30  ;;  %v1958_v29 = vmul.f32 %v1957_v16, %v4134_v52 }
 0x21d   : > { %v1546_v42 = vadd.f32 %v1545_v31, %v1543_v35  ;;  %3289 = vmatpush3.msra.mxu0 %v2184_v32  ;;  %v1762_v45 = vstv %s5233_s24  ;;  %s5253_s19 = sld [smem:[#allocation10 + $0x310]] }
 0x21e   : > { %v1935_v47 = vadd.f32 %v1934_v34, %v1931_v39  ;;  %3290 = vmatprep.subr.mxu0 %v2199_v38  ;;  %v1763_v49 = vmul.f32 %v1762_v45, %v3885_v36  ;;  %v1765_v50 = vstv %s5236_s10  ;;  %s5258_s20 = sld [smem:[#allocation10 + $0x390]]  ;;  %v1962_v34 = vmul.f32 %v1961_v24, %v4144_v61 }
 0x21f   : > { %v1547_v53 = vmax.f32 %v1546_v42, 0.0  ;;  %v1766_v58 = vmul.f32 %v1765_v50, %v3946_v22  ;;  %v1769_v59 = vstv %s5239_s28  ;;  %3291 = vmatpush3.msra.mxu0 %v2183_v41  ;;  %s5266_s26 = sld [smem:[#allocation10 + $0x410]] }
 0x220   : > { %v1939_v62 = vadd.f32 %v1938_v40, %v1935_v47  ;;  %v1770_v36 = vmul.f32 %v1769_v59, %v3969_v43  ;;  %v1773_v4 = vstv %s5243_s3  ;;  %3292 = vmatprep.subr.mxu0 %v2198_v46  ;;  %v1950_v43 = vmul.f32 %v1949_v57, %v4102_v26  ;;  %s5275_s15 = sld [smem:[#allocation10 + $0x490]]  ;;  %s3570_s3 = smov [#allocation14]  }
 0x221   : > { %1548 = vst.msk [vmem:[#allocation2 + $0x30] sm:$0xff] %vm706_vm0, %v1547_v53  ;;  %v1767_v2 = vadd.f32 %v1766_v58, %v1763_v49  ;;  %v1774_v22 = vmul.f32 %v1773_v4, %v3984_v55  ;;  %v1777_v8 = vstv %s5246_s12  ;;  %3293 = vmatpush3.msra.mxu0 %v2182_v51  ;;  %s5278_s14 = sld [smem:[#allocation11 + $0x12]]  ;;  %v2038_v53 = vpop.permute.xlu0 %2037  ;;  %s3488_s12 = sshll.u32 %s3570_s3, 4  ;;  %s3489_s12 = int_to_ptr.vmem [resolvable:$false] %s3488_s12 }
 0x222   : > { %1620 = vst.msk [vmem:[#allocation2 + $0x30] sm:$0xff] %vm779_vm1, %v1618_v54  ;;  %v1943_v13 = vadd.f32 %v1942_v48, %v1939_v62  ;;  %v1781_v11 = vstv %s5249_s11  ;;  %3294 = vmatprep.subr.mxu0 %v2197_v60  ;;  %v1778_v55 = vmul.f32 %v1777_v8, %v3986_v56  ;;  %s5283_s29 = sld [smem:[#allocation10 + $0x510]]  ;;  %s3490_s11 = scalar_lea.vmem %s3489_s12, 256 }
 0x223   : > { %v1771_v18 = vadd.f32 %v1770_v36, %v1767_v2  ;;  %3295 = vmatpush3.msra.mxu0 %v2181_v0  ;;  %v1785_v10 = vstv %s5253_s19  ;;  %v1782_v27 = vmul.f32 %v1781_v11, %v3996_v63  ;;  %s5289_s17 = sld [smem:[#allocation10 + $0x590]] }
 0x224   : > { %v1947_v17 = vadd.f32 %v1946_v3, %v1943_v13  ;;  %3296 = vmatprep.subr.mxu0 %v2196_v12  ;;  %v1789_v56 = vstv %s5258_s20  ;;  %v1786_v32 = vmul.f32 %v1785_v10, %v4003_v5  ;;  %s3067_s23 = sld [smem:[#allocation10 + $0x610]] }
 0x225   : > { %v1775_v25 = vadd.f32 %v1774_v22, %v1771_v18  ;;  %3297 = vmatpush3.msra.mxu0 %v2180_v14  ;;  %v1793_v35 = vstv %s5266_s26  ;;  %v1790_v38 = vmul.f32 %v1789_v56, %v4005_v6  ;;  %s3068_s9 = sld [smem:[#allocation10 + $0x690]] }
 0x226   : > { %v1951_v28 = vadd.f32 %v1950_v43, %v1947_v17  ;;  %3298 = vmatprep.subr.mxu0 %v2195_v19  ;;  %v1797_v40 = vstv %s5275_s15  ;;  %v1794_v5 = vmul.f32 %v1793_v35, %v4007_v7  ;;  %s3069_s13 = sld [smem:[#allocation10 + $0x710]] }
 0x227   : > { %v1779_v31 = vadd.f32 %v1778_v55, %v1775_v25  ;;  %3299 = vmatpush3.msra.mxu0 %v2179_v21  ;;  %v1965_v41 = vstv %s5278_s14  ;;  %v1798_v47 = vmul.f32 %v1797_v40, %v4083_v15  ;;  %s3070_s8 = sld [smem:[#allocation10 + $0x790]] }
 0x228   : > { %v1955_v33 = vadd.f32 %v1954_v20, %v1951_v28  ;;  %v1801_v45 = vstv %s5283_s29  ;;  %s3071_s21 = sld [smem:[#allocation11 + $0x10]] }
 0x229   : > { %v2047_v63 = vld [vmem:[#allocation2 + $0x30] sm:$0xff]  ;;  %v1783_v37 = vadd.f32 %v1782_v27, %v1779_v31  ;;  %v1805_v49 = vstv %s5289_s17  ;;  %v1802_v6 = vmul.f32 %v1801_v45, %v4091_v9  ;;  %s5420_s22 = sld [smem:[#allocation29_spill]] }
 0x22a   : > { %2493 = vmatmul.mubr.f32.vlgmr.msra.gmra.mxu1 %v2047_v63  ;;  %v1959_v39 = vadd.f32 %v1958_v29, %v1955_v33  ;;  %v1809_v54 = vstv %s3067_s23  ;;  %v1806_v58 = vmul.f32 %v1805_v49, %v4097_v23  ;;  %s5421_s1 = sld [smem:[#allocation39_spill]] }
 0x22b   : > { %v1787_v42 = vadd.f32 %v1786_v32, %v1783_v37  ;;  %v1813_v7 = vstv %s3068_s9  ;;  %v1810_v15 = vmul.f32 %v1809_v54, %v4102_v26  ;;  %v1898_v26 = vpop.permute.xlu1 %1897  ;;  %s5422_s4 = sld [smem:[#allocation24_spill]] }
 0x22c   : > { %v1963_v44 = vadd.f32 %v1962_v34, %v1959_v39  ;;  %v1817_v60 = vstv %s3069_s13  ;;  %v1814_v3 = vmul.f32 %v1813_v7, %v4108_v30  ;;  %s5423_s2 = sld [smem:[#allocation27_spill]] }
 0x22d   : > { %v1791_v46 = vadd.f32 %v1790_v38, %v1787_v42  ;;  %v1821_v9 = vstv %s3070_s8  ;;  %v1818_v4 = vmul.f32 %v1817_v60, %v4134_v52  ;;  %s5424_s30 = sld [smem:[#allocation40_spill]] }
 0x22e   : > { %v1966_v48 = vadd.f32 %v1965_v41, %v1963_v44  ;;  %v1822_v23 = vmul.f32 %v1821_v9, %v4144_v61  ;;  %v1825_v22 = vstv %s3071_s21 }
 0x22f   : > { %v1795_v50 = vadd.f32 %v1794_v5, %v1791_v46  ;;  %s2720_s5 = sshll.u32 %s5420_s22, 3  ;;  %s2572_s10 = scalar_lea.sflag [#allocation6], %s5420_s22 }
 0x230   : > { %v1967_v51 = vmax.f32 %v1966_v48, 0.0  ;;  %v3123_v16 = vld [vmem:[%s5421_s1] ss:$0 sm:$0xff]  ;;  %s388_s6 = scalar_lea.vmem [#allocation14], %s2720_s5 }
 0x231   : > { %v1799_v57 = vadd.f32 %v1798_v47, %v1795_v50  ;;  %s3125_s16 = sshll.u32 %s5422_s4, 7  ;;  %s2585_s7 = sshll.u32 %s388_s6, 4  ;;  %s2586_s7 = int_to_ptr.vmem [resolvable:$true] %s2585_s7 }
 0x232   : > { %1968 = vst.msk [vmem:[#allocation2 + $0x48] sm:$0xff] %vm706_vm0, %v1967_v51  ;;  %s3484_s28 = scalar_lea.vmem %s2586_s7, 128  ;;  %p5425_p8 = scmp.ne.s32.totalorder %s5423_s2, 0 }
 0x233   : > { %2040 = vst.msk [vmem:[#allocation2 + $0x48] sm:$0xff] %vm779_vm1, %v2038_v53  ;;  %v1803_v59 = vadd.f32 %v1802_v6, %v1799_v57  ;;  %s2583_s24 = scalar_lea.hbm %s5424_s30, %s3125_s16  ;;  %p3485_p7 = scmp.ne.s32.totalorder %s2586_s7, %s3484_s28 }
 0x234   : > { %p3491_p0 = scmp.lt.s32.totalorder %s2586_s7, %s3489_s12  ;;  %p3492_p1 = scmp.lt.s32.totalorder %s3490_s11, %s3484_s28 }
 0x235   : > { %v1807_v62 = vadd.f32 %v1806_v58, %v1803_v59  ;;  %p3486_p9 = pnand %p3485_p7, %p5425_p8 }
 0x236   : > { %p3493_p3 = por %p3492_p1, %p3491_p0 }
 0x237   : > { %v1811_v36 = vadd.f32 %v1810_v15, %v1807_v62  ;;  %p3487_p2 = pneg %p3486_p9 }
 0x239   : > { %v1815_v0 = vadd.f32 %v1814_v3, %v1811_v36  ;;  %p3494_p11 = pnand %p3493_p3, %p3487_p2 }
 0x23a   : > { %v2050_v1 = vld [vmem:[#allocation2 + $0x48] sm:$0xff] }
 0x23b   : > { %v1819_v2 = vadd.f32 %v1818_v4, %v1815_v0  ;;  %2562 = vmatprep.mubr.f32.mxu0 %v2050_v1 }
 0x23d   : > { %v1823_v8 = vadd.f32 %v1822_v23, %v1819_v2 }
 0x23f   : > { %v1826_v12 = vadd.f32 %v1825_v22, %v1823_v8 }
 0x241   : > { %v1827_v13 = vmax.f32 %v1826_v12, 0.0 }
 0x243   : > { %1828 = vst.msk [vmem:[#allocation2 + $0x40] sm:$0xff] %vm706_vm0, %v1827_v13 }
 0x244   : > { %1900 = vst.msk [vmem:[#allocation2 + $0x40] sm:$0xff] %vm779_vm1, %v1898_v26 }
 0x24b   : > { %v2049_v30 = vld [vmem:[#allocation2 + $0x40] sm:$0xff] }
 0x24c   : > { %2563 = vmatmul.mubr.f32.vlgmr.msra.gmra.mxu0 %v2049_v30 }
 0x295   : > { %v3160_v43 = vpop.f32.mrf.mxu0 }
 0x297   : > { %v3161_v52 = vpop.f32.mrf.mxu0 }
 0x298   : > { %v3162_v61 = vadd.f32 %v3161_v52, %v3160_v43 }
 0x29a   : > { %v2285_v17 = vadd.f32 %v3162_v61, %v3123_v16 }
 0x2a6   : > { %v3195_v11 = vpop.f32.mrf.mxu1 }
 0x2a8   : > { %v3196_v18 = vpop.f32.mrf.mxu1 }
 0x2a9   : > { %v3197_v20 = vadd.f32 %v3196_v18, %v3195_v11 }
 0x2ab   : > { %v2355_v24 = vadd.f32 %v3197_v20, %v2285_v17 }
 0x2c8   : > { %v3230_v14 = vpop.f32.mrf.mxu0 }
 0x2ca   : > { %v3231_v55 = vpop.f32.mrf.mxu0 }
 0x2cb   : > { %v3232_v10 = vadd.f32 %v3231_v55, %v3230_v14 }
 0x2cd   : > { %v2425_v25 = vadd.f32 %v3232_v10, %v2355_v24 }
 0x2ea   : > { %v3265_v19 = vpop.f32.mrf.mxu1 }
 0x2ec   : > { %v3266_v21 = vpop.f32.mrf.mxu1 }
 0x2ed   : > { %v3267_v27 = vadd.f32 %v3266_v21, %v3265_v19 }
 0x2ef   : > { %v2495_v56 = vadd.f32 %v3267_v27, %v2425_v25 }
 0x30c   : > { %v3300_v28 = vpop.f32.mrf.mxu0 }
 0x30e   : > { %v3301_v29 = vpop.f32.mrf.mxu0 }
 0x30f   : > { %v3302_v31 = vadd.f32 %v3301_v29, %v3300_v28 }
 0x311   : > { %v2565_v32 = vadd.f32 %v3302_v31, %v2495_v56 }
 0x313   : > { %v2568_v33 = vmax.f32 %v2565_v32, 0.0 }
 0x315   : > { %2570 = vst.msk [vmem:[%s388_s6] sm:$0xff] %vm2569_vm2, %v2568_v33 }
 0x316   : > { %3497 = shalt.err (!%p3494_p11)
}
 0x317   : > { %s3498_s19 = scalar_lea.hbm %s2583_s24, 128  ;;  %s3502_s15 = scalar_lea.hbm %s5424_s30, 256 }
 0x318   : > { %p3499_p10 = scmp.ne.s32.totalorder %s2583_s24, %s3498_s19  ;;  %p3503_p6 = scmp.lt.s32.totalorder %s2583_s24, %s5424_s30 }
 0x319   : > { %p3504_p12 = scmp.lt.s32.totalorder %s3502_s15, %s3498_s19 }
 0x31a   : > { %p3500_p4 = pnand %p3499_p10, %p5425_p8 }
 0x31b   : > { %p3505_p7 = por %p3504_p12, %p3503_p6 }
 0x31c   : > { %p3501_p5 = pneg %p3500_p4 }
 0x31e   : > { %p3506_p9 = pnand %p3505_p7, %p3501_p5 }
 0x320   : > { %3509 = shalt.err (!%p3506_p9)
}
 0x321   : > { %3325 = dma.vmem_to_hbm [thread:$0]  (%p5425_p8), %s2586_s7, 128, %s2583_s24, %s2572_s10  }
 0x322 PF: > { %s5426_s17 = sld [smem:[#allocation20_spill]] }
 0x323   : > { %s5427_s23 = sld [smem:[#allocation28_spill]] }
 0x328   : > { %s2597_s13 = sand.u32 1, %s5426_s17  }
 0x329   : > { %p5429_p2 = scmp.ne.s32.totalorder %s5427_s23, 0  ;;  %s2598_s8 = scalar_lea.sflag [#allocation6], %s2597_s13 }
 0x32b   : > { %p3344_p0 = pnand %p2712_p13, %p5429_p2 }
 0x32d   : > { %p3345_p1 = pneg %p3344_p0 }
 0x32f   : > { %3543 = dma.done.wait (%p3345_p1), %s2598_s8, 128  }
 0x330   : > { %3545 = vsyncadd (%p3345_p1), %s2598_s8, 4294967168  ;;  %s5430_s27 = sld [smem:[#allocation25_spill]] }
 0x331   : > { %s5431_s24 = sld [smem:[#allocation21_spill]] }
 0x332   : > { %s5432_s25 = sld [smem:[#allocation22_spill]] }
 0x333   : > { %s5433_s26 = sld [smem:[#allocation26_spill]] }
 0x336   : > { %p21_p3 = scmp.ge.s32.totalorder %s5430_s27, 4  }
 0x338   :  { %23 = sbr.rel (!%p21_p3) target bundleno = 16 (0x10), region = 151 }
 0x33d   :  { %2603 = vsyncpa [#allocation5], 1 }
 0x33e   :  { %2605 = vsyncpa [#allocation5 + $0x1], 1 }
 0x33f   :  { %2606 = vsyncpa [#allocation6], 1 }
 0x340   :  { %2608 = vsyncpa [#allocation6 + $0x1], 1 }
 0x341   :  { %2609 = vsyncpa [#allocation7], 1 }
 0x342   :  { %2611 = vsyncpa [#allocation7 + $0x1], 1 }
 0x343   :  { %2612 = vsyncpa [#allocation9], 1 }
 0x344   :  { %2613 = vsyncpa [#allocation12], 1 }

</bundles_post_ra>
